<compile_context>
chip_gen: v5e
topology: v5e:2x2
jax: 0.10.0
libtpu: 0.0.40
codegen_flags: <defaults>
</compile_context>

<pallas_src>
import numpy as np
import jax
import jax.numpy as jnp
from jax.experimental import pallas as pl
from jax.experimental.pallas import tpu as pltpu

D = 256          # padded hidden width of the fused layers
DIN = 128        # padded input / output lane width
N_LAYERS = 7     # fused layer count
H = 100          # per-branch head hidden width
T_COL = 200      # column of the t-logit inside the fused heads_a output


# --------------------------------------------------------------------------
# Parameter construction (deterministic, synthetic — mirrors __init__ shapes)
# --------------------------------------------------------------------------
def _xavier_uniform(key, fan_in, fan_out, dtype=jnp.float32):
    bound = jnp.sqrt(6.0 / (fan_in + fan_out))
    # stored as (in, out) so the math is x @ W + b
    return jax.random.uniform(key, (fan_in, fan_out), dtype, -bound, bound)


def _bias(key, fan_in, fan_out, dtype=jnp.float32):
    # PyTorch Linear default bias init: U(-1/sqrt(fan_in), 1/sqrt(fan_in))
    bound = 1.0 / jnp.sqrt(jnp.float32(fan_in))
    return jax.random.uniform(key, (1, fan_out), dtype, -bound, bound)


def make_params(seed=0):
    layer_dims = [
        ("dense", 25, 25),
        ("rep_fc1", 25, 200),
        ("rep_fc2", 200, 200),
        ("rep_fc3", 200, 200),
        ("t_predictions", 200, 1),
        ("y0_hidden_fc1", 200, 100),
        ("y0_hidden_fc2", 100, 100),
        ("y1_hidden_fc1", 200, 100),
        ("y1_hidden_fc2", 100, 100),
        ("y0_predictions", 100, 1),
        ("y1_predictions", 100, 1),
        ("epsilon", 1, 1),
    ]
    key = jax.random.PRNGKey(seed)
    params = {}
    for name, fi, fo in layer_dims:
        key, kw, kb = jax.random.split(key, 3)
        params[name] = (_xavier_uniform(kw, fi, fo), _bias(kb, fi, fo))
    return params


# --------------------------------------------------------------------------
# Host-side packing: fuse heads + pad everything to 256 and stack into slabs
# --------------------------------------------------------------------------
def pack_params(params, weights_dtype=jnp.bfloat16):
    """Returns (w_slab (L,256,256), b_slab (L,1,256) f32, eps (2,) f32)."""
    def w(name):
        return np.asarray(params[name][0], np.float32)   # (in, out)

    def b(name):
        return np.asarray(params[name][1], np.float32).reshape(-1)  # (out,)

    W = np.zeros((N_LAYERS, D, D), np.float32)
    Bv = np.zeros((N_LAYERS, 1, D), np.float32)

    def put(i, weight, bias, r0=0, c0=0):
        fi, fo = weight.shape
        W[i, r0:r0 + fi, c0:c0 + fo] = weight
        Bv[i, 0, c0:c0 + fo] = bias

    # shared representation
    put(0, w("dense"), b("dense"))
    put(1, w("rep_fc1"), b("rep_fc1"))
    put(2, w("rep_fc2"), b("rep_fc2"))
    put(3, w("rep_fc3"), b("rep_fc3"))
    # fused heads, layer A: columns [0:100)=y0h1, [100:200)=y1h1, [200]=t_logit
    put(4, w("y0_hidden_fc1"), b("y0_hidden_fc1"), 0, 0)
    put(4, w("y1_hidden_fc1"), b("y1_hidden_fc1"), 0, H)
    put(4, w("t_predictions"), b("t_predictions"), 0, T_COL)
    # fused heads, layer B: block-diagonal over the 100/100 split
    put(5, w("y0_hidden_fc2"), b("y0_hidden_fc2"), 0, 0)
    put(5, w("y1_hidden_fc2"), b("y1_hidden_fc2"), H, H)
    # fused prediction heads: col 0 = y0_predict, col 1 = y1_predict
    put(6, w("y0_predictions"), b("y0_predictions"), 0, 0)
    put(6, w("y1_predictions"), b("y1_predictions"), H, 1)

    eps = np.array([w("epsilon").reshape(())[()],
                    b("epsilon").reshape(-1)[0]], np.float32)   # (2,) scalars

    return (jnp.asarray(W, dtype=weights_dtype),
            jnp.asarray(Bv, jnp.float32),
            jnp.asarray(eps, jnp.float32))


# --------------------------------------------------------------------------
# Pallas kernel: the entire (fused) DragonNet forward pass for one batch tile
# --------------------------------------------------------------------------
def dragonnet_kernel(x_ref, w_ref, b_ref, eps_ref, out_ref):
    def matmul(h, w):
        # cast activations to the weight dtype (bf16 by default) at the MXU
        # feed; accumulate in f32.
        return jnp.dot(h.astype(w.dtype), w, preferred_element_type=jnp.float32)

    def elu(v):
        # clamp the exp argument so the dead branch never produces inf.
        return jnp.where(v > 0.0, v, jnp.exp(jnp.minimum(v, 0.0)) - 1.0)

    x = x_ref[...]                                             # (TB, 128) f32

    # shared representation (layers 0/1 use only the first 128 input lanes)
    h = jnp.tanh(matmul(x, w_ref[0, :DIN, :DIN]) + b_ref[0, :, :DIN])   # (TB,128)
    h = jax.nn.relu(matmul(h, w_ref[1, :DIN, :]) + b_ref[1])            # (TB,256)
    h = jax.nn.relu(matmul(h, w_ref[2]) + b_ref[2])
    h = jax.nn.relu(matmul(h, w_ref[3]) + b_ref[3])

    # fused heads layer A: cols [0:100)=y0_h1, [100:200)=y1_h1, [200]=t_logit
    za = matmul(h, w_ref[4]) + b_ref[4]                                 # (TB,256)
    t_predict = jax.nn.sigmoid(za[:, T_COL:T_COL + 1])                  # (TB,1)

    ha = elu(za)                          # t / pad cols killed by zero rows in layer B
    hb = elu(matmul(ha, w_ref[5]) + b_ref[5])                           # (TB,256)

    # fused prediction heads: lane 0 = y0_predict, lane 1 = y1_predict
    zp = matmul(hb, w_ref[6, :, :DIN]) + b_ref[6, :, :DIN]              # (TB,128)

    # epsilon Linear(1,1) as a scalar FMA (scalars live in SMEM)
    epsilons = t_predict * eps_ref[0] + eps_ref[1]                      # (TB,1)

    # lane-dense epilogue: zp already carries lanes 0/1; select t_predict into
    # lane 2 and epsilons into lane 3, then do ONE unmasked (TB,128) store.
    lane = jax.lax.broadcasted_iota(jnp.int32, zp.shape, dimension=1)
    out = jnp.where(lane == 2, t_predict, zp)
    out = jnp.where(lane == 3, epsilons, out)
    out_ref[...] = out


# --------------------------------------------------------------------------
# Wrapper
# --------------------------------------------------------------------------
def _round_up(a, m):
    return ((a + m - 1) // m) * m


def _pallas_forward(xp, w_slab, b_slab, eps, TB, Bp, single_buffer_resident):
    resident_kwargs = (
        dict(pipeline_mode=pl.Buffered(1)) if single_buffer_resident else {})
    in_specs = [
        pl.BlockSpec((TB, DIN), lambda i: (i, 0)),                         # x tile
        pl.BlockSpec((N_LAYERS, D, D), lambda i: (0, 0, 0), **resident_kwargs),
        pl.BlockSpec((N_LAYERS, 1, D), lambda i: (0, 0, 0), **resident_kwargs),
        pl.BlockSpec(memory_space=pltpu.MemorySpace.SMEM),                 # eps scalars
    ]
    return pl.pallas_call(
        dragonnet_kernel,
        out_shape=jax.ShapeDtypeStruct((Bp, DIN), jnp.float32),
        grid=(Bp // TB,),
        in_specs=in_specs,
        out_specs=pl.BlockSpec((TB, DIN), lambda i: (i, 0)),
        compiler_params=pltpu.CompilerParams(
            dimension_semantics=("parallel",)),
    )(xp, w_slab, b_slab, eps)


def dragonnet_forward(x, params, *, block_b=1024, weights_dtype=jnp.bfloat16):
    B, F = x.shape
    assert F <= DIN
    w_slab, b_slab, eps = pack_params(params, weights_dtype)

    # Batch tile: multiple of 16 (bf16 sublane packing).  Big tiles amortize
    # per-grid-step overhead; cap TB so the grid keeps >= 2 steps whenever the
    # batch allows it (so both v7x TensorCores get work).
    B16 = _round_up(B, 16)
    TB = min(_round_up(block_b, 16), B16)
    if TB == B16 and B16 >= 32:
        TB = _round_up(pl.cdiv(B16, 2), 16)
    Bp = _round_up(B16, TB)

    # pad features to 128 lanes with explicit zeros; batch to next TB multiple
    # (padded rows never mix with valid rows — contraction is over features).
    xp = jnp.zeros((Bp, DIN), jnp.float32).at[:B, :F].set(x.astype(jnp.float32))

    try:
        out = _pallas_forward(xp, w_slab, b_slab, eps, TB, Bp, True)
    except Exception:
        # pipeline_mode=pl.Buffered(1) not supported by this JAX build —
        # fall back to default (double-buffered) resident specs.
        out = _pallas_forward(xp, w_slab, b_slab, eps, TB, Bp, False)
    return out[:B, :4]


# --------------------------------------------------------------------------
# Pure-JAX reference (unfused, unpadded) for a sanity check
# --------------------------------------------------------------------------
def dragonnet_ref(x, params):
    def lin(h, name):
        w, b = params[name]
        return h @ w + b

    def elu(v):
        return jnp.where(v > 0.0, v, jnp.exp(jnp.minimum(v, 0.0)) - 1.0)

    h = jnp.tanh(lin(x.astype(jnp.float32), "dense"))
    h = jax.nn.relu(lin(h, "rep_fc1"))
    h = jax.nn.relu(lin(h, "rep_fc2"))
    h = jax.nn.relu(lin(h, "rep_fc3"))
    t = jax.nn.sigmoid(lin(h, "t_predictions"))
    y0 = elu(lin(h, "y0_hidden_fc1")); y0 = elu(lin(y0, "y0_hidden_fc2"))
    y1 = elu(lin(h, "y1_hidden_fc1")); y1 = elu(lin(y1, "y1_hidden_fc2"))
    return jnp.concatenate(
        [lin(y0, "y0_predictions"), lin(y1, "y1_predictions"), t, lin(t, "epsilon")],
        axis=-1)


if __name__ == "__main__":
    params = make_params(seed=0)

    # small batch, default bf16-weight path (loose tolerance)
    x = jax.random.normal(jax.random.PRNGKey(0), (8, 25), dtype=jnp.float32)
    ref = dragonnet_ref(x, params)
    out = jax.block_until_ready(dragonnet_forward(x, params))
    assert out.shape == (8, 4), out.shape
    assert jnp.allclose(out, ref, atol=3e-2, rtol=3e-2), (out, ref)

    # f32-weight path: tight check against the reference
    out32 = jax.block_until_ready(
        dragonnet_forward(x, params, weights_dtype=jnp.float32))
    assert jnp.allclose(out32, ref, atol=1e-3, rtol=1e-3), (out32, ref)

    # larger non-multiple batch: exercises the 2-step grid + padding path
    xb = jax.random.normal(jax.random.PRNGKey(1), (300, 25), dtype=jnp.float32)
    refb = dragonnet_ref(xb, params)
    outb = jax.block_until_ready(dragonnet_forward(xb, params))
    assert outb.shape == (300, 4), outb.shape
    assert jnp.allclose(outb, refb, atol=3e-2, rtol=3e-2)

    # explicit small block_b (>2 grid steps), f32 weights, tight check
    outb32 = jax.block_until_ready(
        dragonnet_forward(xb, params, block_b=128, weights_dtype=jnp.float32))
    assert jnp.allclose(outb32, refb, atol=1e-3, rtol=1e-3)

    print("KERNEL_OK")
</pallas_src>

<mosaic_0001>
module attributes {stable_mosaic.version = 11 : i64} {
  func.func @dragonnet_kernel(%arg0: i32, %arg1: memref<16x128xf32, #tpu.memory_space<vmem>>, %arg2: memref<7x256x256xbf16, #tpu.memory_space<vmem>>, %arg3: memref<7x1x256xf32, #tpu.memory_space<vmem>>, %arg4: memref<2xf32, #tpu.memory_space<smem>>, %arg5: memref<16x128xf32, #tpu.memory_space<vmem>>) attributes {dimension_semantics = [#tpu.dimension_semantics<parallel>], iteration_bounds = array<i64: 1>, scalar_prefetch = 0 : i64, scratch_operands = 0 : i64, tpu.core_type = #tpu.core_type<tc>, window_params = [{transform_indices = @transform_0, window_bounds = array<i64: 16, 128>}, {pipeline_mode = #tpu.pipeline_mode<synchronous>, transform_indices = @transform_1, window_bounds = array<i64: 7, 256, 256>}, {pipeline_mode = #tpu.pipeline_mode<synchronous>, transform_indices = @transform_2, window_bounds = array<i64: 7, 1, 256>}, {transform_indices = @transform_3, window_bounds = array<i64: 2>}, {transform_indices = @transform_4, window_bounds = array<i64: 16, 128>}]} {
    %c0 = arith.constant 0 : index
    %c0_0 = arith.constant 0 : index
    %0 = vector.load %arg1[%c0, %c0_0] : memref<16x128xf32, #tpu.memory_space<vmem>>, vector<16x128xf32>
    %c0_1 = arith.constant 0 : index
    %c0_2 = arith.constant 0 : index
    %c0_3 = arith.constant 0 : index
    %1 = vector.load %arg2[%c0_1, %c0_2, %c0_3] : memref<7x256x256xbf16, #tpu.memory_space<vmem>>, vector<1x128x128xbf16>
    %2 = vector.shape_cast %1 : vector<1x128x128xbf16> to vector<128x128xbf16>
    %3 = arith.truncf %0 : vector<16x128xf32> to vector<16x128xbf16>
    %cst = arith.constant dense<0.000000e+00> : vector<16x128xf32>
    %4 = tpu.matmul %3, %2, %cst {dimension_numbers = #tpu.dot_dimension_numbers<[1], [0], [0], [1], [0, 0, 1, 1], [], []>} : vector<16x128xbf16>, vector<128x128xbf16>, vector<16x128xf32> -> vector<16x128xf32>
    %c0_4 = arith.constant 0 : index
    %c0_5 = arith.constant 0 : index
    %c0_6 = arith.constant 0 : index
    %5 = vector.load %arg3[%c0_4, %c0_5, %c0_6] : memref<7x1x256xf32, #tpu.memory_space<vmem>>, vector<1x1x128xf32>
    %6 = vector.shape_cast %5 : vector<1x1x128xf32> to vector<1x128xf32>
    %7 = vector.broadcast %6 : vector<1x128xf32> to vector<16x128xf32>
    %8 = arith.addf %4, %7 : vector<16x128xf32>
    %9 = math.tanh %8 : vector<16x128xf32>
    %c1 = arith.constant 1 : index
    %c0_7 = arith.constant 0 : index
    %c0_8 = arith.constant 0 : index
    %10 = vector.load %arg2[%c1, %c0_7, %c0_8] : memref<7x256x256xbf16, #tpu.memory_space<vmem>>, vector<1x128x256xbf16>
    %11 = vector.shape_cast %10 : vector<1x128x256xbf16> to vector<128x256xbf16>
    %12 = arith.truncf %9 : vector<16x128xf32> to vector<16x128xbf16>
    %cst_9 = arith.constant dense<0.000000e+00> : vector<16x256xf32>
    %13 = tpu.matmul %12, %11, %cst_9 {dimension_numbers = #tpu.dot_dimension_numbers<[1], [0], [0], [1], [0, 0, 1, 1], [], []>} : vector<16x128xbf16>, vector<128x256xbf16>, vector<16x256xf32> -> vector<16x256xf32>
    %c1_10 = arith.constant 1 : index
    %c0_11 = arith.constant 0 : index
    %c0_12 = arith.constant 0 : index
    %14 = vector.load %arg3[%c1_10, %c0_11, %c0_12] : memref<7x1x256xf32, #tpu.memory_space<vmem>>, vector<1x1x256xf32>
    %15 = vector.shape_cast %14 : vector<1x1x256xf32> to vector<1x256xf32>
    %16 = vector.broadcast %15 : vector<1x256xf32> to vector<16x256xf32>
    %17 = arith.addf %13, %16 : vector<16x256xf32>
    %cst_13 = arith.constant 0.000000e+00 : f32
    %18 = vector.broadcast %cst_13 : f32 to vector<16x256xf32>
    %19 = arith.maximumf %17, %18 : vector<16x256xf32>
    %c2 = arith.constant 2 : index
    %c0_14 = arith.constant 0 : index
    %c0_15 = arith.constant 0 : index
    %20 = vector.load %arg2[%c2, %c0_14, %c0_15] : memref<7x256x256xbf16, #tpu.memory_space<vmem>>, vector<1x256x256xbf16>
    %21 = vector.shape_cast %20 : vector<1x256x256xbf16> to vector<256x256xbf16>
    %22 = arith.truncf %19 : vector<16x256xf32> to vector<16x256xbf16>
    %cst_16 = arith.constant dense<0.000000e+00> : vector<16x256xf32>
    %23 = tpu.matmul %22, %21, %cst_16 {dimension_numbers = #tpu.dot_dimension_numbers<[1], [0], [0], [1], [0, 0, 1, 1], [], []>} : vector<16x256xbf16>, vector<256x256xbf16>, vector<16x256xf32> -> vector<16x256xf32>
    %c2_17 = arith.constant 2 : index
    %c0_18 = arith.constant 0 : index
    %c0_19 = arith.constant 0 : index
    %24 = vector.load %arg3[%c2_17, %c0_18, %c0_19] : memref<7x1x256xf32, #tpu.memory_space<vmem>>, vector<1x1x256xf32>
    %25 = vector.shape_cast %24 : vector<1x1x256xf32> to vector<1x256xf32>
    %26 = vector.broadcast %25 : vector<1x256xf32> to vector<16x256xf32>
    %27 = arith.addf %23, %26 : vector<16x256xf32>
    %cst_20 = arith.constant 0.000000e+00 : f32
    %28 = vector.broadcast %cst_20 : f32 to vector<16x256xf32>
    %29 = arith.maximumf %27, %28 : vector<16x256xf32>
    %c3 = arith.constant 3 : index
    %c0_21 = arith.constant 0 : index
    %c0_22 = arith.constant 0 : index
    %30 = vector.load %arg2[%c3, %c0_21, %c0_22] : memref<7x256x256xbf16, #tpu.memory_space<vmem>>, vector<1x256x256xbf16>
    %31 = vector.shape_cast %30 : vector<1x256x256xbf16> to vector<256x256xbf16>
    %32 = arith.truncf %29 : vector<16x256xf32> to vector<16x256xbf16>
    %cst_23 = arith.constant dense<0.000000e+00> : vector<16x256xf32>
    %33 = tpu.matmul %32, %31, %cst_23 {dimension_numbers = #tpu.dot_dimension_numbers<[1], [0], [0], [1], [0, 0, 1, 1], [], []>} : vector<16x256xbf16>, vector<256x256xbf16>, vector<16x256xf32> -> vector<16x256xf32>
    %c3_24 = arith.constant 3 : index
    %c0_25 = arith.constant 0 : index
    %c0_26 = arith.constant 0 : index
    %34 = vector.load %arg3[%c3_24, %c0_25, %c0_26] : memref<7x1x256xf32, #tpu.memory_space<vmem>>, vector<1x1x256xf32>
    %35 = vector.shape_cast %34 : vector<1x1x256xf32> to vector<1x256xf32>
    %36 = vector.broadcast %35 : vector<1x256xf32> to vector<16x256xf32>
    %37 = arith.addf %33, %36 : vector<16x256xf32>
    %cst_27 = arith.constant 0.000000e+00 : f32
    %38 = vector.broadcast %cst_27 : f32 to vector<16x256xf32>
    %39 = arith.maximumf %37, %38 : vector<16x256xf32>
    %c4 = arith.constant 4 : index
    %c0_28 = arith.constant 0 : index
    %c0_29 = arith.constant 0 : index
    %40 = vector.load %arg2[%c4, %c0_28, %c0_29] : memref<7x256x256xbf16, #tpu.memory_space<vmem>>, vector<1x256x256xbf16>
    %41 = vector.shape_cast %40 : vector<1x256x256xbf16> to vector<256x256xbf16>
    %42 = arith.truncf %39 : vector<16x256xf32> to vector<16x256xbf16>
    %cst_30 = arith.constant dense<0.000000e+00> : vector<16x256xf32>
    %43 = tpu.matmul %42, %41, %cst_30 {dimension_numbers = #tpu.dot_dimension_numbers<[1], [0], [0], [1], [0, 0, 1, 1], [], []>} : vector<16x256xbf16>, vector<256x256xbf16>, vector<16x256xf32> -> vector<16x256xf32>
    %c4_31 = arith.constant 4 : index
    %c0_32 = arith.constant 0 : index
    %c0_33 = arith.constant 0 : index
    %44 = vector.load %arg3[%c4_31, %c0_32, %c0_33] : memref<7x1x256xf32, #tpu.memory_space<vmem>>, vector<1x1x256xf32>
    %45 = vector.shape_cast %44 : vector<1x1x256xf32> to vector<1x256xf32>
    %46 = vector.broadcast %45 : vector<1x256xf32> to vector<16x256xf32>
    %47 = arith.addf %43, %46 : vector<16x256xf32>
    %48 = vector.extract_strided_slice %47 {offsets = [0, 200], sizes = [16, 1], strides = [1, 1]} : vector<16x256xf32> to vector<16x1xf32>
    %49 = arith.negf %48 : vector<16x1xf32>
    %50 = math.exp %49 : vector<16x1xf32>
    %cst_34 = arith.constant 1.000000e+00 : f32
    %51 = vector.broadcast %cst_34 : f32 to vector<16x1xf32>
    %52 = arith.addf %51, %50 : vector<16x1xf32>
    %53 = arith.divf %51, %52 : vector<16x1xf32>
    %cst_35 = arith.constant 0.000000e+00 : f32
    %54 = vector.broadcast %cst_35 : f32 to vector<16x256xf32>
    %55 = arith.cmpf ogt, %47, %54 : vector<16x256xf32>
    %cst_36 = arith.constant 0.000000e+00 : f32
    %56 = vector.broadcast %cst_36 : f32 to vector<16x256xf32>
    %57 = arith.minimumf %47, %56 : vector<16x256xf32>
    %58 = math.exp %57 : vector<16x256xf32>
    %cst_37 = arith.constant 1.000000e+00 : f32
    %59 = vector.broadcast %cst_37 : f32 to vector<16x256xf32>
    %60 = arith.subf %58, %59 : vector<16x256xf32>
    %61 = arith.select %55, %47, %60 : vector<16x256xi1>, vector<16x256xf32>
    %c5 = arith.constant 5 : index
    %c0_38 = arith.constant 0 : index
    %c0_39 = arith.constant 0 : index
    %62 = vector.load %arg2[%c5, %c0_38, %c0_39] : memref<7x256x256xbf16, #tpu.memory_space<vmem>>, vector<1x256x256xbf16>
    %63 = vector.shape_cast %62 : vector<1x256x256xbf16> to vector<256x256xbf16>
    %64 = arith.truncf %61 : vector<16x256xf32> to vector<16x256xbf16>
    %cst_40 = arith.constant dense<0.000000e+00> : vector<16x256xf32>
    %65 = tpu.matmul %64, %63, %cst_40 {dimension_numbers = #tpu.dot_dimension_numbers<[1], [0], [0], [1], [0, 0, 1, 1], [], []>} : vector<16x256xbf16>, vector<256x256xbf16>, vector<16x256xf32> -> vector<16x256xf32>
    %c5_41 = arith.constant 5 : index
    %c0_42 = arith.constant 0 : index
    %c0_43 = arith.constant 0 : index
    %66 = vector.load %arg3[%c5_41, %c0_42, %c0_43] : memref<7x1x256xf32, #tpu.memory_space<vmem>>, vector<1x1x256xf32>
    %67 = vector.shape_cast %66 : vector<1x1x256xf32> to vector<1x256xf32>
    %68 = vector.broadcast %67 : vector<1x256xf32> to vector<16x256xf32>
    %69 = arith.addf %65, %68 : vector<16x256xf32>
    %cst_44 = arith.constant 0.000000e+00 : f32
    %70 = vector.broadcast %cst_44 : f32 to vector<16x256xf32>
    %71 = arith.cmpf ogt, %69, %70 : vector<16x256xf32>
    %cst_45 = arith.constant 0.000000e+00 : f32
    %72 = vector.broadcast %cst_45 : f32 to vector<16x256xf32>
    %73 = arith.minimumf %69, %72 : vector<16x256xf32>
    %74 = math.exp %73 : vector<16x256xf32>
    %cst_46 = arith.constant 1.000000e+00 : f32
    %75 = vector.broadcast %cst_46 : f32 to vector<16x256xf32>
    %76 = arith.subf %74, %75 : vector<16x256xf32>
    %77 = arith.select %71, %69, %76 : vector<16x256xi1>, vector<16x256xf32>
    %c6 = arith.constant 6 : index
    %c0_47 = arith.constant 0 : index
    %c0_48 = arith.constant 0 : index
    %78 = vector.load %arg2[%c6, %c0_47, %c0_48] : memref<7x256x256xbf16, #tpu.memory_space<vmem>>, vector<1x256x128xbf16>
    %79 = vector.shape_cast %78 : vector<1x256x128xbf16> to vector<256x128xbf16>
    %80 = arith.truncf %77 : vector<16x256xf32> to vector<16x256xbf16>
    %cst_49 = arith.constant dense<0.000000e+00> : vector<16x128xf32>
    %81 = tpu.matmul %80, %79, %cst_49 {dimension_numbers = #tpu.dot_dimension_numbers<[1], [0], [0], [1], [0, 0, 1, 1], [], []>} : vector<16x256xbf16>, vector<256x128xbf16>, vector<16x128xf32> -> vector<16x128xf32>
    %c6_50 = arith.constant 6 : index
    %c0_51 = arith.constant 0 : index
    %c0_52 = arith.constant 0 : index
    %82 = vector.load %arg3[%c6_50, %c0_51, %c0_52] : memref<7x1x256xf32, #tpu.memory_space<vmem>>, vector<1x1x128xf32>
    %83 = vector.shape_cast %82 : vector<1x1x128xf32> to vector<1x128xf32>
    %84 = vector.broadcast %83 : vector<1x128xf32> to vector<16x128xf32>
    %85 = arith.addf %81, %84 : vector<16x128xf32>
    %c0_53 = arith.constant 0 : index
    %86 = memref.load %arg4[%c0_53] : memref<2xf32, #tpu.memory_space<smem>>
    %87 = vector.broadcast %86 : f32 to vector<16x1xf32>
    %88 = arith.mulf %53, %87 : vector<16x1xf32>
    %c1_54 = arith.constant 1 : index
    %89 = memref.load %arg4[%c1_54] : memref<2xf32, #tpu.memory_space<smem>>
    %90 = vector.broadcast %89 : f32 to vector<16x1xf32>
    %91 = arith.addf %88, %90 : vector<16x1xf32>
    %92 = tpu.iota {dimensions = array<i32: 1>} : vector<16x128xi32>
    %c2_i32 = arith.constant 2 : i32
    %93 = vector.broadcast %c2_i32 : i32 to vector<16x128xi32>
    %94 = arith.cmpi eq, %92, %93 : vector<16x128xi32>
    %95 = vector.shape_cast %53 : vector<16x1xf32> to vector<16x1xf32>
    %96 = vector.broadcast %95 : vector<16x1xf32> to vector<16x128xf32>
    %97 = arith.select %94, %96, %85 : vector<16x128xi1>, vector<16x128xf32>
    %c3_i32 = arith.constant 3 : i32
    %98 = vector.broadcast %c3_i32 : i32 to vector<16x128xi32>
    %99 = arith.cmpi eq, %92, %98 : vector<16x128xi32>
    %100 = vector.shape_cast %91 : vector<16x1xf32> to vector<16x1xf32>
    %101 = vector.broadcast %100 : vector<16x1xf32> to vector<16x128xf32>
    %102 = arith.select %99, %101, %97 : vector<16x128xi1>, vector<16x128xf32>
    %c0_55 = arith.constant 0 : index
    %c0_56 = arith.constant 0 : index
    %103 = vector.load %arg5[%c0_55, %c0_56] : memref<16x128xf32, #tpu.memory_space<vmem>>, vector<16x128xf32>
    tpu.vector_store %arg5[%c0_55, %c0_56], %102 {strides = array<i32>} : memref<16x128xf32, #tpu.memory_space<vmem>>, vector<16x128xf32>,
    return
  }
  func.func @transform_0(%arg0: i32) -> (i32, i32) {
    %c0_i32 = arith.constant 0 : i32
    %c0_i32_0 = arith.constant 0 : i32
    return %arg0, %c0_i32 : i32, i32
  }
  func.func @transform_1(%arg0: i32) -> (i32, i32, i32) {
    %c0_i32 = arith.constant 0 : i32
    %c0_i32_0 = arith.constant 0 : i32
    %c0_i32_1 = arith.constant 0 : i32
    %c0_i32_2 = arith.constant 0 : i32
    return %c0_i32, %c0_i32_0, %c0_i32_1 : i32, i32, i32
  }
  func.func @transform_2(%arg0: i32) -> (i32, i32, i32) {
    %c0_i32 = arith.constant 0 : i32
    %c0_i32_0 = arith.constant 0 : i32
    %c0_i32_1 = arith.constant 0 : i32
    %c0_i32_2 = arith.constant 0 : i32
    return %c0_i32, %c0_i32_0, %c0_i32_1 : i32, i32, i32
  }
  func.func @transform_3(%arg0: i32) -> i32 {
    %c0_i32 = arith.constant 0 : i32
    %c0_i32_0 = arith.constant 0 : i32
    return %c0_i32 : i32
  }
  func.func @transform_4(%arg0: i32) -> (i32, i32) {
    %c0_i32 = arith.constant 0 : i32
    %c0_i32_0 = arith.constant 0 : i32
    return %arg0, %c0_i32 : i32, i32
  }
}

module attributes {stable_mosaic.version = 11 : i64} {
  func.func @dragonnet_kernel(%arg0: i32, %arg1: memref<16x128xf32, #tpu.memory_space<vmem>>, %arg2: memref<7x256x256xbf16, #tpu.memory_space<vmem>>, %arg3: memref<7x1x256xf32, #tpu.memory_space<vmem>>, %arg4: memref<2xf32, #tpu.memory_space<smem>>, %arg5: memref<16x128xf32, #tpu.memory_space<vmem>>) attributes {dimension_semantics = [#tpu.dimension_semantics<parallel>], iteration_bounds = array<i64: 1>, scalar_prefetch = 0 : i64, scratch_operands = 0 : i64, tpu.core_type = #tpu.core_type<tc>, window_params = [{transform_indices = @transform_0, window_bounds = array<i64: 16, 128>}, {pipeline_mode = #tpu.pipeline_mode<synchronous>, transform_indices = @transform_1, window_bounds = array<i64: 7, 256, 256>}, {pipeline_mode = #tpu.pipeline_mode<synchronous>, transform_indices = @transform_2, window_bounds = array<i64: 7, 1, 256>}, {transform_indices = @transform_3, window_bounds = array<i64: 2>}, {transform_indices = @transform_4, window_bounds = array<i64: 16, 128>}]} {
    %c0 = arith.constant 0 : index
    %c0_0 = arith.constant 0 : index
    %0 = vector.load %arg1[%c0, %c0_0] : memref<16x128xf32, #tpu.memory_space<vmem>>, vector<16x128xf32>
    %c0_1 = arith.constant 0 : index
    %c0_2 = arith.constant 0 : index
    %c0_3 = arith.constant 0 : index
    %1 = vector.load %arg2[%c0_1, %c0_2, %c0_3] : memref<7x256x256xbf16, #tpu.memory_space<vmem>>, vector<1x128x128xbf16>
    %2 = vector.shape_cast %1 : vector<1x128x128xbf16> to vector<128x128xbf16>
    %3 = arith.truncf %0 : vector<16x128xf32> to vector<16x128xbf16>
    %cst = arith.constant dense<0.000000e+00> : vector<16x128xf32>
    %4 = tpu.matmul %3, %2, %cst {dimension_numbers = #tpu.dot_dimension_numbers<[1], [0], [0], [1], [0, 0, 1, 1], [], []>} : vector<16x128xbf16>, vector<128x128xbf16>, vector<16x128xf32> -> vector<16x128xf32>
    %c0_4 = arith.constant 0 : index
    %c0_5 = arith.constant 0 : index
    %c0_6 = arith.constant 0 : index
    %5 = vector.load %arg3[%c0_4, %c0_5, %c0_6] : memref<7x1x256xf32, #tpu.memory_space<vmem>>, vector<1x1x128xf32>
    %6 = vector.shape_cast %5 : vector<1x1x128xf32> to vector<1x128xf32>
    %7 = vector.broadcast %6 : vector<1x128xf32> to vector<16x128xf32>
    %8 = arith.addf %4, %7 : vector<16x128xf32>
    %9 = math.tanh %8 : vector<16x128xf32>
    %c1 = arith.constant 1 : index
    %c0_7 = arith.constant 0 : index
    %c0_8 = arith.constant 0 : index
    %10 = vector.load %arg2[%c1, %c0_7, %c0_8] : memref<7x256x256xbf16, #tpu.memory_space<vmem>>, vector<1x128x256xbf16>
    %11 = vector.shape_cast %10 : vector<1x128x256xbf16> to vector<128x256xbf16>
    %12 = arith.truncf %9 : vector<16x128xf32> to vector<16x128xbf16>
    %cst_9 = arith.constant dense<0.000000e+00> : vector<16x256xf32>
    %13 = tpu.matmul %12, %11, %cst_9 {dimension_numbers = #tpu.dot_dimension_numbers<[1], [0], [0], [1], [0, 0, 1, 1], [], []>} : vector<16x128xbf16>, vector<128x256xbf16>, vector<16x256xf32> -> vector<16x256xf32>
    %c1_10 = arith.constant 1 : index
    %c0_11 = arith.constant 0 : index
    %c0_12 = arith.constant 0 : index
    %14 = vector.load %arg3[%c1_10, %c0_11, %c0_12] : memref<7x1x256xf32, #tpu.memory_space<vmem>>, vector<1x1x256xf32>
    %15 = vector.shape_cast %14 : vector<1x1x256xf32> to vector<1x256xf32>
    %16 = vector.broadcast %15 : vector<1x256xf32> to vector<16x256xf32>
    %17 = arith.addf %13, %16 : vector<16x256xf32>
    %cst_13 = arith.constant 0.000000e+00 : f32
    %18 = vector.broadcast %cst_13 : f32 to vector<16x256xf32>
    %19 = arith.maximumf %17, %18 : vector<16x256xf32>
    %c2 = arith.constant 2 : index
    %c0_14 = arith.constant 0 : index
    %c0_15 = arith.constant 0 : index
    %20 = vector.load %arg2[%c2, %c0_14, %c0_15] : memref<7x256x256xbf16, #tpu.memory_space<vmem>>, vector<1x256x256xbf16>
    %21 = vector.shape_cast %20 : vector<1x256x256xbf16> to vector<256x256xbf16>
    %22 = arith.truncf %19 : vector<16x256xf32> to vector<16x256xbf16>
    %cst_16 = arith.constant dense<0.000000e+00> : vector<16x256xf32>
    %23 = tpu.matmul %22, %21, %cst_16 {dimension_numbers = #tpu.dot_dimension_numbers<[1], [0], [0], [1], [0, 0, 1, 1], [], []>} : vector<16x256xbf16>, vector<256x256xbf16>, vector<16x256xf32> -> vector<16x256xf32>
    %c2_17 = arith.constant 2 : index
    %c0_18 = arith.constant 0 : index
    %c0_19 = arith.constant 0 : index
    %24 = vector.load %arg3[%c2_17, %c0_18, %c0_19] : memref<7x1x256xf32, #tpu.memory_space<vmem>>, vector<1x1x256xf32>
    %25 = vector.shape_cast %24 : vector<1x1x256xf32> to vector<1x256xf32>
    %26 = vector.broadcast %25 : vector<1x256xf32> to vector<16x256xf32>
    %27 = arith.addf %23, %26 : vector<16x256xf32>
    %cst_20 = arith.constant 0.000000e+00 : f32
    %28 = vector.broadcast %cst_20 : f32 to vector<16x256xf32>
    %29 = arith.maximumf %27, %28 : vector<16x256xf32>
    %c3 = arith.constant 3 : index
    %c0_21 = arith.constant 0 : index
    %c0_22 = arith.constant 0 : index
    %30 = vector.load %arg2[%c3, %c0_21, %c0_22] : memref<7x256x256xbf16, #tpu.memory_space<vmem>>, vector<1x256x256xbf16>
    %31 = vector.shape_cast %30 : vector<1x256x256xbf16> to vector<256x256xbf16>
    %32 = arith.truncf %29 : vector<16x256xf32> to vector<16x256xbf16>
    %cst_23 = arith.constant dense<0.000000e+00> : vector<16x256xf32>
    %33 = tpu.matmul %32, %31, %cst_23 {dimension_numbers = #tpu.dot_dimension_numbers<[1], [0], [0], [1], [0, 0, 1, 1], [], []>} : vector<16x256xbf16>, vector<256x256xbf16>, vector<16x256xf32> -> vector<16x256xf32>
    %c3_24 = arith.constant 3 : index
    %c0_25 = arith.constant 0 : index
    %c0_26 = arith.constant 0 : index
    %34 = vector.load %arg3[%c3_24, %c0_25, %c0_26] : memref<7x1x256xf32, #tpu.memory_space<vmem>>, vector<1x1x256xf32>
    %35 = vector.shape_cast %34 : vector<1x1x256xf32> to vector<1x256xf32>
    %36 = vector.broadcast %35 : vector<1x256xf32> to vector<16x256xf32>
    %37 = arith.addf %33, %36 : vector<16x256xf32>
    %cst_27 = arith.constant 0.000000e+00 : f32
    %38 = vector.broadcast %cst_27 : f32 to vector<16x256xf32>
    %39 = arith.maximumf %37, %38 : vector<16x256xf32>
    %c4 = arith.constant 4 : index
    %c0_28 = arith.constant 0 : index
    %c0_29 = arith.constant 0 : index
    %40 = vector.load %arg2[%c4, %c0_28, %c0_29] : memref<7x256x256xbf16, #tpu.memory_space<vmem>>, vector<1x256x256xbf16>
    %41 = vector.shape_cast %40 : vector<1x256x256xbf16> to vector<256x256xbf16>
    %42 = arith.truncf %39 : vector<16x256xf32> to vector<16x256xbf16>
    %cst_30 = arith.constant dense<0.000000e+00> : vector<16x256xf32>
    %43 = tpu.matmul %42, %41, %cst_30 {dimension_numbers = #tpu.dot_dimension_numbers<[1], [0], [0], [1], [0, 0, 1, 1], [], []>} : vector<16x256xbf16>, vector<256x256xbf16>, vector<16x256xf32> -> vector<16x256xf32>
    %c4_31 = arith.constant 4 : index
    %c0_32 = arith.constant 0 : index
    %c0_33 = arith.constant 0 : index
    %44 = vector.load %arg3[%c4_31, %c0_32, %c0_33] : memref<7x1x256xf32, #tpu.memory_space<vmem>>, vector<1x1x256xf32>
    %45 = vector.shape_cast %44 : vector<1x1x256xf32> to vector<1x256xf32>
    %46 = vector.broadcast %45 : vector<1x256xf32> to vector<16x256xf32>
    %47 = arith.addf %43, %46 : vector<16x256xf32>
    %48 = vector.extract_strided_slice %47 {offsets = [0, 200], sizes = [16, 1], strides = [1, 1]} : vector<16x256xf32> to vector<16x1xf32>
    %49 = arith.negf %48 : vector<16x1xf32>
    %50 = math.exp %49 : vector<16x1xf32>
    %cst_34 = arith.constant 1.000000e+00 : f32
    %51 = vector.broadcast %cst_34 : f32 to vector<16x1xf32>
    %52 = arith.addf %51, %50 : vector<16x1xf32>
    %53 = arith.divf %51, %52 : vector<16x1xf32>
    %cst_35 = arith.constant 0.000000e+00 : f32
    %54 = vector.broadcast %cst_35 : f32 to vector<16x256xf32>
    %55 = arith.cmpf ogt, %47, %54 : vector<16x256xf32>
    %cst_36 = arith.constant 0.000000e+00 : f32
    %56 = vector.broadcast %cst_36 : f32 to vector<16x256xf32>
    %57 = arith.minimumf %47, %56 : vector<16x256xf32>
    %58 = math.exp %57 : vector<16x256xf32>
    %cst_37 = arith.constant 1.000000e+00 : f32
    %59 = vector.broadcast %cst_37 : f32 to vector<16x256xf32>
    %60 = arith.subf %58, %59 : vector<16x256xf32>
    %61 = arith.select %55, %47, %60 : vector<16x256xi1>, vector<16x256xf32>
    %c5 = arith.constant 5 : index
    %c0_38 = arith.constant 0 : index
    %c0_39 = arith.constant 0 : index
    %62 = vector.load %arg2[%c5, %c0_38, %c0_39] : memref<7x256x256xbf16, #tpu.memory_space<vmem>>, vector<1x256x256xbf16>
    %63 = vector.shape_cast %62 : vector<1x256x256xbf16> to vector<256x256xbf16>
    %64 = arith.truncf %61 : vector<16x256xf32> to vector<16x256xbf16>
    %cst_40 = arith.constant dense<0.000000e+00> : vector<16x256xf32>
    %65 = tpu.matmul %64, %63, %cst_40 {dimension_numbers = #tpu.dot_dimension_numbers<[1], [0], [0], [1], [0, 0, 1, 1], [], []>} : vector<16x256xbf16>, vector<256x256xbf16>, vector<16x256xf32> -> vector<16x256xf32>
    %c5_41 = arith.constant 5 : index
    %c0_42 = arith.constant 0 : index
    %c0_43 = arith.constant 0 : index
    %66 = vector.load %arg3[%c5_41, %c0_42, %c0_43] : memref<7x1x256xf32, #tpu.memory_space<vmem>>, vector<1x1x256xf32>
    %67 = vector.shape_cast %66 : vector<1x1x256xf32> to vector<1x256xf32>
    %68 = vector.broadcast %67 : vector<1x256xf32> to vector<16x256xf32>
    %69 = arith.addf %65, %68 : vector<16x256xf32>
    %cst_44 = arith.constant 0.000000e+00 : f32
    %70 = vector.broadcast %cst_44 : f32 to vector<16x256xf32>
    %71 = arith.cmpf ogt, %69, %70 : vector<16x256xf32>
    %cst_45 = arith.constant 0.000000e+00 : f32
    %72 = vector.broadcast %cst_45 : f32 to vector<16x256xf32>
    %73 = arith.minimumf %69, %72 : vector<16x256xf32>
    %74 = math.exp %73 : vector<16x256xf32>
    %cst_46 = arith.constant 1.000000e+00 : f32
    %75 = vector.broadcast %cst_46 : f32 to vector<16x256xf32>
    %76 = arith.subf %74, %75 : vector<16x256xf32>
    %77 = arith.select %71, %69, %76 : vector<16x256xi1>, vector<16x256xf32>
    %c6 = arith.constant 6 : index
    %c0_47 = arith.constant 0 : index
    %c0_48 = arith.constant 0 : index
    %78 = vector.load %arg2[%c6, %c0_47, %c0_48] : memref<7x256x256xbf16, #tpu.memory_space<vmem>>, vector<1x256x128xbf16>
    %79 = vector.shape_cast %78 : vector<1x256x128xbf16> to vector<256x128xbf16>
    %80 = arith.truncf %77 : vector<16x256xf32> to vector<16x256xbf16>
    %cst_49 = arith.constant dense<0.000000e+00> : vector<16x128xf32>
    %81 = tpu.matmul %80, %79, %cst_49 {dimension_numbers = #tpu.dot_dimension_numbers<[1], [0], [0], [1], [0, 0, 1, 1], [], []>} : vector<16x256xbf16>, vector<256x128xbf16>, vector<16x128xf32> -> vector<16x128xf32>
    %c6_50 = arith.constant 6 : index
    %c0_51 = arith.constant 0 : index
    %c0_52 = arith.constant 0 : index
    %82 = vector.load %arg3[%c6_50, %c0_51, %c0_52] : memref<7x1x256xf32, #tpu.memory_space<vmem>>, vector<1x1x128xf32>
    %83 = vector.shape_cast %82 : vector<1x1x128xf32> to vector<1x128xf32>
    %84 = vector.broadcast %83 : vector<1x128xf32> to vector<16x128xf32>
    %85 = arith.addf %81, %84 : vector<16x128xf32>
    %c0_53 = arith.constant 0 : index
    %86 = memref.load %arg4[%c0_53] : memref<2xf32, #tpu.memory_space<smem>>
    %87 = vector.broadcast %86 : f32 to vector<16x1xf32>
    %88 = arith.mulf %53, %87 : vector<16x1xf32>
    %c1_54 = arith.constant 1 : index
    %89 = memref.load %arg4[%c1_54] : memref<2xf32, #tpu.memory_space<smem>>
    %90 = vector.broadcast %89 : f32 to vector<16x1xf32>
    %91 = arith.addf %88, %90 : vector<16x1xf32>
    %92 = tpu.iota {dimensions = array<i32: 1>} : vector<16x128xi32>
    %c2_i32 = arith.constant 2 : i32
    %93 = vector.broadcast %c2_i32 : i32 to vector<16x128xi32>
    %94 = arith.cmpi eq, %92, %93 : vector<16x128xi32>
    %95 = vector.shape_cast %53 : vector<16x1xf32> to vector<16x1xf32>
    %96 = vector.broadcast %95 : vector<16x1xf32> to vector<16x128xf32>
    %97 = arith.select %94, %96, %85 : vector<16x128xi1>, vector<16x128xf32>
    %c3_i32 = arith.constant 3 : i32
    %98 = vector.broadcast %c3_i32 : i32 to vector<16x128xi32>
    %99 = arith.cmpi eq, %92, %98 : vector<16x128xi32>
    %100 = vector.shape_cast %91 : vector<16x1xf32> to vector<16x1xf32>
    %101 = vector.broadcast %100 : vector<16x1xf32> to vector<16x128xf32>
    %102 = arith.select %99, %101, %97 : vector<16x128xi1>, vector<16x128xf32>
    %c0_55 = arith.constant 0 : index
    %c0_56 = arith.constant 0 : index
    %103 = vector.load %arg5[%c0_55, %c0_56] : memref<16x128xf32, #tpu.memory_space<vmem>>, vector<16x128xf32>
    tpu.vector_store %arg5[%c0_55, %c0_56], %102 {strides = array<i32>} : memref<16x128xf32, #tpu.memory_space<vmem>>, vector<16x128xf32>,
    return
  }
  func.func @transform_0(%arg0: i32) -> (i32, i32) {
    %c0_i32 = arith.constant 0 : i32
    %c0_i32_0 = arith.constant 0 : i32
    return %arg0, %c0_i32 : i32, i32
  }
  func.func @transform_1(%arg0: i32) -> (i32, i32, i32) {
    %c0_i32 = arith.constant 0 : i32
    %c0_i32_0 = arith.constant 0 : i32
    %c0_i32_1 = arith.constant 0 : i32
    %c0_i32_2 = arith.constant 0 : i32
    return %c0_i32, %c0_i32_0, %c0_i32_1 : i32, i32, i32
  }
  func.func @transform_2(%arg0: i32) -> (i32, i32, i32) {
    %c0_i32 = arith.constant 0 : i32
    %c0_i32_0 = arith.constant 0 : i32
    %c0_i32_1 = arith.constant 0 : i32
    %c0_i32_2 = arith.constant 0 : i32
    return %c0_i32, %c0_i32_0, %c0_i32_1 : i32, i32, i32
  }
  func.func @transform_3(%arg0: i32) -> i32 {
    %c0_i32 = arith.constant 0 : i32
    %c0_i32_0 = arith.constant 0 : i32
    return %c0_i32 : i32
  }
  func.func @transform_4(%arg0: i32) -> (i32, i32) {
    %c0_i32 = arith.constant 0 : i32
    %c0_i32_0 = arith.constant 0 : i32
    return %arg0, %c0_i32 : i32, i32
  }
}

</mosaic_0001>

<bundles_post_ra>
// kernel: tpu_custom_call.1
= control target key start
LH: loop header
LB: loop body
LE: loop exit
PB: predicated region body
PF: predicated region fallthrough
CT: control target
= control target key end

     0   :  { %9 = vsyncpa [#allocation3], 0  ;;  %s2729_s0 = inlined_call_operand.hbm [shape: f32[16,128], index: 0, kind: input, shape index: {}]   ;;  %s2730_s1 = inlined_call_operand.hbm [shape: bf16[7,256,256], index: 1, kind: input, shape index: {}]   ;;  %s2731_s2 = inlined_call_operand.hbm [shape: f32[7,1,256], index: 2, kind: input, shape index: {}]   ;;  %s2732_s3 = inlined_call_operand.vmem [shape: f32[2], index: 3, kind: input, shape index: {}]   ;;  %s2733_s4 = inlined_call_operand.hbm [shape: f32[16,128], index: 4, kind: output, shape index: {}]  }
   0x1   :  { %10 = vsyncpa [#allocation7], 0 }
   0x2   :  { %11 = vsyncpa [#allocation5], 0 }
   0x3   :  { %12 = vsyncpa [#allocation4], 0  ;;  %s30_s17 = sshll.u32 %s2730_s1, 4  ;;  %s2660_s18 = smov [#allocation6]   ;;  %s31_s17 = int_to_ptr.hbm [resolvable:$true] %s30_s17 }
   0x4   :  { %s32_s19 = sshll.u32 %s2660_s18, 4  ;;  %s17_s22 = sshll.u32 %s2729_s0, 4  ;;  %s33_s19 = int_to_ptr.vmem [resolvable:$true] %s32_s19  ;;  %s18_s22 = int_to_ptr.hbm [resolvable:$true] %s17_s22 }
   0x5   :  { %s2661_s23 = smov 128   ;;  %s2662_s24 = smov 8  }
   0x6   :  { %38 = dma.hbm_to_vmem [thread:$0]  %s31_s17, 28672, %s33_s19, [#allocation7], %s2661_s23, %s2661_s23, %s2662_s24  }
   0x7   :  { %s2663_s25 = smov [#allocation2]   ;;  %s43_s1 = sshll.u32 %s2731_s2, 4  ;;  %s44_s1 = int_to_ptr.hbm [resolvable:$true] %s43_s1 }
   0x8   :  { %s19_s26 = sshll.u32 %s2663_s25, 4  ;;  %s2664_s0 = smov [#allocation8]   ;;  %s20_s26 = int_to_ptr.vmem [resolvable:$true] %s19_s26 }
   0x9   :  { %25 = dma.hbm_to_vmem [thread:$0]  %s18_s22, 256, %s20_s26, [#allocation3], %s2661_s23, %s2661_s23, %s2662_s24  }
   0xa   :  { %s45_s29 = sshll.u32 %s2664_s0, 4  ;;  %s57_s6 = sshll.u32 %s2732_s3, 4  ;;  %s46_s29 = int_to_ptr.vmem [resolvable:$true] %s45_s29  ;;  %s58_s6 = int_to_ptr.vmem [resolvable:$true] %s57_s6 }
   0xb   :  { %s2665_s7 = smov 32   ;;  %s2666_s8 = smov 2  }
   0xc   :  { %51 = dma.hbm_to_vmem [thread:$0]  %s44_s1, 224, %s46_s29, [#allocation7], %s2665_s7, %s2665_s7, %s2666_s8  }
   0xd   :  { %s2667_s9 = smov [#allocation9]  }
   0xe   :  { %60 = dma.vmem_to_smem %s58_s6, 16, %s2667_s9, [#allocation5]  }
   0xf   :  { %2652 = dma.done.wait [#allocation3], 256  }
  0x10   :  { %2653 = vsyncadd [#allocation3], 4294967040 }
  0x11   :  { %2654 = dma.done.wait [#allocation7], 28896  }
  0x12   :  { %2655 = vsyncadd [#allocation7], 4294938400 }
  0x13   :  { %2656 = dma.done.wait [#allocation5], 16  }
  0x14   :  { %2657 = vsyncadd [#allocation5], 4294967280 }
  0x15   :  { %77 = sfence }
  0x16   :  { %v1681_v0 = vld [vmem:[#allocation6 + $0x70] sm:$0xf]  ;;  %v2341_v1 = vld [vmem:[#allocation6 + $0x74] sm:$0xf0]  ;;  %v1677_v2 = vld [vmem:[#allocation6 + $0x60] sm:$0xf] }
  0x17   :  { %v1682_v3 = vor.u32 %v2341_v1, %v1681_v0  ;;  %v2340_v4 = vld [vmem:[#allocation6 + $0x64] sm:$0xf0]  ;;  %v1673_v6 = vld [vmem:[#allocation6 + $0x50] sm:$0xf]  ;;  %v2339_v7 = vld [vmem:[#allocation6 + $0x54] sm:$0xf0] }
  0x18   :  { %v1678_v5 = vor.u32 %v2340_v4, %v1677_v2  ;;  %v1669_v8 = vld [vmem:[#allocation6 + $0x40] sm:$0xf]  ;;  %v1741_v9 = vld [vmem:[#allocation6 + $0x170] sm:$0xf]  ;;  %v2357_v10 = vld [vmem:[#allocation6 + $0x174] sm:$0xf0]  ;;  %v1674_v12 = vor.u32 %v2339_v7, %v1673_v6 }
  0x19   :  { %149 = vmatpush.bf16.msra.mxu0 %v1682_v3  ;;  %v2356_v11 = vld [vmem:[#allocation6 + $0x174] sm:$0xf]  ;;  %v1742_v13 = vor.u32 %v2357_v10, %v1741_v9  ;;  %v1743_v14 = vld [vmem:[#allocation6 + $0x178] sm:$0xf0]  ;;  %v1733_v15 = vld [vmem:[#allocation6 + $0x160] sm:$0xf] }
  0x1a   :  { %v2355_v16 = vld [vmem:[#allocation6 + $0x164] sm:$0xf0]  ;;  %v1746_v18 = vor.u32 %v2356_v11, %v1743_v14  ;;  %v2354_v19 = vld [vmem:[#allocation6 + $0x164] sm:$0xf]  ;;  %v1735_v20 = vld [vmem:[#allocation6 + $0x168] sm:$0xf0] }
  0x1b   :  { %v2338_v17 = vld [vmem:[#allocation6 + $0x44] sm:$0xf0]  ;;  %270 = vmatpush.bf16.msra.mxu1 %v1742_v13  ;;  %v1734_v21 = vor.u32 %v2355_v16, %v1733_v15  ;;  %v1725_v22 = vld [vmem:[#allocation6 + $0x150] sm:$0xf]  ;;  %v1738_v23 = vor.u32 %v2354_v19, %v1735_v20  ;;  %v2353_v24 = vld [vmem:[#allocation6 + $0x154] sm:$0xf0] }
  0x1c   :  { %284 = vmatpush.bf16.msra.mxu2 %v1746_v18  ;;  %v1670_v25 = vor.u32 %v2338_v17, %v1669_v8  ;;  %v2352_v26 = vld [vmem:[#allocation6 + $0x154] sm:$0xf]  ;;  %v1727_v27 = vld [vmem:[#allocation6 + $0x158] sm:$0xf0]  ;;  %v1665_v28 = vld [vmem:[#allocation6 + $0x30] sm:$0xf]  ;;  %v1726_v30 = vor.u32 %v2353_v24, %v1725_v22 }
  0x1d   :  { %150 = vmatpush.bf16.msra.mxu0 %v1678_v5  ;;  %v2337_v29 = vld [vmem:[#allocation6 + $0x34] sm:$0xf0]  ;;  %v1730_v31 = vor.u32 %v2352_v26, %v1727_v27  ;;  %v1661_v33 = vld [vmem:[#allocation6 + $0x20] sm:$0xf]  ;;  %v2336_v34 = vld [vmem:[#allocation6 + $0x24] sm:$0xf0] }
  0x1e   :  { %v1666_v32 = vor.u32 %v2337_v29, %v1665_v28  ;;  %v1662_v35 = vor.u32 %v2336_v34, %v1661_v33  ;;  %v1657_v36 = vld [vmem:[#allocation6 + $0x10] sm:$0xf]  ;;  %v2335_v37 = vld [vmem:[#allocation6 + $0x14] sm:$0xf0]  ;;  %v1653_v39 = vld [vmem:[#allocation6] sm:$0xf] }
  0x1f   :  { %271 = vmatpush.bf16.msra.mxu1 %v1734_v21  ;;  %v1658_v38 = vor.u32 %v2335_v37, %v1657_v36  ;;  %v2334_v40 = vld [vmem:[#allocation6 + $0x4] sm:$0xf0]  ;;  %v78_v42 = vld [vmem:[#allocation2] sm:$0xff]  ;;  %v79_v43 = vld [vmem:[#allocation2 + $0x8] sm:$0xff]  ;;  %s2713_s2 = sld [smem:[#allocation9]]  ;;  %s2669_s10 = smov [#allocation10]  }
  0x20   :  { %285 = vmatpush.bf16.msra.mxu2 %v1738_v23  ;;  %v1654_v41 = vor.u32 %v2334_v40, %v1653_v39  ;;  %v96_v44 = vpack.c.bf16 %v79_v43, %v78_v42  ;;  %v1717_v45 = vld [vmem:[#allocation6 + $0x140] sm:$0xf]  ;;  %v2351_v46 = vld [vmem:[#allocation6 + $0x144] sm:$0xf0]  ;;  %v2350_v47 = vld [vmem:[#allocation6 + $0x144] sm:$0xf] }
  0x21   :  { %151 = vmatpush.bf16.msra.mxu0 %v1674_v12  ;;  %v1718_v48 = vor.u32 %v2351_v46, %v1717_v45  ;;  %v1719_v49 = vld [vmem:[#allocation6 + $0x148] sm:$0xf0]  ;;  %v1709_v51 = vld [vmem:[#allocation6 + $0x130] sm:$0xf]  ;;  %v2349_v52 = vld [vmem:[#allocation6 + $0x134] sm:$0xf0] }
  0x22   :  { %v1722_v50 = vor.u32 %v2350_v47, %v1719_v49  ;;  %v2348_v53 = vld [vmem:[#allocation6 + $0x134] sm:$0xf]  ;;  %v1710_v54 = vor.u32 %v2349_v52, %v1709_v51  ;;  %v1711_v55 = vld [vmem:[#allocation6 + $0x138] sm:$0xf0]  ;;  %v1701_v57 = vld [vmem:[#allocation6 + $0x120] sm:$0xf] }
  0x23   :  { %272 = vmatpush.bf16.msra.mxu1 %v1726_v30  ;;  %v1714_v56 = vor.u32 %v2348_v53, %v1711_v55  ;;  %v2347_v58 = vld [vmem:[#allocation6 + $0x124] sm:$0xf0]  ;;  %v2346_v59 = vld [vmem:[#allocation6 + $0x124] sm:$0xf]  ;;  %v1703_v61 = vld [vmem:[#allocation6 + $0x128] sm:$0xf0] }
  0x24   :  { %286 = vmatpush.bf16.msra.mxu2 %v1730_v31  ;;  %v1702_v60 = vor.u32 %v2347_v58, %v1701_v57  ;;  %v1706_v62 = vor.u32 %v2346_v59, %v1703_v61  ;;  %v1693_v63 = vld [vmem:[#allocation6 + $0x110] sm:$0xf]  ;;  %v2345_v0 = vld [vmem:[#allocation6 + $0x114] sm:$0xf0]  ;;  %v2344_v1 = vld [vmem:[#allocation6 + $0x114] sm:$0xf] }
  0x25   :  { %152 = vmatpush.bf16.msra.mxu0 %v1670_v25  ;;  %v1694_v2 = vor.u32 %v2345_v0, %v1693_v63  ;;  %v1695_v3 = vld [vmem:[#allocation6 + $0x118] sm:$0xf0]  ;;  %v1685_v4 = vld [vmem:[#allocation6 + $0x100] sm:$0xf]  ;;  %v2343_v5 = vld [vmem:[#allocation6 + $0x104] sm:$0xf0] }
  0x26   :  { %v1698_v6 = vor.u32 %v2344_v1, %v1695_v3  ;;  %v2342_v7 = vld [vmem:[#allocation6 + $0x104] sm:$0xf]  ;;  %v1687_v8 = vld [vmem:[#allocation6 + $0x108] sm:$0xf0]  ;;  %v1686_v9 = vor.u32 %v2343_v5, %v1685_v4  ;;  %v1805_v11 = vld [vmem:[#allocation6 + $0x270] sm:$0xf] }
  0x27   :  { %273 = vmatpush.bf16.msra.mxu1 %v1718_v48  ;;  %v1690_v10 = vor.u32 %v2342_v7, %v1687_v8  ;;  %v2373_v12 = vld [vmem:[#allocation6 + $0x274] sm:$0xf0]  ;;  %v2372_v13 = vld [vmem:[#allocation6 + $0x274] sm:$0xf]  ;;  %v1807_v15 = vld [vmem:[#allocation6 + $0x278] sm:$0xf0] }
  0x28   :  { %287 = vmatpush.bf16.msra.mxu2 %v1722_v50  ;;  %v1806_v14 = vor.u32 %v2373_v12, %v1805_v11  ;;  %v1797_v16 = vld [vmem:[#allocation6 + $0x260] sm:$0xf]  ;;  %v2371_v17 = vld [vmem:[#allocation6 + $0x264] sm:$0xf0]  ;;  %v1810_v18 = vor.u32 %v2372_v13, %v1807_v15  ;;  %v2370_v19 = vld [vmem:[#allocation6 + $0x264] sm:$0xf] }
  0x29   :  { %153 = vmatpush.bf16.msra.mxu0 %v1666_v32  ;;  %v1799_v20 = vld [vmem:[#allocation6 + $0x268] sm:$0xf0]  ;;  %v1869_v21 = vld [vmem:[#allocation6 + $0x2f0] sm:$0xf]  ;;  %v1798_v22 = vor.u32 %v2371_v17, %v1797_v16  ;;  %v2389_v23 = vld [vmem:[#allocation6 + $0x2f4] sm:$0xf0] }
  0x2a   :  { %504 = vmatpush.bf16.msra.mxu3 %v1806_v14  ;;  %v2388_v24 = vld [vmem:[#allocation6 + $0x2f4] sm:$0xf]  ;;  %v1871_v25 = vld [vmem:[#allocation6 + $0x2f8] sm:$0xf0]  ;;  %v1802_v26 = vor.u32 %v2370_v19, %v1799_v20  ;;  %v1870_v27 = vor.u32 %v2389_v23, %v1869_v21  ;;  %v1789_v29 = vld [vmem:[#allocation6 + $0x250] sm:$0xf] }
  0x2b   :  { %274 = vmatpush.bf16.msra.mxu1 %v1710_v54  ;;  %v1874_v28 = vor.u32 %v2388_v24, %v1871_v25  ;;  %v2369_v30 = vld [vmem:[#allocation6 + $0x254] sm:$0xf0]  ;;  %v2368_v31 = vld [vmem:[#allocation6 + $0x254] sm:$0xf]  ;;  %v1791_v32 = vld [vmem:[#allocation6 + $0x258] sm:$0xf0] }
  0x2c   :  { %288 = vmatpush.bf16.msra.mxu2 %v1714_v56  ;;  %v1861_v33 = vld [vmem:[#allocation6 + $0x2e0] sm:$0xf]  ;;  %v2387_v34 = vld [vmem:[#allocation6 + $0x2e4] sm:$0xf0]  ;;  %v2386_v36 = vld [vmem:[#allocation6 + $0x2e4] sm:$0xf]  ;;  %v1794_v42 = vor.u32 %v2368_v31, %v1791_v32 }
  0x2d   :  { %154 = vmatpush.bf16.msra.mxu0 %v1662_v35  ;;  %v1862_v35 = vor.u32 %v2387_v34, %v1861_v33  ;;  %v1863_v37 = vld [vmem:[#allocation6 + $0x2e8] sm:$0xf0]  ;;  %v1781_v40 = vld [vmem:[#allocation6 + $0x240] sm:$0xf]  ;;  %v1853_v43 = vld [vmem:[#allocation6 + $0x2d0] sm:$0xf] }
  0x2e   :  { %505 = vmatpush.bf16.msra.mxu3 %v1798_v22  ;;  %v1866_v39 = vor.u32 %v2386_v36, %v1863_v37  ;;  %v2384_v45 = vld [vmem:[#allocation6 + $0x2d4] sm:$0xf]  ;;  %v2366_v46 = vld [vmem:[#allocation6 + $0x244] sm:$0xf]  ;;  %v1783_v47 = vld [vmem:[#allocation6 + $0x248] sm:$0xf0] }
  0x2f   :  { %275 = vmatpush.bf16.msra.mxu1 %v1702_v60  ;;  %v1855_v48 = vld [vmem:[#allocation6 + $0x2d8] sm:$0xf0]  ;;  %v1786_v53 = vor.u32 %v2366_v46, %v1783_v47  ;;  %v2514_v54 = vld [vmem:[#allocation8] ss:$0 sm:$0xff]  ;;  %v1773_v61 = vld [vmem:[#allocation6 + $0x230] sm:$0xf] }
  0x30   :  { %289 = vmatpush.bf16.msra.mxu2 %v1706_v62  ;;  %v1858_v50 = vor.u32 %v2384_v45, %v1855_v48  ;;  %v2365_v62 = vld [vmem:[#allocation6 + $0x234] sm:$0xf0]  ;;  %v2364_v63 = vld [vmem:[#allocation6 + $0x234] sm:$0xf]  ;;  %v1775_v1 = vld [vmem:[#allocation6 + $0x238] sm:$0xf0] }
  0x31   :  { %155 = vmatpush.bf16.msra.mxu0 %v1658_v38  ;;  %v1790_v38 = vor.u32 %v2369_v30, %v1789_v29  ;;  %v1774_v0 = vor.u32 %v2365_v62, %v1773_v61  ;;  %v1845_v3 = vld [vmem:[#allocation6 + $0x2c0] sm:$0xf]  ;;  %v2383_v4 = vld [vmem:[#allocation6 + $0x2c4] sm:$0xf0]  ;;  %v2382_v5 = vld [vmem:[#allocation6 + $0x2c4] sm:$0xf] }
  0x32   :  { %v1847_v7 = vld [vmem:[#allocation6 + $0x2c8] sm:$0xf0]  ;;  %v2362_v11 = vld [vmem:[#allocation6 + $0x224] sm:$0xf]  ;;  %v1837_v15 = vld [vmem:[#allocation6 + $0x2b0] sm:$0xf] }
  0x33   :  { %276 = vmatpush.bf16.msra.mxu1 %v1694_v2  ;;  %506 = vmatpush.bf16.msra.mxu3 %v1790_v38  ;;  %v1778_v2 = vor.u32 %v2364_v63, %v1775_v1  ;;  %v1850_v8 = vor.u32 %v2382_v5, %v1847_v7  ;;  %v1767_v13 = vld [vmem:[#allocation6 + $0x228] sm:$0xf0]  ;;  %v2381_v16 = vld [vmem:[#allocation6 + $0x2b4] sm:$0xf0]  ;;  %v1839_v19 = vld [vmem:[#allocation6 + $0x2b8] sm:$0xf0] }
  0x34   :  { %290 = vmatpush.bf16.msra.mxu2 %v1698_v6  ;;  %v1846_v6 = vor.u32 %v2383_v4, %v1845_v3  ;;  %v1770_v14 = vor.u32 %v2362_v11, %v1767_v13  ;;  %v1838_v17 = vor.u32 %v2381_v16, %v1837_v15  ;;  %v1757_v21 = vld [vmem:[#allocation6 + $0x210] sm:$0xf]  ;;  %v2361_v22 = vld [vmem:[#allocation6 + $0x214] sm:$0xf0]  ;;  %v2360_v23 = vld [vmem:[#allocation6 + $0x214] sm:$0xf] }
  0x35   :  { %156 = vmatpush.bf16.msra.mxu0 %v1654_v41  ;;  %v2367_v41 = vld [vmem:[#allocation6 + $0x244] sm:$0xf0]  ;;  %v1758_v24 = vor.u32 %v2361_v22, %v1757_v21  ;;  %v1759_v25 = vld [vmem:[#allocation6 + $0x218] sm:$0xf0]  ;;  %v2378_v29 = vld [vmem:[#allocation6 + $0x2a4] sm:$0xf] }
  0x36   :  { %v1782_v51 = vor.u32 %v2367_v41, %v1781_v40  ;;  %v1831_v31 = vld [vmem:[#allocation6 + $0x2a8] sm:$0xf0]  ;;  %v1749_v33 = vld [vmem:[#allocation6 + $0x200] sm:$0xf]  ;;  %v2359_v34 = vld [vmem:[#allocation6 + $0x204] sm:$0xf0] }
  0x37   :  { %277 = vmatpush.bf16.msra.mxu1 %v1686_v9  ;;  %v1765_v9 = vld [vmem:[#allocation6 + $0x220] sm:$0xf]  ;;  %v1834_v32 = vor.u32 %v2378_v29, %v1831_v31  ;;  %v1750_v36 = vor.u32 %v2359_v34, %v1749_v33  ;;  %v1751_v37 = vld [vmem:[#allocation6 + $0x208] sm:$0xf0]  ;;  %v2377_v40 = vld [vmem:[#allocation6 + $0x294] sm:$0xf0] }
  0x38   :  { %157 = vmatmul.bf16.vlgmr.msra.gmra.mxu0 %v96_v44  ;;  %291 = vmatpush.bf16.msra.mxu2 %v1690_v10  ;;  %v2385_v44 = vld [vmem:[#allocation6 + $0x2d4] sm:$0xf0]  ;;  %v2363_v10 = vld [vmem:[#allocation6 + $0x224] sm:$0xf0]  ;;  %v2376_v41 = vld [vmem:[#allocation6 + $0x294] sm:$0xf] }
  0x39   :  { %518 = vmatpush.bf16.msrb.mxu0 %v1870_v27  ;;  %v1854_v49 = vor.u32 %v2385_v44, %v1853_v43  ;;  %507 = vmatpush.bf16.msra.mxu3 %v1782_v51  ;;  %v1766_v12 = vor.u32 %v2363_v10, %v1765_v9  ;;  %v1829_v27 = vld [vmem:[#allocation6 + $0x2a0] sm:$0xf]  ;;  %v1823_v43 = vld [vmem:[#allocation6 + $0x298] sm:$0xf0]  ;;  %v2375_v46 = vld [vmem:[#allocation6 + $0x284] sm:$0xf0] }
  0x3a   :  { %v1826_v44 = vor.u32 %v2376_v41, %v1823_v43  ;;  %v1813_v45 = vld [vmem:[#allocation6 + $0x280] sm:$0xf]  ;;  %v2374_v47 = vld [vmem:[#allocation6 + $0x284] sm:$0xf]  ;;  %v1933_v51 = vld [vmem:[#allocation6 + $0x370] sm:$0xf] }
  0x3b   :  { %532 = vmatpush.bf16.msrb.mxu1 %v1810_v18  ;;  %v2380_v18 = vld [vmem:[#allocation6 + $0x2b4] sm:$0xf]  ;;  %v1814_v48 = vor.u32 %v2375_v46, %v1813_v45  ;;  %v2402_v61 = vld [vmem:[#allocation6 + $0x364] sm:$0xf]  ;;  %v184_v5 = vld [vmem:[#allocation8 + $0x2] sm:$0x3] }
  0x3c   :  { %546 = vmatpush.bf16.msrb.mxu2 %v1874_v28  ;;  %v1842_v20 = vor.u32 %v2380_v18, %v1839_v19  ;;  %v2379_v28 = vld [vmem:[#allocation6 + $0x2a4] sm:$0xf0]  ;;  %v2420_v1 = vld [vmem:[#allocation6 + $0x3f4] sm:$0xf]  ;;  %v186_v7 = vperm.slane %v184_v5, 0  ;;  %v187_v11 = vperm.slane %v184_v5, 1 }
  0x3d   :  { %519 = vmatpush.bf16.msrb.mxu0 %v1862_v35  ;;  %508 = vmatpush.bf16.msra.mxu3 %v1774_v0  ;;  %v1830_v30 = vor.u32 %v2379_v28, %v1829_v27  ;;  %v2358_v35 = vld [vmem:[#allocation6 + $0x204] sm:$0xf]  ;;  %v1927_v0 = vld [vmem:[#allocation6 + $0x368] sm:$0xf0]  ;;  %v1917_v22 = vld [vmem:[#allocation6 + $0x350] sm:$0xf] }
  0x3e   :  { %v1754_v38 = vor.u32 %v2358_v35, %v1751_v37  ;;  %v1930_v3 = vor.u32 %v2402_v61, %v1927_v0  ;;  %v2400_v27 = vld [vmem:[#allocation6 + $0x354] sm:$0xf]  ;;  %v1919_v28 = vld [vmem:[#allocation6 + $0x358] sm:$0xf0]  ;;  %v2418_v31 = vld [vmem:[#allocation6 + $0x3e4] sm:$0xf] }
  0x3f   :  { %533 = vmatpush.bf16.msrb.mxu1 %v1802_v26  ;;  %v1762_v26 = vor.u32 %v2360_v23, %v1759_v25  ;;  %v2401_v23 = vld [vmem:[#allocation6 + $0x354] sm:$0xf0]  ;;  %v1909_v34 = vld [vmem:[#allocation6 + $0x340] sm:$0xf]  ;;  %v2399_v35 = vld [vmem:[#allocation6 + $0x344] sm:$0xf0] }
  0x40   :  { %547 = vmatpush.bf16.msrb.mxu2 %v1866_v39  ;;  %v1821_v39 = vld [vmem:[#allocation6 + $0x290] sm:$0xf]  ;;  %v1918_v25 = vor.u32 %v2401_v23, %v1917_v22  ;;  %v1910_v37 = vor.u32 %v2399_v35, %v1909_v34  ;;  %v2416_v43 = vld [vmem:[#allocation6 + $0x3d4] sm:$0xf]  ;;  %v1895_v0 = vld [vmem:[#allocation6 + $0x328] sm:$0xf0] }
  0x41   :  { %520 = vmatpush.bf16.msrb.mxu0 %v1854_v49  ;;  %509 = vmatpush.bf16.msra.mxu3 %v1766_v12  ;;  %v1815_v49 = vld [vmem:[#allocation6 + $0x288] sm:$0xf0]  ;;  %v1901_v46 = vld [vmem:[#allocation6 + $0x330] sm:$0xf]  ;;  %v2409_v22 = vld [vmem:[#allocation6 + $0x394] sm:$0xf0] }
  0x42   :  { %v2390_v23 = vld [vmem:[#allocation6 + $0x304] sm:$0xf]  ;;  %v1943_v34 = vld [vmem:[#allocation6 + $0x388] sm:$0xf0]  ;;  %s2715_s3 = sld [smem:[#allocation9 + $0x1]]  ;;  %s1634_s11 = sshll.u32 %s2669_s10, 4  ;;  %s1635_s11 = int_to_ptr.vmem [resolvable:$true] %s1634_s11 }
  0x43   :  { %534 = vmatpush.bf16.msrb.mxu1 %v1794_v42  ;;  %v1822_v42 = vor.u32 %v2377_v40, %v1821_v39  ;;  %v2398_v39 = vld [vmem:[#allocation6 + $0x344] sm:$0xf]  ;;  %v1911_v40 = vld [vmem:[#allocation6 + $0x348] sm:$0xf0]  ;;  %s1636_s14 = sshll.u32 %s2733_s4, 4  ;;  %s1637_s14 = int_to_ptr.hbm [resolvable:$true] %s1636_s14 }
  0x44   :  { %548 = vmatpush.bf16.msrb.mxu2 %v1858_v50  ;;  %v1818_v50 = vor.u32 %v2374_v47, %v1815_v49  ;;  %v2397_v47 = vld [vmem:[#allocation6 + $0x334] sm:$0xf0] }
  0x45   :  { %521 = vmatpush.bf16.msrb.mxu0 %v1846_v6  ;;  %510 = vmatpush.bf16.msra.mxu3 %v1758_v24  ;;  %v1989_v24 = vld [vmem:[#allocation6 + $0x3e0] sm:$0xf]  ;;  %v1902_v49 = vor.u32 %v2397_v47, %v1901_v46  ;;  %v2127_v46 = vld [vmem:[#allocation6 + $0x4f8] sm:$0xf0] }
  0x46   :  { %v2053_v47 = vld [vmem:[#allocation6 + $0x460] sm:$0xf] }
  0x47   :  { %535 = vmatpush.bf16.msrb.mxu1 %v1786_v53  ;;  %v2404_v53 = vld [vmem:[#allocation6 + $0x374] sm:$0xf] }
  0x48   :  { %549 = vmatpush.bf16.msrb.mxu2 %v1850_v8 }
  0x49   :  { %522 = vmatpush.bf16.msrb.mxu0 %v1838_v17  ;;  %511 = vmatpush.bf16.msra.mxu3 %v1750_v36  ;;  %v1981_v36 = vld [vmem:[#allocation6 + $0x3d0] sm:$0xf] }
  0x4b   :  { %536 = vmatpush.bf16.msrb.mxu1 %v1778_v2  ;;  %v1999_v2 = vld [vmem:[#allocation6 + $0x3f8] sm:$0xf0] }
  0x4c   :  { %550 = vmatpush.bf16.msrb.mxu2 %v1842_v20  ;;  %v2002_v4 = vor.u32 %v2420_v1, %v1999_v2 }
  0x4d   :  { %523 = vmatpush.bf16.msrb.mxu0 %v1830_v30  ;;  %v1922_v30 = vor.u32 %v2400_v27, %v1919_v28  ;;  %v2408_v27 = vld [vmem:[#allocation6 + $0x394] sm:$0xf]  ;;  %v1951_v28 = vld [vmem:[#allocation6 + $0x398] sm:$0xf0] }
  0x4f   :  { %537 = vmatpush.bf16.msrb.mxu1 %v1770_v14 }
  0x50   :  { %551 = vmatpush.bf16.msrb.mxu2 %v1834_v32  ;;  %v1991_v32 = vld [vmem:[#allocation6 + $0x3e8] sm:$0xf0] }
  0x51   :  { %524 = vmatpush.bf16.msrb.mxu0 %v1822_v42  ;;  %v1994_v33 = vor.u32 %v2418_v31, %v1991_v32  ;;  %v1914_v42 = vor.u32 %v2398_v39, %v1911_v40  ;;  %v2407_v31 = vld [vmem:[#allocation6 + $0x384] sm:$0xf0]  ;;  %v2406_v32 = vld [vmem:[#allocation6 + $0x384] sm:$0xf]  ;;  %v2063_v40 = vld [vmem:[#allocation6 + $0x478] sm:$0xf0] }
  0x52   :  { %v1946_v35 = vor.u32 %v2406_v32, %v1943_v34  ;;  %v2431_v34 = vld [vmem:[#allocation6 + $0x444] sm:$0xf0] }
  0x53   :  { %538 = vmatpush.bf16.msrb.mxu1 %v1762_v26  ;;  %v2419_v26 = vld [vmem:[#allocation6 + $0x3e4] sm:$0xf0] }
  0x54   :  { %552 = vmatpush.bf16.msrb.mxu2 %v1826_v44  ;;  %v1990_v29 = vor.u32 %v2419_v26, %v1989_v24  ;;  %v1983_v44 = vld [vmem:[#allocation6 + $0x3d8] sm:$0xf0]  ;;  %v1879_v24 = vld [vmem:[#allocation6 + $0x308] sm:$0xf0] }
  0x55   :  { %525 = vmatpush.bf16.msrb.mxu0 %v1814_v48  ;;  %v1986_v45 = vor.u32 %v2416_v43, %v1983_v44  ;;  %v1973_v48 = vld [vmem:[#allocation6 + $0x3c0] sm:$0xf]  ;;  %v1882_v26 = vor.u32 %v2390_v23, %v1879_v24  ;;  %v2432_v23 = vld [vmem:[#allocation6 + $0x454] sm:$0xf] }
  0x57   :  { %539 = vmatpush.bf16.msrb.mxu1 %v1754_v38  ;;  %v2417_v38 = vld [vmem:[#allocation6 + $0x3d4] sm:$0xf0] }
  0x58   :  { %553 = vmatpush.bf16.msrb.mxu2 %v1818_v50  ;;  %v1982_v41 = vor.u32 %v2417_v38, %v1981_v36  ;;  %v2415_v50 = vld [vmem:[#allocation6 + $0x3c4] sm:$0xf0]  ;;  %v2061_v36 = vld [vmem:[#allocation6 + $0x470] sm:$0xf]  ;;  %v2436_v38 = vld [vmem:[#allocation6 + $0x474] sm:$0xf] }
  0x59   :  { %v2066_v43 = vor.u32 %v2436_v38, %v2063_v40  ;;  %v2447_v40 = vld [vmem:[#allocation6 + $0x4c4] sm:$0xf0] }
  0xb5   :  { %v158_v52 = vpop.f32.mrf.mxu0 }
  0xb6   :  { %v159_v55 = vadd.f32 %v2514_v54, %v158_v52  ;;  %v2405_v52 = vld [vmem:[#allocation6 + $0x374] sm:$0xf0] }
  0xb8   :  { %2516 = vtanh.f32 %v159_v55  ;;  %v1935_v55 = vld [vmem:[#allocation6 + $0x378] sm:$0xf0] }
  0xbd   :  { %v160_v56 = vpop.f32.mrf.mxu0 }
  0xbe   :  { %v161_v57 = vadd.f32 %v2514_v54, %v160_v56  ;;  %v2517_v58 = vpop.eup %2516  ;;  %v1934_v54 = vor.u32 %v2405_v52, %v1933_v51  ;;  %v1925_v56 = vld [vmem:[#allocation6 + $0x360] sm:$0xf]  ;;  %v2396_v51 = vld [vmem:[#allocation6 + $0x334] sm:$0xf]  ;;  %v1903_v52 = vld [vmem:[#allocation6 + $0x338] sm:$0xf0] }
  0xc0   :  { %2518 = vtanh.f32 %v161_v57  ;;  %v2403_v57 = vld [vmem:[#allocation6 + $0x364] sm:$0xf0]  ;;  %766 = vmatpush.bf16.msrb.mxu3 %v1934_v54  ;;  %v1906_v54 = vor.u32 %v2396_v51, %v1903_v52  ;;  %v2055_v51 = vld [vmem:[#allocation6 + $0x468] sm:$0xf0] }
  0xc1   :  { %v1926_v62 = vor.u32 %v2403_v57, %v1925_v56  ;;  %v1975_v56 = vld [vmem:[#allocation6 + $0x3c8] sm:$0xf0] }
  0xc4   :  { %767 = vmatpush.bf16.msrb.mxu3 %v1926_v62  ;;  %v2413_v62 = vld [vmem:[#allocation6 + $0x3b4] sm:$0xf0] }
  0xc6   :  { %v2519_v59 = vpop.eup %2518 }
  0xc7   :  { %v182_v60 = vpack.c.bf16 %v2519_v59, %v2517_v58  ;;  %v1938_v58 = vor.u32 %v2404_v53, %v1935_v55  ;;  %v1997_v59 = vld [vmem:[#allocation6 + $0x3f0] sm:$0xf]  ;;  %v1974_v53 = vor.u32 %v2415_v50, %v1973_v48  ;;  %v2414_v55 = vld [vmem:[#allocation6 + $0x3c4] sm:$0xf] }
  0xc8   :  { %768 = vmatpush.bf16.msrb.mxu3 %v1918_v25  ;;  %v1978_v57 = vor.u32 %v2414_v55, %v1975_v56  ;;  %v2434_v50 = vld [vmem:[#allocation6 + $0x464] sm:$0xf]  ;;  %v2451_v55 = vld [vmem:[#allocation6 + $0x4e4] sm:$0xf0] }
  0xc9   :  { %278 = vmatmul.bf16.vlgmr.msra.gmra.mxu1 %v182_v60  ;;  %292 = vmatmul.bf16.vlgmr.msra.gmra.mxu2 %v182_v60  ;;  %v2421_v60 = vld [vmem:[#allocation6 + $0x3f4] sm:$0xf0]  ;;  %v2450_v56 = vld [vmem:[#allocation6 + $0x4e4] sm:$0xf] }
  0xca   :  { %v1998_v63 = vor.u32 %v2421_v60, %v1997_v59  ;;  %794 = vmatpush.bf16.msra.mxu1 %v1938_v58  ;;  %808 = vmatpush.bf16.msra.mxu2 %v2002_v4  ;;  %v1893_v58 = vld [vmem:[#allocation6 + $0x320] sm:$0xf]  ;;  %v2395_v59 = vld [vmem:[#allocation6 + $0x324] sm:$0xf0]  ;;  %v1965_v60 = vld [vmem:[#allocation6 + $0x3b0] sm:$0xf] }
  0xcb   :  { %v1894_v61 = vor.u32 %v2395_v59, %v1893_v58  ;;  %v1966_v1 = vor.u32 %v2413_v62, %v1965_v60  ;;  %v1967_v4 = vld [vmem:[#allocation6 + $0x3b8] sm:$0xf0]  ;;  %v2119_v58 = vld [vmem:[#allocation6 + $0x4e8] sm:$0xf0] }
  0xcc   :  { %780 = vmatpush.bf16.msra.mxu0 %v1998_v63  ;;  %769 = vmatpush.bf16.msrb.mxu3 %v1910_v37  ;;  %v2394_v63 = vld [vmem:[#allocation6 + $0x324] sm:$0xf]  ;;  %v2437_v37 = vld [vmem:[#allocation6 + $0x474] sm:$0xf0]  ;;  %v2122_v59 = vor.u32 %v2450_v56, %v2119_v58  ;;  %v2427_v58 = vld [vmem:[#allocation6 + $0x424] sm:$0xf0] }
  0xcd   :  { %v1898_v2 = vor.u32 %v2394_v63, %v1895_v0  ;;  %v2062_v39 = vor.u32 %v2437_v37, %v2061_v36  ;;  %v2039_v37 = vld [vmem:[#allocation6 + $0x448] sm:$0xf0] }
  0xce   :  { %795 = vmatpush.bf16.msra.mxu1 %v1930_v3  ;;  %809 = vmatpush.bf16.msra.mxu2 %v1994_v33  ;;  %v2412_v3 = vld [vmem:[#allocation6 + $0x3b4] sm:$0xf] }
  0xcf   :  { %v1970_v5 = vor.u32 %v2412_v3, %v1967_v4 }
  0xd0   :  { %781 = vmatpush.bf16.msra.mxu0 %v1990_v29  ;;  %770 = vmatpush.bf16.msrb.mxu3 %v1902_v49  ;;  %v1954_v29 = vor.u32 %v2408_v27, %v1951_v28  ;;  %v2435_v49 = vld [vmem:[#allocation6 + $0x464] sm:$0xf0]  ;;  %v2109_v27 = vld [vmem:[#allocation6 + $0x4d0] sm:$0xf]  ;;  %v2449_v28 = vld [vmem:[#allocation6 + $0x4d4] sm:$0xf0] }
  0xd1   :  { %v2054_v52 = vor.u32 %v2435_v49, %v2053_v47  ;;  %v2428_v47 = vld [vmem:[#allocation6 + $0x434] sm:$0xf]  ;;  %v2031_v49 = vld [vmem:[#allocation6 + $0x438] sm:$0xf0] }
  0xd2   :  { %796 = vmatpush.bf16.msra.mxu1 %v1922_v30  ;;  %810 = vmatpush.bf16.msra.mxu2 %v1986_v45  ;;  %v1941_v30 = vld [vmem:[#allocation6 + $0x380] sm:$0xf]  ;;  %v2452_v45 = vld [vmem:[#allocation6 + $0x4f4] sm:$0xf] }
  0xd3   :  { %v1942_v33 = vor.u32 %v2407_v31, %v1941_v30  ;;  %v2130_v48 = vor.u32 %v2452_v45, %v2127_v46  ;;  %v2110_v30 = vor.u32 %v2449_v28, %v2109_v27  ;;  %v2111_v31 = vld [vmem:[#allocation6 + $0x4d8] sm:$0xf0]  ;;  %v2029_v45 = vld [vmem:[#allocation6 + $0x430] sm:$0xf]  ;;  %v2429_v46 = vld [vmem:[#allocation6 + $0x434] sm:$0xf0] }
  0xd4   :  { %782 = vmatpush.bf16.msra.mxu0 %v1982_v41  ;;  %771 = vmatpush.bf16.msrb.mxu3 %v1894_v61  ;;  %v2125_v41 = vld [vmem:[#allocation6 + $0x4f0] sm:$0xf]  ;;  %v338_v61 = vld [vmem:[#allocation8 + $0x4] sm:$0x3]  ;;  %v2071_v27 = vld [vmem:[#allocation6 + $0x488] sm:$0xf0] }
  0xd5   :  { %v340_v0 = vperm.slane %v338_v61, 0  ;;  %v341_v3 = vperm.slane %v338_v61, 1  ;;  %v2023_v61 = vld [vmem:[#allocation6 + $0x428] sm:$0xf0] }
  0xd6   :  { %797 = vmatpush.bf16.msra.mxu1 %v1914_v42  ;;  %811 = vmatpush.bf16.msra.mxu2 %v1978_v57  ;;  %v2453_v42 = vld [vmem:[#allocation6 + $0x4f4] sm:$0xf0] }
  0xd7   :  { %v2126_v44 = vor.u32 %v2453_v42, %v2125_v41  ;;  %v2446_v41 = vld [vmem:[#allocation6 + $0x4c4] sm:$0xf] }
  0xd8   :  { %783 = vmatpush.bf16.msra.mxu0 %v1974_v53  ;;  %v2058_v53 = vor.u32 %v2434_v50, %v2055_v51  ;;  %v2034_v50 = vor.u32 %v2428_v47, %v2031_v49  ;;  %v2093_v51 = vld [vmem:[#allocation6 + $0x4b0] sm:$0xf] }
  0xda   :  { %798 = vmatpush.bf16.msra.mxu1 %v1906_v54  ;;  %812 = vmatpush.bf16.msra.mxu2 %v1970_v5  ;;  %v2117_v54 = vld [vmem:[#allocation6 + $0x4e0] sm:$0xf] }
  0xdb   :  { %v2118_v57 = vor.u32 %v2451_v55, %v2117_v54  ;;  %v2095_v55 = vld [vmem:[#allocation6 + $0x4b8] sm:$0xf0] }
  0xdc   :  { %784 = vmatpush.bf16.msra.mxu0 %v1966_v1 }
  0xde   :  { %799 = vmatpush.bf16.msra.mxu1 %v1898_v2 }
 0x146   :  { %v279_v6 = vpop.f32.mrf.mxu1 }
 0x147   :  { %v280_v9 = vadd.f32 %v279_v6, %v186_v7  ;;  %v1885_v6 = vld [vmem:[#allocation6 + $0x310] sm:$0xf] }
 0x149   :  { %v298_v13 = vmax.f32 %v280_v9, 0.0 }
 0x14c   :  { %v293_v8 = vpop.f32.mrf.mxu2 }
 0x14d   :  { %v294_v15 = vadd.f32 %v293_v8, %v187_v11  ;;  %v1957_v8 = vld [vmem:[#allocation6 + $0x3a0] sm:$0xf] }
 0x14e   :  { %v281_v10 = vpop.f32.mrf.mxu1 }
 0x14f   :  { %v282_v12 = vadd.f32 %v281_v10, %v186_v7  ;;  %v299_v19 = vmax.f32 %v294_v15, 0.0  ;;  %v2393_v7 = vld [vmem:[#allocation6 + $0x314] sm:$0xf0]  ;;  %v2411_v10 = vld [vmem:[#allocation6 + $0x3a4] sm:$0xf0] }
 0x150   :  { %v1886_v9 = vor.u32 %v2393_v7, %v1885_v6  ;;  %v2410_v15 = vld [vmem:[#allocation6 + $0x3a4] sm:$0xf] }
 0x151   :  { %v300_v14 = vmax.f32 %v282_v12, 0.0  ;;  %v1887_v12 = vld [vmem:[#allocation6 + $0x318] sm:$0xf0] }
 0x152   :  { %772 = vmatpush.bf16.msrb.mxu3 %v1886_v9 }
 0x153   :  { %v335_v16 = vpack.c.bf16 %v300_v14, %v298_v13  ;;  %v1958_v13 = vor.u32 %v2411_v10, %v1957_v8 }
 0x154   :  { %v295_v17 = vpop.f32.mrf.mxu2 }
 0x155   :  { %v296_v18 = vadd.f32 %v295_v17, %v187_v11  ;;  %512 = vmatmul.bf16.vlgmr.msra.gmra.mxu3 %v335_v16  ;;  %540 = vmatmul.bf16.vlgmr.msrb.gmra.mxu1 %v335_v16  ;;  %v2392_v11 = vld [vmem:[#allocation6 + $0x314] sm:$0xf]  ;;  %v1959_v16 = vld [vmem:[#allocation6 + $0x3a8] sm:$0xf0] }
 0x156   :  { %v1890_v14 = vor.u32 %v2392_v11, %v1887_v12  ;;  %v1962_v17 = vor.u32 %v2410_v15, %v1959_v16  ;;  %785 = vmatpush.bf16.msra.mxu0 %v1958_v13 }
 0x157   :  { %v301_v20 = vmax.f32 %v296_v18, 0.0  ;;  %v1877_v18 = vld [vmem:[#allocation6 + $0x300] sm:$0xf] }
 0x158   :  { %800 = vmatpush.bf16.msra.mxu1 %v1890_v14  ;;  %813 = vmatpush.bf16.msra.mxu2 %v1962_v17 }
 0x159   :  { %v336_v21 = vpack.c.bf16 %v301_v20, %v299_v19  ;;  %v2391_v19 = vld [vmem:[#allocation6 + $0x304] sm:$0xf0]  ;;  %v1949_v20 = vld [vmem:[#allocation6 + $0x390] sm:$0xf] }
 0x15a   :  { %v1950_v25 = vor.u32 %v2409_v22, %v1949_v20  ;;  %v2433_v22 = vld [vmem:[#allocation6 + $0x454] sm:$0xf0] }
 0x15b   :  { %526 = vmatmul.bf16.vlgmr.msrb.gmra.mxu0 %v336_v21  ;;  %554 = vmatmul.bf16.vlgmr.msrb.gmra.mxu2 %v336_v21  ;;  %v1878_v21 = vor.u32 %v2391_v19, %v1877_v18 }
 0x15c   :  { %786 = vmatpush.bf16.msra.mxu0 %v1950_v25  ;;  %801 = vmatpush.bf16.msra.mxu1 %v1882_v26  ;;  %v2047_v25 = vld [vmem:[#allocation6 + $0x458] sm:$0xf0] }
 0x15d   :  { %773 = vmatpush.bf16.msrb.mxu3 %v1878_v21  ;;  %814 = vmatpush.bf16.msra.mxu2 %v1954_v29  ;;  %v2045_v21 = vld [vmem:[#allocation6 + $0x450] sm:$0xf]  ;;  %v2050_v26 = vor.u32 %v2432_v23, %v2047_v25  ;;  %v2448_v29 = vld [vmem:[#allocation6 + $0x4d4] sm:$0xf]  ;;  %v2069_v23 = vld [vmem:[#allocation6 + $0x480] sm:$0xf] }
 0x15e   :  { %v2046_v24 = vor.u32 %v2433_v22, %v2045_v21  ;;  %v2114_v32 = vor.u32 %v2448_v29, %v2111_v31  ;;  %v2007_v21 = vld [vmem:[#allocation6 + $0x408] sm:$0xf0]  ;;  %v2438_v25 = vld [vmem:[#allocation6 + $0x484] sm:$0xf] }
 0x15f   :  { %v2074_v28 = vor.u32 %v2438_v25, %v2071_v27  ;;  %v2463_v27 = vld [vmem:[#allocation6 + $0x544] sm:$0xf0] }
 0x160   :  { %787 = vmatpush.bf16.msra.mxu0 %v1942_v33  ;;  %1056 = vmatpush.bf16.msrb.mxu1 %v2066_v43  ;;  %v2037_v33 = vld [vmem:[#allocation6 + $0x440] sm:$0xf]  ;;  %v2103_v43 = vld [vmem:[#allocation6 + $0x4c8] sm:$0xf0] }
 0x161   :  { %815 = vmatpush.bf16.msra.mxu2 %v1946_v35  ;;  %1028 = vmatpush.bf16.msra.mxu3 %v2062_v39  ;;  %v2430_v35 = vld [vmem:[#allocation6 + $0x444] sm:$0xf]  ;;  %v2038_v36 = vor.u32 %v2431_v34, %v2037_v33  ;;  %v2101_v39 = vld [vmem:[#allocation6 + $0x4c0] sm:$0xf] }
 0x162   :  { %v2042_v38 = vor.u32 %v2430_v35, %v2039_v37  ;;  %v2102_v42 = vor.u32 %v2447_v40, %v2101_v39 }
 0x164   :  { %1042 = vmatpush.bf16.msrb.mxu0 %v2126_v44  ;;  %1057 = vmatpush.bf16.msrb.mxu1 %v2058_v53  ;;  %v2106_v44 = vor.u32 %v2446_v41, %v2103_v43  ;;  %v2444_v53 = vld [vmem:[#allocation6 + $0x4b4] sm:$0xf] }
 0x165   :  { %1070 = vmatpush.bf16.msrb.mxu2 %v2130_v48  ;;  %1029 = vmatpush.bf16.msra.mxu3 %v2054_v52  ;;  %v2030_v48 = vor.u32 %v2429_v46, %v2029_v45  ;;  %v2445_v52 = vld [vmem:[#allocation6 + $0x4b4] sm:$0xf0]  ;;  %v2098_v56 = vor.u32 %v2444_v53, %v2095_v55 }
 0x166   :  { %v2094_v54 = vor.u32 %v2445_v52, %v2093_v51  ;;  %v2469_v55 = vld [vmem:[#allocation6 + $0x574] sm:$0xf0] }
 0x168   :  { %1043 = vmatpush.bf16.msrb.mxu0 %v2118_v57  ;;  %1058 = vmatpush.bf16.msrb.mxu1 %v2050_v26  ;;  %v2021_v57 = vld [vmem:[#allocation6 + $0x420] sm:$0xf] }
 0x169   :  { %1071 = vmatpush.bf16.msrb.mxu2 %v2122_v59  ;;  %1030 = vmatpush.bf16.msra.mxu3 %v2046_v24  ;;  %v2426_v59 = vld [vmem:[#allocation6 + $0x424] sm:$0xf]  ;;  %v2439_v24 = vld [vmem:[#allocation6 + $0x484] sm:$0xf0] }
 0x16a   :  { %v2070_v26 = vor.u32 %v2439_v24, %v2069_v23  ;;  %v2480_v23 = vld [vmem:[#allocation6 + $0x5d4] sm:$0xf]  ;;  %v2245_v24 = vld [vmem:[#allocation6 + $0x5d8] sm:$0xf0] }
 0x16b   :  { %v2248_v25 = vor.u32 %v2480_v23, %v2245_v24 }
 0x16c   :  { %1044 = vmatpush.bf16.msrb.mxu0 %v2110_v30  ;;  %1059 = vmatpush.bf16.msrb.mxu1 %v2042_v38  ;;  %v600_v30 = vld [vmem:[#allocation8 + $0x6] sm:$0x3] }
 0x16d   :  { %1072 = vmatpush.bf16.msrb.mxu2 %v2114_v32  ;;  %1031 = vmatpush.bf16.msra.mxu3 %v2038_v36  ;;  %v602_v33 = vperm.slane %v600_v30, 0  ;;  %v603_v35 = vperm.slane %v600_v30, 1  ;;  %v2479_v30 = vld [vmem:[#allocation6 + $0x5c4] sm:$0xf0] }
 0x170   :  { %1045 = vmatpush.bf16.msrb.mxu0 %v2102_v42  ;;  %1060 = vmatpush.bf16.msrb.mxu1 %v2034_v50 }
 0x171   :  { %1073 = vmatpush.bf16.msrb.mxu2 %v2106_v44  ;;  %1032 = vmatpush.bf16.msra.mxu3 %v2030_v48 }
 0x174   :  { %1046 = vmatpush.bf16.msrb.mxu0 %v2094_v54  ;;  %v2195_v54 = vld [vmem:[#allocation6 + $0x570] sm:$0xf] }
 0x175   :  { %1074 = vmatpush.bf16.msrb.mxu2 %v2098_v56  ;;  %v2259_v56 = vld [vmem:[#allocation6 + $0x5f0] sm:$0xf] }
 0x1d2   :  { %v541_v60 = vpop.f32.mrf.mxu1 }
 0x1d3   :  { %v542_v9 = vadd.f32 %v541_v60, %v341_v3  ;;  %v2022_v60 = vor.u32 %v2427_v58, %v2021_v57  ;;  %v2196_v57 = vor.u32 %v2469_v55, %v2195_v54  ;;  %v2485_v58 = vld [vmem:[#allocation6 + $0x5f4] sm:$0xf0]  ;;  %v2475_v54 = vld [vmem:[#allocation6 + $0x5a4] sm:$0xf0]  ;;  %v2458_v55 = vld [vmem:[#allocation6 + $0x524] sm:$0xf] }
 0x1d5   :  { %1033 = vmatpush.bf16.msra.mxu3 %v2022_v60  ;;  %v2197_v60 = vld [vmem:[#allocation6 + $0x578] sm:$0xf0] }
 0x1d8   :  { %v513_v62 = vpop.f32.mrf.mxu3  ;;  %v527_v63 = vpop.f32.mrf.mxu0 }
 0x1d9   :  { %v514_v1 = vadd.f32 %v513_v62, %v340_v0  ;;  %v2026_v62 = vor.u32 %v2426_v59, %v2023_v61  ;;  %v2468_v59 = vld [vmem:[#allocation6 + $0x574] sm:$0xf]  ;;  %v2260_v61 = vor.u32 %v2485_v58, %v2259_v56  ;;  %v2157_v56 = vld [vmem:[#allocation6 + $0x528] sm:$0xf0] }
 0x1da   :  { %v543_v7 = vpop.f32.mrf.mxu1  ;;  %v2160_v58 = vor.u32 %v2458_v55, %v2157_v56 }
 0x1db   :  { %v528_v5 = vadd.f32 %v527_v63, %v514_v1  ;;  %v544_v12 = vadd.f32 %v543_v7, %v341_v3  ;;  %v2085_v63 = vld [vmem:[#allocation6 + $0x4a0] sm:$0xf]  ;;  %v2442_v1 = vld [vmem:[#allocation6 + $0x4a4] sm:$0xf]  ;;  %v2087_v3 = vld [vmem:[#allocation6 + $0x4a8] sm:$0xf0]  ;;  %1061 = vmatpush.bf16.msrb.mxu1 %v2026_v62  ;;  %v2200_v62 = vor.u32 %v2468_v59, %v2197_v60 }
 0x1dc   :  { %v2424_v7 = vld [vmem:[#allocation6 + $0x414] sm:$0xf]  ;;  %v2474_v59 = vld [vmem:[#allocation6 + $0x5a4] sm:$0xf]  ;;  %v2221_v60 = vld [vmem:[#allocation6 + $0x5a8] sm:$0xf0] }
 0x1dd   :  { %v560_v11 = vmax.f32 %v528_v5, 0.0  ;;  %v2013_v5 = vld [vmem:[#allocation6 + $0x410] sm:$0xf] }
 0x1de   :  { %v555_v2 = vpop.f32.mrf.mxu2 }
 0x1df   :  { %v556_v13 = vadd.f32 %v555_v2, %v542_v9  ;;  %v2015_v9 = vld [vmem:[#allocation6 + $0x418] sm:$0xf0] }
 0x1e0   :  { %v515_v4 = vpop.f32.mrf.mxu3  ;;  %v529_v8 = vpop.f32.mrf.mxu0 }
 0x1e1   :  { %v516_v6 = vadd.f32 %v515_v4, %v340_v0  ;;  %v561_v18 = vmax.f32 %v556_v13, 0.0  ;;  %v2443_v0 = vld [vmem:[#allocation6 + $0x4a4] sm:$0xf0]  ;;  %v2090_v4 = vor.u32 %v2442_v1, %v2087_v3  ;;  %v2440_v13 = vld [vmem:[#allocation6 + $0x494] sm:$0xf] }
 0x1e2   :  { %v2086_v2 = vor.u32 %v2443_v0, %v2085_v63  ;;  %v2484_v63 = vld [vmem:[#allocation6 + $0x5f4] sm:$0xf]  ;;  %v2261_v0 = vld [vmem:[#allocation6 + $0x5f8] sm:$0xf0]  ;;  %v2467_v3 = vld [vmem:[#allocation6 + $0x564] sm:$0xf0] }
 0x1e3   :  { %v530_v10 = vadd.f32 %v529_v8, %v516_v6  ;;  %v2425_v6 = vld [vmem:[#allocation6 + $0x414] sm:$0xf0]  ;;  %1075 = vmatpush.bf16.msrb.mxu2 %v2090_v4  ;;  %v2264_v1 = vor.u32 %v2484_v63, %v2261_v0  ;;  %v2251_v4 = vld [vmem:[#allocation6 + $0x5e0] sm:$0xf]  ;;  %v2211_v0 = vld [vmem:[#allocation6 + $0x590] sm:$0xf] }
 0x1e4   :  { %1047 = vmatpush.bf16.msrb.mxu0 %v2086_v2  ;;  %v2014_v8 = vor.u32 %v2425_v6, %v2013_v5  ;;  %v2187_v2 = vld [vmem:[#allocation6 + $0x560] sm:$0xf]  ;;  %v2483_v6 = vld [vmem:[#allocation6 + $0x5e4] sm:$0xf0]  ;;  %v2457_v63 = vld [vmem:[#allocation6 + $0x514] sm:$0xf0] }
 0x1e5   :  { %v562_v14 = vmax.f32 %v530_v10, 0.0  ;;  %v2018_v10 = vor.u32 %v2424_v7, %v2015_v9  ;;  %v2188_v5 = vor.u32 %v2467_v3, %v2187_v2  ;;  %v2466_v7 = vld [vmem:[#allocation6 + $0x564] sm:$0xf]  ;;  %v2252_v9 = vor.u32 %v2483_v6, %v2251_v4  ;;  %v2473_v2 = vld [vmem:[#allocation6 + $0x594] sm:$0xf0] }
 0x1e6   :  { %v557_v15 = vpop.f32.mrf.mxu2  ;;  %1034 = vmatpush.bf16.msra.mxu3 %v2014_v8  ;;  %v2189_v8 = vld [vmem:[#allocation6 + $0x568] sm:$0xf0]  ;;  %v2456_v3 = vld [vmem:[#allocation6 + $0x514] sm:$0xf]  ;;  %v2149_v4 = vld [vmem:[#allocation6 + $0x518] sm:$0xf0] }
 0x1e7   :  { %v597_v16 = vpack.c.bf16 %v562_v14, %v560_v11  ;;  %v558_v17 = vadd.f32 %v557_v15, %v544_v12  ;;  %v2077_v11 = vld [vmem:[#allocation6 + $0x490] sm:$0xf]  ;;  %v2441_v12 = vld [vmem:[#allocation6 + $0x494] sm:$0xf0]  ;;  %v2079_v15 = vld [vmem:[#allocation6 + $0x498] sm:$0xf0]  ;;  %1062 = vmatpush.bf16.msrb.mxu1 %v2018_v10  ;;  %v2192_v10 = vor.u32 %v2466_v7, %v2189_v8  ;;  %v2152_v6 = vor.u32 %v2456_v3, %v2149_v4 }
 0x1e8   :  { %v2078_v14 = vor.u32 %v2441_v12, %v2077_v11  ;;  %v2482_v11 = vld [vmem:[#allocation6 + $0x5e4] sm:$0xf]  ;;  %v2253_v12 = vld [vmem:[#allocation6 + $0x5e8] sm:$0xf0]  ;;  %v2472_v7 = vld [vmem:[#allocation6 + $0x594] sm:$0xf] }
 0x1e9   :  { %v563_v19 = vmax.f32 %v558_v17, 0.0  ;;  %774 = vmatmul.bf16.vlgmr.msrb.gmra.mxu3 %v597_v16  ;;  %802 = vmatmul.bf16.vlgmr.msra.gmra.mxu1 %v597_v16  ;;  %v2082_v16 = vor.u32 %v2440_v13, %v2079_v15  ;;  %v2005_v17 = vld [vmem:[#allocation6 + $0x400] sm:$0xf]  ;;  %v2256_v13 = vor.u32 %v2482_v11, %v2253_v12  ;;  %v2465_v15 = vld [vmem:[#allocation6 + $0x554] sm:$0xf0] }
 0x1ea   :  { %1048 = vmatpush.bf16.msrb.mxu0 %v2078_v14  ;;  %v2179_v14 = vld [vmem:[#allocation6 + $0x550] sm:$0xf]  ;;  %v2213_v8 = vld [vmem:[#allocation6 + $0x598] sm:$0xf0]  ;;  %v2455_v11 = vld [vmem:[#allocation6 + $0x504] sm:$0xf0] }
 0x1eb   :  { %v598_v20 = vpack.c.bf16 %v563_v19, %v561_v18  ;;  %v2423_v18 = vld [vmem:[#allocation6 + $0x404] sm:$0xf0]  ;;  %v2422_v19 = vld [vmem:[#allocation6 + $0x404] sm:$0xf]  ;;  %1076 = vmatpush.bf16.msrb.mxu2 %v2082_v16  ;;  %v2243_v16 = vld [vmem:[#allocation6 + $0x5d0] sm:$0xf] }
 0x1ec   :  { %v2010_v22 = vor.u32 %v2422_v19, %v2007_v21  ;;  %v2464_v19 = vld [vmem:[#allocation6 + $0x554] sm:$0xf]  ;;  %v2203_v12 = vld [vmem:[#allocation6 + $0x580] sm:$0xf] }
 0x1ed   :  { %788 = vmatmul.bf16.vlgmr.msra.gmra.mxu0 %v598_v20  ;;  %816 = vmatmul.bf16.vlgmr.msra.gmra.mxu2 %v598_v20  ;;  %v2006_v20 = vor.u32 %v2423_v18, %v2005_v17  ;;  %v2180_v17 = vor.u32 %v2465_v15, %v2179_v14  ;;  %v2481_v18 = vld [vmem:[#allocation6 + $0x5d4] sm:$0xf0]  ;;  %v2471_v14 = vld [vmem:[#allocation6 + $0x584] sm:$0xf0]  ;;  %v2454_v15 = vld [vmem:[#allocation6 + $0x504] sm:$0xf] }
 0x1ee   :  { %1063 = vmatpush.bf16.msrb.mxu1 %v2010_v22  ;;  %1049 = vmatpush.bf16.msrb.mxu0 %v2070_v26  ;;  %v2244_v21 = vor.u32 %v2481_v18, %v2243_v16  ;;  %v2171_v26 = vld [vmem:[#allocation6 + $0x540] sm:$0xf]  ;;  %v2141_v16 = vld [vmem:[#allocation6 + $0x508] sm:$0xf0]  ;;  %v2204_v18 = vor.u32 %v2471_v14, %v2203_v12 }
 0x1ef   :  { %1035 = vmatpush.bf16.msra.mxu3 %v2006_v20  ;;  %1077 = vmatpush.bf16.msrb.mxu2 %v2074_v28  ;;  %v2181_v20 = vld [vmem:[#allocation6 + $0x558] sm:$0xf0]  ;;  %v2235_v28 = vld [vmem:[#allocation6 + $0x5c0] sm:$0xf] }
 0x1f0   :  { %v2184_v22 = vor.u32 %v2464_v19, %v2181_v20  ;;  %v2144_v19 = vor.u32 %v2454_v15, %v2141_v16  ;;  %v2470_v20 = vld [vmem:[#allocation6 + $0x584] sm:$0xf]  ;;  %v1593_v15 = vstv %s2713_s2 }
 0x1f2   :  { %1362 = vmatpush.bf16.msra.mxu0 %v2260_v61  ;;  %1376 = vmatpush.bf16.msra.mxu1 %v2200_v62  ;;  %v2224_v61 = vor.u32 %v2474_v59, %v2221_v60  ;;  %v2147_v62 = vld [vmem:[#allocation6 + $0x510] sm:$0xf] }
 0x1f3   :  { %1348 = vmatpush.bf16.msrb.mxu3 %v2196_v57  ;;  %1390 = vmatpush.bf16.msra.mxu2 %v2264_v1  ;;  %v2148_v1 = vor.u32 %v2457_v63, %v2147_v62 }
 0x1f6   :  { %1363 = vmatpush.bf16.msra.mxu0 %v2252_v9  ;;  %1377 = vmatpush.bf16.msra.mxu1 %v2192_v10  ;;  %v2216_v9 = vor.u32 %v2472_v7, %v2213_v8  ;;  %v2139_v10 = vld [vmem:[#allocation6 + $0x500] sm:$0xf] }
 0x1f7   :  { %1349 = vmatpush.bf16.msrb.mxu3 %v2188_v5  ;;  %1391 = vmatpush.bf16.msra.mxu2 %v2256_v13  ;;  %v2212_v5 = vor.u32 %v2473_v2, %v2211_v0  ;;  %v2140_v13 = vor.u32 %v2455_v11, %v2139_v10 }
 0x1fa   :  { %1364 = vmatpush.bf16.msra.mxu0 %v2244_v21  ;;  %1378 = vmatpush.bf16.msra.mxu1 %v2184_v22  ;;  %v2205_v21 = vld [vmem:[#allocation6 + $0x588] sm:$0xf0] }
 0x1fb   :  { %1350 = vmatpush.bf16.msrb.mxu3 %v2180_v17  ;;  %1392 = vmatpush.bf16.msra.mxu2 %v2248_v25  ;;  %v862_v17 = vld [vmem:[#allocation8 + $0x8] sm:$0x3]  ;;  %v2208_v22 = vor.u32 %v2470_v20, %v2205_v21 }
 0x1fc   :  { %v865_v24 = vperm.slane %v862_v17, 1  ;;  %v864_v25 = vperm.slane %v862_v17, 0 }
 0x266   :  { %v803_v29 = vpop.f32.mrf.mxu1 }
 0x267   :  { %v804_v39 = vadd.f32 %v803_v29, %v603_v35  ;;  %v2172_v29 = vor.u32 %v2463_v27, %v2171_v26  ;;  %v2668_v26 = vmov 72  }
 0x268   :  { %2512 = vset.pattern.permute.xlu0 %v2668_v26  ;;  %2513 = vset.pattern.permute.xlu1 %v2668_v26 }
 0x269   :  { %1351 = vmatpush.bf16.msrb.mxu3 %v2172_v29 }
 0x26a   :  { %v789_v31 = vpop.f32.mrf.mxu0 }
 0x26c   :  { %v775_v32 = vpop.f32.mrf.mxu3 }
 0x26d   :  { %v776_v36 = vadd.f32 %v775_v32, %v602_v33  ;;  %v2173_v32 = vld [vmem:[#allocation6 + $0x548] sm:$0xf0] }
 0x26e   :  { %v805_v37 = vpop.f32.mrf.mxu1 }
 0x26f   :  { %v790_v40 = vadd.f32 %v789_v31, %v776_v36  ;;  %v806_v43 = vadd.f32 %v805_v37, %v603_v35  ;;  %v2462_v31 = vld [vmem:[#allocation6 + $0x544] sm:$0xf]  ;;  %v2237_v36 = vld [vmem:[#allocation6 + $0x5c8] sm:$0xf0] }
 0x270   :  { %v817_v34 = vpop.f32.mrf.mxu2  ;;  %v2478_v35 = vld [vmem:[#allocation6 + $0x5c4] sm:$0xf] }
 0x271   :  { %v818_v44 = vadd.f32 %v817_v34, %v804_v39  ;;  %v822_v47 = vmax.f32 %v790_v40, 0.0  ;;  %v2176_v34 = vor.u32 %v2462_v31, %v2173_v32  ;;  %v2240_v37 = vor.u32 %v2478_v35, %v2237_v36  ;;  %v2461_v39 = vld [vmem:[#allocation6 + $0x534] sm:$0xf0]  ;;  %v2227_v40 = vld [vmem:[#allocation6 + $0x5b0] sm:$0xf] }
 0x272   :  { %v791_v42 = vpop.f32.mrf.mxu0 }
 0x273   :  { %v823_v50 = vmax.f32 %v818_v44, 0.0  ;;  %1379 = vmatpush.bf16.msra.mxu1 %v2176_v34  ;;  %1393 = vmatpush.bf16.msra.mxu2 %v2240_v37  ;;  %v2165_v44 = vld [vmem:[#allocation6 + $0x538] sm:$0xf0] }
 0x274   :  { %v777_v38 = vpop.f32.mrf.mxu3 }
 0x275   :  { %v778_v41 = vadd.f32 %v777_v38, %v602_v33  ;;  %v2236_v33 = vor.u32 %v2479_v30, %v2235_v28  ;;  %v2163_v38 = vld [vmem:[#allocation6 + $0x530] sm:$0xf] }
 0x277   :  { %v792_v45 = vadd.f32 %v791_v42, %v778_v41  ;;  %1365 = vmatpush.bf16.msra.mxu0 %v2236_v33  ;;  %v2164_v41 = vor.u32 %v2461_v39, %v2163_v38  ;;  %v2477_v42 = vld [vmem:[#allocation6 + $0x5b4] sm:$0xf0] }
 0x278   :  { %v819_v46 = vpop.f32.mrf.mxu2 }
 0x279   :  { %v824_v48 = vmax.f32 %v792_v45, 0.0  ;;  %v820_v49 = vadd.f32 %v819_v46, %v806_v43  ;;  %v2460_v43 = vld [vmem:[#allocation6 + $0x534] sm:$0xf]  ;;  %v2228_v45 = vor.u32 %v2477_v42, %v2227_v40  ;;  %1352 = vmatpush.bf16.msrb.mxu3 %v2164_v41 }
 0x27a   :  { %v2168_v46 = vor.u32 %v2460_v43, %v2165_v44 }
 0x27b   :  { %v859_v51 = vpack.c.bf16 %v824_v48, %v822_v47  ;;  %v825_v52 = vmax.f32 %v820_v49, 0.0  ;;  %v2476_v47 = vld [vmem:[#allocation6 + $0x5b4] sm:$0xf]  ;;  %v2229_v48 = vld [vmem:[#allocation6 + $0x5b8] sm:$0xf0]  ;;  %1366 = vmatpush.bf16.msra.mxu0 %v2228_v45 }
 0x27c   :  { %v2232_v49 = vor.u32 %v2476_v47, %v2229_v48  ;;  %1380 = vmatpush.bf16.msra.mxu1 %v2168_v46 }
 0x27d   :  { %v860_v53 = vpack.c.bf16 %v825_v52, %v823_v50  ;;  %1036 = vmatmul.bf16.vlgmr.msra.gmra.mxu3 %v859_v51  ;;  %1064 = vmatmul.bf16.vlgmr.msrb.gmra.mxu1 %v859_v51  ;;  %v2155_v50 = vld [vmem:[#allocation6 + $0x520] sm:$0xf]  ;;  %v2459_v51 = vld [vmem:[#allocation6 + $0x524] sm:$0xf0] }
 0x27e   :  { %v2219_v52 = vld [vmem:[#allocation6 + $0x5a0] sm:$0xf]  ;;  %1394 = vmatpush.bf16.msra.mxu2 %v2232_v49 }
 0x27f   :  { %1050 = vmatmul.bf16.vlgmr.msrb.gmra.mxu0 %v860_v53  ;;  %1078 = vmatmul.bf16.vlgmr.msrb.gmra.mxu2 %v860_v53  ;;  %v2156_v53 = vor.u32 %v2459_v51, %v2155_v50  ;;  %v2220_v57 = vor.u32 %v2475_v54, %v2219_v52 }
 0x280   :  { %1381 = vmatpush.bf16.msra.mxu1 %v2160_v58 }
 0x281   :  { %1353 = vmatpush.bf16.msrb.mxu3 %v2156_v53  ;;  %1367 = vmatpush.bf16.msra.mxu0 %v2220_v57 }
 0x282   :  { %1395 = vmatpush.bf16.msra.mxu2 %v2224_v61 }
 0x284   :  { %1382 = vmatpush.bf16.msra.mxu1 %v2152_v6 }
 0x285   :  { %1354 = vmatpush.bf16.msrb.mxu3 %v2148_v1  ;;  %1368 = vmatpush.bf16.msra.mxu0 %v2212_v5 }
 0x286   :  { %1396 = vmatpush.bf16.msra.mxu2 %v2216_v9 }
 0x288   :  { %1383 = vmatpush.bf16.msra.mxu1 %v2144_v19  ;;  %v1597_v19 = vstv %s2715_s3 }
 0x289   :  { %1355 = vmatpush.bf16.msrb.mxu3 %v2140_v13  ;;  %1369 = vmatpush.bf16.msra.mxu0 %v2204_v18 }
 0x28a   :  { %1397 = vmatpush.bf16.msra.mxu2 %v2208_v22 }
 0x2fa   :  { %v1065_v23 = vpop.f32.mrf.mxu1 }
 0x2fb   :  { %v1066_v29 = vadd.f32 %v1065_v23, %v865_v24 }
 0x2fc   :  { %v1051_v27 = vpop.f32.mrf.mxu0 }
 0x300   :  { %v1037_v28 = vpop.f32.mrf.mxu3 }
 0x301   :  { %v1038_v30 = vadd.f32 %v1037_v28, %v864_v25 }
 0x302   :  { %v1079_v31 = vpop.f32.mrf.mxu2  ;;  %v1067_v36 = vpop.f32.mrf.mxu1 }
 0x303   :  { %v1052_v32 = vadd.f32 %v1051_v27, %v1038_v30  ;;  %v1080_v33 = vadd.f32 %v1079_v31, %v1066_v29  ;;  %v1068_v40 = vadd.f32 %v1067_v36, %v865_v24  ;;  %v2493_v36 = vld [vmem:[#allocation6 + $0x674] sm:$0xf0] }
 0x304   :  { %v1053_v43 = vpop.f32.mrf.mxu0 }
 0x305   :  { %v1126_v34 = vmin.f32 %v1052_v32, 0.0  ;;  %v2131_v35 = vmul.f32 -1.442695, %v1080_v33  ;;  %v1127_v37 = vmin.f32 %v1080_v33, 0.0  ;;  %vm1122_vm0 = vcmp.gt.f32.partialorder %v1052_v32, 0.0 }
 0x306   :  { %vm1123_vm1 = vcmp.gt.f32.partialorder %v1080_v33, 0.0 }
 0x307   :  { %2520 = vpow2.f32 %v2131_v35  ;;  %v1130_v38 = vmul.f32 1.442695, %v1126_v34  ;;  %v1132_v41 = vmul.f32 1.442695, %v1127_v37  ;;  %v2299_v35 = vld [vmem:[#allocation6 + $0x670] sm:$0xf] }
 0x308   :  { %v1039_v39 = vpop.f32.mrf.mxu3  ;;  %v2300_v37 = vor.u32 %v2493_v36, %v2299_v35 }
 0x309   :  { %v1040_v42 = vadd.f32 %v1039_v39, %v864_v25  ;;  %2522 = vpow2.f32 %v1130_v38  ;;  %v2327_v38 = vld [vmem:[#allocation6 + $0x6e0] sm:$0xf]  ;;  %v2500_v39 = vld [vmem:[#allocation6 + $0x6e4] sm:$0xf0] }
 0x30a   :  { %v1081_v44 = vpop.f32.mrf.mxu2  ;;  %2524 = vpow2.f32 %v1132_v41  ;;  %1564 = vmatpush.bf16.msra.mxu3 %v2300_v37  ;;  %v2295_v41 = vld [vmem:[#allocation6 + $0x660] sm:$0xf] }
 0x30b   :  { %v1054_v45 = vadd.f32 %v1053_v43, %v1040_v42  ;;  %v1082_v46 = vadd.f32 %v1081_v44, %v1068_v40  ;;  %v2328_v40 = vor.u32 %v2500_v39, %v2327_v38  ;;  %v2492_v42 = vld [vmem:[#allocation6 + $0x664] sm:$0xf0]  ;;  %v2323_v44 = vld [vmem:[#allocation6 + $0x6d0] sm:$0xf] }
 0x30c   :  { %v2296_v43 = vor.u32 %v2492_v42, %v2295_v41 }
 0x30d   :  { %v2521_v47 = vpop.eup %2520  ;;  %v1128_v48 = vmin.f32 %v1054_v45, 0.0  ;;  %v2132_v49 = vmul.f32 -1.442695, %v1082_v46  ;;  %v1129_v51 = vmin.f32 %v1082_v46, 0.0  ;;  %vm1124_vm2 = vcmp.gt.f32.partialorder %v1054_v45, 0.0 }
 0x30e   :  { %v1090_v50 = vadd.f32 1.0, %v2521_v47  ;;  %vm1125_vm3 = vcmp.gt.f32.partialorder %v1082_v46, 0.0  ;;  %1565 = vmatpush.bf16.msra.mxu3 %v2296_v43  ;;  %v2291_v47 = vld [vmem:[#allocation6 + $0x650] sm:$0xf] }
 0x30f   :  { %v1134_v52 = vmul.f32 1.442695, %v1128_v48  ;;  %2526 = vpow2.f32 %v2132_v49  ;;  %v1136_v53 = vmul.f32 1.442695, %v1129_v51  ;;  %v2523_v54 = vpop.eup %2522  ;;  %v2491_v48 = vld [vmem:[#allocation6 + $0x654] sm:$0xf0] }
 0x310   :  { %2528 = vrcp.f32 %v1090_v50  ;;  %v2525_v55 = vpop.eup %2524  ;;  %v2133_v58 = vadd.f32 -1.0, %v2523_v54  ;;  %v1101_v3 = vand.u32 2147483647, %v1090_v50  ;;  %v1103_v7 = vand.u32 2147483648, %v1090_v50  ;;  %v2498_v51 = vld [vmem:[#allocation6 + $0x6c4] sm:$0xf0] }
 0x311   :  { %2530 = vpow2.f32 %v1134_v52  ;;  %v2134_v59 = vadd.f32 -1.0, %v2525_v55  ;;  %vm1097_vm5 = vweird.f32 %v1090_v50  ;;  %v2292_v49 = vor.u32 %v2491_v48, %v2291_v47  ;;  %v2490_v54 = vld [vmem:[#allocation6 + $0x644] sm:$0xf0] }
 0x312   :  { %2532 = vpow2.f32 %v1136_v53  ;;  %v1142_v4 = vsel %vm1122_vm0, %v1052_v32, %v2133_v58  ;;  %v1104_v14 = vor.u32 1.1754944e-38, %v1103_v7  ;;  %vm1102_vm7 = vcmp.eq.f32.partialorder %v1101_v3, 8.507059e+37  ;;  %v2331_v32 = vld [vmem:[#allocation6 + $0x6f0] sm:$0xf]  ;;  %v2287_v53 = vld [vmem:[#allocation6 + $0x640] sm:$0xf] }
 0x313   :  { %v1143_v6 = vsel %vm1123_vm1, %v1080_v33, %v2134_v59  ;;  %v2501_v33 = vld [vmem:[#allocation6 + $0x6f4] sm:$0xf0]  ;;  %1566 = vmatpush.bf16.msra.mxu3 %v2292_v49  ;;  %v2288_v55 = vor.u32 %v2490_v54, %v2287_v53  ;;  %v2283_v59 = vld [vmem:[#allocation6 + $0x630] sm:$0xf] }
 0x314   :  { %v2332_v34 = vor.u32 %v2501_v33, %v2331_v32  ;;  %v2275_v7 = vld [vmem:[#allocation6 + $0x610] sm:$0xf] }
 0x315   :  { %v2527_v56 = vpop.eup %2526 }
 0x316   :  { %v2529_v57 = vpop.eup %2528  ;;  %v1091_v60 = vadd.f32 1.0, %v2527_v56  ;;  %1578 = vmatpush.bf16.msrb.mxu0 %v2332_v34  ;;  %v2315_v56 = vld [vmem:[#allocation6 + $0x6b0] sm:$0xf] }
 0x317   :  { %v2531_v61 = vpop.eup %2530  ;;  %v1093_v62 = vmul.f32 %v2529_v57, %v1090_v50  ;;  %vm1098_vm4 = vweird.f32 %v2529_v57  ;;  %v2319_v50 = vld [vmem:[#allocation6 + $0x6c0] sm:$0xf]  ;;  %1567 = vmatpush.bf16.msra.mxu3 %v2288_v55 }
 0x318   :  { %v2533_v63 = vpop.eup %2532  ;;  %v2135_v0 = vadd.f32 -1.0, %v2531_v61  ;;  %2534 = vrcp.f32 %v1091_v60  ;;  %vm1099_vm6 = vmor %vm1097_vm5, %vm1098_vm4  ;;  %v1118_v22 = vand.u32 2147483648, %v1091_v60  ;;  %v1116_v25 = vand.u32 2147483647, %v1091_v60 }
 0x319   :  { %v2136_v1 = vadd.f32 -1.0, %v2533_v63  ;;  %v1094_v2 = vsub.f32 1.0, %v1093_v62  ;;  %vm1112_vm9 = vweird.f32 %v1091_v60  ;;  %v2320_v52 = vor.u32 %v2498_v51, %v2319_v50  ;;  %v2311_v62 = vld [vmem:[#allocation6 + $0x6a0] sm:$0xf]  ;;  %v2496_v63 = vld [vmem:[#allocation6 + $0x6a4] sm:$0xf0] }
 0x31a   :  { %v1144_v5 = vsel %vm1124_vm2, %v1054_v45, %v2135_v0  ;;  %v1119_v27 = vor.u32 1.1754944e-38, %v1118_v22  ;;  %vm1117_vm11 = vcmp.eq.f32.partialorder %v1116_v25, 8.507059e+37  ;;  %1579 = vmatpush.bf16.msrb.mxu0 %v2328_v40  ;;  %v2499_v45 = vld [vmem:[#allocation6 + $0x6d4] sm:$0xf0]  ;;  %v2312_v0 = vor.u32 %v2496_v63, %v2311_v62 }
 0x31b   :  { %v1179_v8 = vpack.c.bf16 %v1144_v5, %v1142_v4  ;;  %v1145_v9 = vsel %vm1125_vm3, %v1082_v46, %v2136_v1  ;;  %v1095_v10 = vmul.f32 %v2529_v57, %v1094_v2  ;;  %v2324_v46 = vor.u32 %v2499_v45, %v2323_v44  ;;  %v2279_v1 = vld [vmem:[#allocation6 + $0x620] sm:$0xf]  ;;  %v2488_v2 = vld [vmem:[#allocation6 + $0x624] sm:$0xf0]  ;;  %v2307_v4 = vld [vmem:[#allocation6 + $0x690] sm:$0xf] }
 0x31c   :  { %v1180_v11 = vpack.c.bf16 %v1145_v9, %v1143_v6  ;;  %v2280_v3 = vor.u32 %v2488_v2, %v2279_v1  ;;  %v2495_v5 = vld [vmem:[#allocation6 + $0x694] sm:$0xf0] }
 0x31d   :  { %1356 = vmatmul.bf16.vlgmr.msrb.gmra.mxu3 %v1179_v8  ;;  %1384 = vmatmul.bf16.vlgmr.msra.gmra.mxu1 %v1179_v8  ;;  %v1096_v12 = vadd.f32 %v2529_v57, %v1095_v10  ;;  %v2308_v6 = vor.u32 %v2495_v5, %v2307_v4  ;;  %v2487_v8 = vld [vmem:[#allocation6 + $0x614] sm:$0xf0]  ;;  %v2303_v10 = vld [vmem:[#allocation6 + $0x680] sm:$0xf] }
 0x31e   :  { %v2535_v13 = vpop.eup %2534  ;;  %1370 = vmatmul.bf16.vlgmr.msra.gmra.mxu0 %v1180_v11  ;;  %1398 = vmatmul.bf16.vlgmr.msra.gmra.mxu2 %v1180_v11  ;;  %v2276_v9 = vor.u32 %v2487_v8, %v2275_v7  ;;  %v2494_v11 = vld [vmem:[#allocation6 + $0x684] sm:$0xf0] }
 0x31f   :  { %v1100_v16 = vsel %vm1099_vm6, %v2529_v57, %v1096_v12  ;;  %v1108_v17 = vmul.f32 %v2535_v13, %v1091_v60  ;;  %vm1113_vm8 = vweird.f32 %v2535_v13  ;;  %1580 = vmatpush.bf16.msrb.mxu0 %v2324_v46  ;;  %v2497_v57 = vld [vmem:[#allocation6 + $0x6b4] sm:$0xf0]  ;;  %v2304_v12 = vor.u32 %v2494_v11, %v2303_v10 }
 0x320   :  { %v1105_v18 = vsel %vm1102_vm7, %v1104_v14, %v1100_v16  ;;  %vm1114_vm10 = vmor %vm1112_vm9, %vm1113_vm8  ;;  %v2316_v58 = vor.u32 %v2497_v57, %v2315_v56  ;;  %v2489_v60 = vld [vmem:[#allocation6 + $0x634] sm:$0xf0]  ;;  %v2486_v14 = vld [vmem:[#allocation6 + $0x604] sm:$0xf0]  ;;  %v1600_v57 = vlaneseq }
 0x321   :  { %1605 = vperm.xlu0 %2512, %v1105_v18   ;;  %v1594_v20 = vmul.f32 %v1593_v15, %v1105_v18  ;;  %v1109_v21 = vsub.f32 1.0, %v1108_v17  ;;  %v2284_v61 = vor.u32 %v2489_v60, %v2283_v59 }
 0x322   :  { %v1601_v59 = vand.u32 127, %v1600_v57 }
 0x323   :  { %v1598_v23 = vadd.f32 %v1597_v19, %v1594_v20  ;;  %v1110_v24 = vmul.f32 %v2535_v13, %v1109_v21  ;;  %1581 = vmatpush.bf16.msrb.mxu0 %v2320_v52  ;;  %1568 = vmatpush.bf16.msra.mxu3 %v2284_v61 }
 0x324   :  { %vm1602_vm0 = vcmp.eq.s32.totalorder %v1601_v59, 2  ;;  %vm1615_vm1 = vcmp.eq.s32.totalorder %v1601_v59, 3 }
 0x325   :  { %1618 = vperm.xlu1 %2513, %v1598_v23   ;;  %v1111_v26 = vadd.f32 %v2535_v13, %v1110_v24 }
 0x327   :  { %v1115_v28 = vsel %vm1114_vm10, %v2535_v13, %v1111_v26  ;;  %1582 = vmatpush.bf16.msrb.mxu0 %v2316_v58  ;;  %1569 = vmatpush.bf16.msra.mxu3 %v2280_v3  ;;  %v2271_v13 = vld [vmem:[#allocation6 + $0x600] sm:$0xf]  ;;  %v2515_v58 = vld [vmem:[#allocation8 + $0xc] ss:$0 sm:$0xff] }
 0x328   :  { %v1120_v29 = vsel %vm1117_vm11, %v1119_v27, %v1115_v28  ;;  %v2272_v16 = vor.u32 %v2486_v14, %v2271_v13 }
 0x329   :  { %v1595_v30 = vmul.f32 %v1593_v15, %v1120_v29  ;;  %1610 = vperm.xlu0 %2512, %v1120_v29   ;;  %v1182_v15 = vld [vmem:[#allocation8 + $0xa] sm:$0x3] }
 0x32a   :  { %v1185_v18 = vperm.slane %v1182_v15, 1 }
 0x32b   :  { %v1599_v31 = vadd.f32 %v1597_v19, %v1595_v30  ;;  %1583 = vmatpush.bf16.msrb.mxu0 %v2312_v0  ;;  %1570 = vmatpush.bf16.msra.mxu3 %v2276_v9  ;;  %v1184_v19 = vperm.slane %v1182_v15, 0 }
 0x32d   :  { %1623 = vperm.xlu1 %2513, %v1599_v31  }
 0x32f   :  { %1584 = vmatpush.bf16.msrb.mxu0 %v2308_v6  ;;  %1571 = vmatpush.bf16.msra.mxu3 %v2272_v16 }
 0x333   :  { %1585 = vmatpush.bf16.msrb.mxu0 %v2304_v12 }
 0x393   :  { %v1606_v63 = vpop.permute.xlu0 %1605 }
 0x397   :  { %v1619_v0 = vpop.permute.xlu1 %1618 }
 0x39a   :  { %v1385_v17 = vpop.f32.mrf.mxu1 }
 0x39b   :  { %v1371_v20 = vpop.f32.mrf.mxu0  ;;  %v1386_v21 = vadd.f32 %v1385_v17, %v1185_v18  ;;  %v1611_v8 = vpop.permute.xlu0 %1610 }
 0x39f   :  { %v1624_v9 = vpop.permute.xlu1 %1623 }
 0x3a0   :  { %v1357_v22 = vpop.f32.mrf.mxu3 }
 0x3a1   :  { %v1358_v23 = vadd.f32 %v1357_v22, %v1184_v19  ;;  %v1399_v24 = vpop.f32.mrf.mxu2 }
 0x3a2   :  { %v1400_v25 = vadd.f32 %v1399_v24, %v1386_v21  ;;  %v1387_v29 = vpop.f32.mrf.mxu1 }
 0x3a3   :  { %v1372_v26 = vadd.f32 %v1371_v20, %v1358_v23  ;;  %v1388_v31 = vadd.f32 %v1387_v29, %v1185_v18  ;;  %v1373_v36 = vpop.f32.mrf.mxu0 }
 0x3a4   :  { %v1409_v27 = vmin.f32 %v1400_v25, 0.0  ;;  %vm1405_vm12 = vcmp.gt.f32.partialorder %v1400_v25, 0.0 }
 0x3a5   :  { %v1408_v28 = vmin.f32 %v1372_v26, 0.0  ;;  %vm1404_vm14 = vcmp.gt.f32.partialorder %v1372_v26, 0.0 }
 0x3a6   :  { %v1414_v30 = vmul.f32 1.442695, %v1409_v27 }
 0x3a7   :  { %v1412_v33 = vmul.f32 1.442695, %v1408_v28 }
 0x3a8   :  { %v1359_v32 = vpop.f32.mrf.mxu3  ;;  %2536 = vpow2.f32 %v1414_v30 }
 0x3a9   :  { %v1360_v34 = vadd.f32 %v1359_v32, %v1184_v19  ;;  %v1401_v35 = vpop.f32.mrf.mxu2  ;;  %2538 = vpow2.f32 %v1412_v33 }
 0x3aa   :  { %v1402_v37 = vadd.f32 %v1401_v35, %v1388_v31 }
 0x3ab   :  { %v1374_v38 = vadd.f32 %v1373_v36, %v1360_v34 }
 0x3ac   :  { %v1411_v39 = vmin.f32 %v1402_v37, 0.0  ;;  %vm1407_vm13 = vcmp.gt.f32.partialorder %v1402_v37, 0.0 }
 0x3ad   :  { %v1410_v40 = vmin.f32 %v1374_v38, 0.0  ;;  %vm1406_vm15 = vcmp.gt.f32.partialorder %v1374_v38, 0.0 }
 0x3ae   :  { %v1418_v41 = vmul.f32 1.442695, %v1411_v39  ;;  %v2537_v43 = vpop.eup %2536 }
 0x3af   :  { %v1416_v42 = vmul.f32 1.442695, %v1410_v40  ;;  %v2539_v44 = vpop.eup %2538  ;;  %v2266_v45 = vadd.f32 -1.0, %v2537_v43 }
 0x3b0   :  { %2540 = vpow2.f32 %v1418_v41  ;;  %v2265_v47 = vadd.f32 -1.0, %v2539_v44 }
 0x3b1   :  { %2542 = vpow2.f32 %v1416_v42  ;;  %v1425_v51 = vsel %vm1405_vm12, %v1400_v25, %v2266_v45 }
 0x3b2   :  { %v1424_v53 = vsel %vm1404_vm14, %v1372_v26, %v2265_v47 }
 0x3b6   :  { %v2541_v46 = vpop.eup %2540 }
 0x3b7   :  { %v2543_v48 = vpop.eup %2542  ;;  %v2268_v49 = vadd.f32 -1.0, %v2541_v46 }
 0x3b8   :  { %v2267_v50 = vadd.f32 -1.0, %v2543_v48 }
 0x3b9   :  { %v1427_v52 = vsel %vm1407_vm13, %v1402_v37, %v2268_v49 }
 0x3ba   :  { %v1426_v54 = vsel %vm1406_vm15, %v1374_v38, %v2267_v50  ;;  %v1462_v55 = vpack.c.bf16 %v1427_v52, %v1425_v51 }
 0x3bb   :  { %v1461_v56 = vpack.c.bf16 %v1426_v54, %v1424_v53 }
 0x3bc   :  { %1586 = vmatmul.bf16.vlgmr.msrb.gmra.mxu0 %v1462_v55 }
 0x3bd   :  { %1572 = vmatmul.bf16.vlgmr.msra.gmra.mxu3 %v1461_v56 }
 0x439   :  { %v1587_v60 = vpop.f32.mrf.mxu0 }
 0x440   :  { %v1573_v61 = vpop.f32.mrf.mxu3 }
 0x441   :  { %v1574_v62 = vadd.f32 %v2515_v58, %v1573_v61  ;;  %v1589_v6 = vpop.f32.mrf.mxu0 }
 0x443   :  { %v1588_v1 = vadd.f32 %v1587_v60, %v1574_v62 }
 0x445   :  { %v1613_v2 = vsel %vm1602_vm0, %v1606_v63, %v1588_v1 }
 0x446   :  { %v1626_v3 = vsel %vm1615_vm1, %v1619_v0, %v1613_v2 }
 0x447   :  { %1628 = vst [vmem:[#allocation10] sm:$0xff] %v1626_v3 }
 0x448   :  { %v1575_v4 = vpop.f32.mrf.mxu3 }
 0x449   :  { %v1576_v5 = vadd.f32 %v2515_v58, %v1575_v4 }
 0x44b   :  { %v1590_v7 = vadd.f32 %v1589_v6, %v1576_v5 }
 0x44d   :  { %v1614_v10 = vsel %vm1602_vm0, %v1611_v8, %v1590_v7 }
 0x44e   :  { %v1627_v11 = vsel %vm1615_vm1, %v1624_v9, %v1614_v10 }
 0x44f   :  { %1629 = vst [vmem:[#allocation10 + $0x8] sm:$0xff] %v1627_v11 }
 0x450   :  { %1642 = dma.vmem_to_hbm [thread:$0]  %s1635_s11, 256, %s1637_s14, [#allocation4], %s2661_s23, %s2661_s23, %s2662_s24  }
 0x451   :  { %2658 = dma.done.wait [#allocation4], 256  }
 0x452   :  { %2659 = vsyncadd [#allocation4], 4294967040 }
 0x453   :  { %1647 = vsyncpa [#allocation3], 1 }
 0x454   :  { %1648 = vsyncpa [#allocation7], 1 }
 0x455   :  { %1649 = vsyncpa [#allocation4], 1 }
 0x456   :  { %1650 = vsyncpa [#allocation5], 1 }

// kernel: tpu_custom_call.1
= control target key start
LH: loop header
LB: loop body
LE: loop exit
PB: predicated region body
PF: predicated region fallthrough
CT: control target
= control target key end

     0   :  { %9 = vsyncpa [#allocation3], 0  ;;  %s2729_s0 = inlined_call_operand.hbm [shape: f32[16,128], index: 0, kind: input, shape index: {}]   ;;  %s2730_s1 = inlined_call_operand.hbm [shape: bf16[7,256,256], index: 1, kind: input, shape index: {}]   ;;  %s2731_s2 = inlined_call_operand.hbm [shape: f32[7,1,256], index: 2, kind: input, shape index: {}]   ;;  %s2732_s3 = inlined_call_operand.vmem [shape: f32[2], index: 3, kind: input, shape index: {}]   ;;  %s2733_s4 = inlined_call_operand.hbm [shape: f32[16,128], index: 4, kind: output, shape index: {}]  }
   0x1   :  { %10 = vsyncpa [#allocation7], 0 }
   0x2   :  { %11 = vsyncpa [#allocation5], 0 }
   0x3   :  { %12 = vsyncpa [#allocation4], 0  ;;  %s30_s17 = sshll.u32 %s2730_s1, 4  ;;  %s2660_s18 = smov [#allocation6]   ;;  %s31_s17 = int_to_ptr.hbm [resolvable:$true] %s30_s17 }
   0x4   :  { %s32_s19 = sshll.u32 %s2660_s18, 4  ;;  %s17_s22 = sshll.u32 %s2729_s0, 4  ;;  %s33_s19 = int_to_ptr.vmem [resolvable:$true] %s32_s19  ;;  %s18_s22 = int_to_ptr.hbm [resolvable:$true] %s17_s22 }
   0x5   :  { %s2661_s23 = smov 128   ;;  %s2662_s24 = smov 8  }
   0x6   :  { %38 = dma.hbm_to_vmem [thread:$0]  %s31_s17, 28672, %s33_s19, [#allocation7], %s2661_s23, %s2661_s23, %s2662_s24  }
   0x7   :  { %s2663_s25 = smov [#allocation2]   ;;  %s43_s1 = sshll.u32 %s2731_s2, 4  ;;  %s44_s1 = int_to_ptr.hbm [resolvable:$true] %s43_s1 }
   0x8   :  { %s19_s26 = sshll.u32 %s2663_s25, 4  ;;  %s2664_s0 = smov [#allocation8]   ;;  %s20_s26 = int_to_ptr.vmem [resolvable:$true] %s19_s26 }
   0x9   :  { %25 = dma.hbm_to_vmem [thread:$0]  %s18_s22, 256, %s20_s26, [#allocation3], %s2661_s23, %s2661_s23, %s2662_s24  }
   0xa   :  { %s45_s29 = sshll.u32 %s2664_s0, 4  ;;  %s57_s6 = sshll.u32 %s2732_s3, 4  ;;  %s46_s29 = int_to_ptr.vmem [resolvable:$true] %s45_s29  ;;  %s58_s6 = int_to_ptr.vmem [resolvable:$true] %s57_s6 }
   0xb   :  { %s2665_s7 = smov 32   ;;  %s2666_s8 = smov 2  }
   0xc   :  { %51 = dma.hbm_to_vmem [thread:$0]  %s44_s1, 224, %s46_s29, [#allocation7], %s2665_s7, %s2665_s7, %s2666_s8  }
   0xd   :  { %s2667_s9 = smov [#allocation9]  }
   0xe   :  { %60 = dma.vmem_to_smem %s58_s6, 16, %s2667_s9, [#allocation5]  }
   0xf   :  { %2652 = dma.done.wait [#allocation3], 256  }
  0x10   :  { %2653 = vsyncadd [#allocation3], 4294967040 }
  0x11   :  { %2654 = dma.done.wait [#allocation7], 28896  }
  0x12   :  { %2655 = vsyncadd [#allocation7], 4294938400 }
  0x13   :  { %2656 = dma.done.wait [#allocation5], 16  }
  0x14   :  { %2657 = vsyncadd [#allocation5], 4294967280 }
  0x15   :  { %77 = sfence }
  0x16   :  { %v1681_v0 = vld [vmem:[#allocation6 + $0x70] sm:$0xf]  ;;  %v2341_v1 = vld [vmem:[#allocation6 + $0x74] sm:$0xf0]  ;;  %v1677_v2 = vld [vmem:[#allocation6 + $0x60] sm:$0xf] }
  0x17   :  { %v1682_v3 = vor.u32 %v2341_v1, %v1681_v0  ;;  %v2340_v4 = vld [vmem:[#allocation6 + $0x64] sm:$0xf0]  ;;  %v1673_v6 = vld [vmem:[#allocation6 + $0x50] sm:$0xf]  ;;  %v2339_v7 = vld [vmem:[#allocation6 + $0x54] sm:$0xf0] }
  0x18   :  { %v1678_v5 = vor.u32 %v2340_v4, %v1677_v2  ;;  %v1669_v8 = vld [vmem:[#allocation6 + $0x40] sm:$0xf]  ;;  %v1741_v9 = vld [vmem:[#allocation6 + $0x170] sm:$0xf]  ;;  %v2357_v10 = vld [vmem:[#allocation6 + $0x174] sm:$0xf0]  ;;  %v1674_v12 = vor.u32 %v2339_v7, %v1673_v6 }
  0x19   :  { %149 = vmatpush.bf16.msra.mxu0 %v1682_v3  ;;  %v2356_v11 = vld [vmem:[#allocation6 + $0x174] sm:$0xf]  ;;  %v1742_v13 = vor.u32 %v2357_v10, %v1741_v9  ;;  %v1743_v14 = vld [vmem:[#allocation6 + $0x178] sm:$0xf0]  ;;  %v1733_v15 = vld [vmem:[#allocation6 + $0x160] sm:$0xf] }
  0x1a   :  { %v2355_v16 = vld [vmem:[#allocation6 + $0x164] sm:$0xf0]  ;;  %v1746_v18 = vor.u32 %v2356_v11, %v1743_v14  ;;  %v2354_v19 = vld [vmem:[#allocation6 + $0x164] sm:$0xf]  ;;  %v1735_v20 = vld [vmem:[#allocation6 + $0x168] sm:$0xf0] }
  0x1b   :  { %v2338_v17 = vld [vmem:[#allocation6 + $0x44] sm:$0xf0]  ;;  %270 = vmatpush.bf16.msra.mxu1 %v1742_v13  ;;  %v1734_v21 = vor.u32 %v2355_v16, %v1733_v15  ;;  %v1725_v22 = vld [vmem:[#allocation6 + $0x150] sm:$0xf]  ;;  %v1738_v23 = vor.u32 %v2354_v19, %v1735_v20  ;;  %v2353_v24 = vld [vmem:[#allocation6 + $0x154] sm:$0xf0] }
  0x1c   :  { %284 = vmatpush.bf16.msra.mxu2 %v1746_v18  ;;  %v1670_v25 = vor.u32 %v2338_v17, %v1669_v8  ;;  %v2352_v26 = vld [vmem:[#allocation6 + $0x154] sm:$0xf]  ;;  %v1727_v27 = vld [vmem:[#allocation6 + $0x158] sm:$0xf0]  ;;  %v1665_v28 = vld [vmem:[#allocation6 + $0x30] sm:$0xf]  ;;  %v1726_v30 = vor.u32 %v2353_v24, %v1725_v22 }
  0x1d   :  { %150 = vmatpush.bf16.msra.mxu0 %v1678_v5  ;;  %v2337_v29 = vld [vmem:[#allocation6 + $0x34] sm:$0xf0]  ;;  %v1730_v31 = vor.u32 %v2352_v26, %v1727_v27  ;;  %v1661_v33 = vld [vmem:[#allocation6 + $0x20] sm:$0xf]  ;;  %v2336_v34 = vld [vmem:[#allocation6 + $0x24] sm:$0xf0] }
  0x1e   :  { %v1666_v32 = vor.u32 %v2337_v29, %v1665_v28  ;;  %v1662_v35 = vor.u32 %v2336_v34, %v1661_v33  ;;  %v1657_v36 = vld [vmem:[#allocation6 + $0x10] sm:$0xf]  ;;  %v2335_v37 = vld [vmem:[#allocation6 + $0x14] sm:$0xf0]  ;;  %v1653_v39 = vld [vmem:[#allocation6] sm:$0xf] }
  0x1f   :  { %271 = vmatpush.bf16.msra.mxu1 %v1734_v21  ;;  %v1658_v38 = vor.u32 %v2335_v37, %v1657_v36  ;;  %v2334_v40 = vld [vmem:[#allocation6 + $0x4] sm:$0xf0]  ;;  %v78_v42 = vld [vmem:[#allocation2] sm:$0xff]  ;;  %v79_v43 = vld [vmem:[#allocation2 + $0x8] sm:$0xff]  ;;  %s2713_s2 = sld [smem:[#allocation9]]  ;;  %s2669_s10 = smov [#allocation10]  }
  0x20   :  { %285 = vmatpush.bf16.msra.mxu2 %v1738_v23  ;;  %v1654_v41 = vor.u32 %v2334_v40, %v1653_v39  ;;  %v96_v44 = vpack.c.bf16 %v79_v43, %v78_v42  ;;  %v1717_v45 = vld [vmem:[#allocation6 + $0x140] sm:$0xf]  ;;  %v2351_v46 = vld [vmem:[#allocation6 + $0x144] sm:$0xf0]  ;;  %v2350_v47 = vld [vmem:[#allocation6 + $0x144] sm:$0xf] }
  0x21   :  { %151 = vmatpush.bf16.msra.mxu0 %v1674_v12  ;;  %v1718_v48 = vor.u32 %v2351_v46, %v1717_v45  ;;  %v1719_v49 = vld [vmem:[#allocation6 + $0x148] sm:$0xf0]  ;;  %v1709_v51 = vld [vmem:[#allocation6 + $0x130] sm:$0xf]  ;;  %v2349_v52 = vld [vmem:[#allocation6 + $0x134] sm:$0xf0] }
  0x22   :  { %v1722_v50 = vor.u32 %v2350_v47, %v1719_v49  ;;  %v2348_v53 = vld [vmem:[#allocation6 + $0x134] sm:$0xf]  ;;  %v1710_v54 = vor.u32 %v2349_v52, %v1709_v51  ;;  %v1711_v55 = vld [vmem:[#allocation6 + $0x138] sm:$0xf0]  ;;  %v1701_v57 = vld [vmem:[#allocation6 + $0x120] sm:$0xf] }
  0x23   :  { %272 = vmatpush.bf16.msra.mxu1 %v1726_v30  ;;  %v1714_v56 = vor.u32 %v2348_v53, %v1711_v55  ;;  %v2347_v58 = vld [vmem:[#allocation6 + $0x124] sm:$0xf0]  ;;  %v2346_v59 = vld [vmem:[#allocation6 + $0x124] sm:$0xf]  ;;  %v1703_v61 = vld [vmem:[#allocation6 + $0x128] sm:$0xf0] }
  0x24   :  { %286 = vmatpush.bf16.msra.mxu2 %v1730_v31  ;;  %v1702_v60 = vor.u32 %v2347_v58, %v1701_v57  ;;  %v1706_v62 = vor.u32 %v2346_v59, %v1703_v61  ;;  %v1693_v63 = vld [vmem:[#allocation6 + $0x110] sm:$0xf]  ;;  %v2345_v0 = vld [vmem:[#allocation6 + $0x114] sm:$0xf0]  ;;  %v2344_v1 = vld [vmem:[#allocation6 + $0x114] sm:$0xf] }
  0x25   :  { %152 = vmatpush.bf16.msra.mxu0 %v1670_v25  ;;  %v1694_v2 = vor.u32 %v2345_v0, %v1693_v63  ;;  %v1695_v3 = vld [vmem:[#allocation6 + $0x118] sm:$0xf0]  ;;  %v1685_v4 = vld [vmem:[#allocation6 + $0x100] sm:$0xf]  ;;  %v2343_v5 = vld [vmem:[#allocation6 + $0x104] sm:$0xf0] }
  0x26   :  { %v1698_v6 = vor.u32 %v2344_v1, %v1695_v3  ;;  %v2342_v7 = vld [vmem:[#allocation6 + $0x104] sm:$0xf]  ;;  %v1687_v8 = vld [vmem:[#allocation6 + $0x108] sm:$0xf0]  ;;  %v1686_v9 = vor.u32 %v2343_v5, %v1685_v4  ;;  %v1805_v11 = vld [vmem:[#allocation6 + $0x270] sm:$0xf] }
  0x27   :  { %273 = vmatpush.bf16.msra.mxu1 %v1718_v48  ;;  %v1690_v10 = vor.u32 %v2342_v7, %v1687_v8  ;;  %v2373_v12 = vld [vmem:[#allocation6 + $0x274] sm:$0xf0]  ;;  %v2372_v13 = vld [vmem:[#allocation6 + $0x274] sm:$0xf]  ;;  %v1807_v15 = vld [vmem:[#allocation6 + $0x278] sm:$0xf0] }
  0x28   :  { %287 = vmatpush.bf16.msra.mxu2 %v1722_v50  ;;  %v1806_v14 = vor.u32 %v2373_v12, %v1805_v11  ;;  %v1797_v16 = vld [vmem:[#allocation6 + $0x260] sm:$0xf]  ;;  %v2371_v17 = vld [vmem:[#allocation6 + $0x264] sm:$0xf0]  ;;  %v1810_v18 = vor.u32 %v2372_v13, %v1807_v15  ;;  %v2370_v19 = vld [vmem:[#allocation6 + $0x264] sm:$0xf] }
  0x29   :  { %153 = vmatpush.bf16.msra.mxu0 %v1666_v32  ;;  %v1799_v20 = vld [vmem:[#allocation6 + $0x268] sm:$0xf0]  ;;  %v1869_v21 = vld [vmem:[#allocation6 + $0x2f0] sm:$0xf]  ;;  %v1798_v22 = vor.u32 %v2371_v17, %v1797_v16  ;;  %v2389_v23 = vld [vmem:[#allocation6 + $0x2f4] sm:$0xf0] }
  0x2a   :  { %504 = vmatpush.bf16.msra.mxu3 %v1806_v14  ;;  %v2388_v24 = vld [vmem:[#allocation6 + $0x2f4] sm:$0xf]  ;;  %v1871_v25 = vld [vmem:[#allocation6 + $0x2f8] sm:$0xf0]  ;;  %v1802_v26 = vor.u32 %v2370_v19, %v1799_v20  ;;  %v1870_v27 = vor.u32 %v2389_v23, %v1869_v21  ;;  %v1789_v29 = vld [vmem:[#allocation6 + $0x250] sm:$0xf] }
  0x2b   :  { %274 = vmatpush.bf16.msra.mxu1 %v1710_v54  ;;  %v1874_v28 = vor.u32 %v2388_v24, %v1871_v25  ;;  %v2369_v30 = vld [vmem:[#allocation6 + $0x254] sm:$0xf0]  ;;  %v2368_v31 = vld [vmem:[#allocation6 + $0x254] sm:$0xf]  ;;  %v1791_v32 = vld [vmem:[#allocation6 + $0x258] sm:$0xf0] }
  0x2c   :  { %288 = vmatpush.bf16.msra.mxu2 %v1714_v56  ;;  %v1861_v33 = vld [vmem:[#allocation6 + $0x2e0] sm:$0xf]  ;;  %v2387_v34 = vld [vmem:[#allocation6 + $0x2e4] sm:$0xf0]  ;;  %v2386_v36 = vld [vmem:[#allocation6 + $0x2e4] sm:$0xf]  ;;  %v1794_v42 = vor.u32 %v2368_v31, %v1791_v32 }
  0x2d   :  { %154 = vmatpush.bf16.msra.mxu0 %v1662_v35  ;;  %v1862_v35 = vor.u32 %v2387_v34, %v1861_v33  ;;  %v1863_v37 = vld [vmem:[#allocation6 + $0x2e8] sm:$0xf0]  ;;  %v1781_v40 = vld [vmem:[#allocation6 + $0x240] sm:$0xf]  ;;  %v1853_v43 = vld [vmem:[#allocation6 + $0x2d0] sm:$0xf] }
  0x2e   :  { %505 = vmatpush.bf16.msra.mxu3 %v1798_v22  ;;  %v1866_v39 = vor.u32 %v2386_v36, %v1863_v37  ;;  %v2384_v45 = vld [vmem:[#allocation6 + $0x2d4] sm:$0xf]  ;;  %v2366_v46 = vld [vmem:[#allocation6 + $0x244] sm:$0xf]  ;;  %v1783_v47 = vld [vmem:[#allocation6 + $0x248] sm:$0xf0] }
  0x2f   :  { %275 = vmatpush.bf16.msra.mxu1 %v1702_v60  ;;  %v1855_v48 = vld [vmem:[#allocation6 + $0x2d8] sm:$0xf0]  ;;  %v1786_v53 = vor.u32 %v2366_v46, %v1783_v47  ;;  %v2514_v54 = vld [vmem:[#allocation8] ss:$0 sm:$0xff]  ;;  %v1773_v61 = vld [vmem:[#allocation6 + $0x230] sm:$0xf] }
  0x30   :  { %289 = vmatpush.bf16.msra.mxu2 %v1706_v62  ;;  %v1858_v50 = vor.u32 %v2384_v45, %v1855_v48  ;;  %v2365_v62 = vld [vmem:[#allocation6 + $0x234] sm:$0xf0]  ;;  %v2364_v63 = vld [vmem:[#allocation6 + $0x234] sm:$0xf]  ;;  %v1775_v1 = vld [vmem:[#allocation6 + $0x238] sm:$0xf0] }
  0x31   :  { %155 = vmatpush.bf16.msra.mxu0 %v1658_v38  ;;  %v1790_v38 = vor.u32 %v2369_v30, %v1789_v29  ;;  %v1774_v0 = vor.u32 %v2365_v62, %v1773_v61  ;;  %v1845_v3 = vld [vmem:[#allocation6 + $0x2c0] sm:$0xf]  ;;  %v2383_v4 = vld [vmem:[#allocation6 + $0x2c4] sm:$0xf0]  ;;  %v2382_v5 = vld [vmem:[#allocation6 + $0x2c4] sm:$0xf] }
  0x32   :  { %v1847_v7 = vld [vmem:[#allocation6 + $0x2c8] sm:$0xf0]  ;;  %v2362_v11 = vld [vmem:[#allocation6 + $0x224] sm:$0xf]  ;;  %v1837_v15 = vld [vmem:[#allocation6 + $0x2b0] sm:$0xf] }
  0x33   :  { %276 = vmatpush.bf16.msra.mxu1 %v1694_v2  ;;  %506 = vmatpush.bf16.msra.mxu3 %v1790_v38  ;;  %v1778_v2 = vor.u32 %v2364_v63, %v1775_v1  ;;  %v1850_v8 = vor.u32 %v2382_v5, %v1847_v7  ;;  %v1767_v13 = vld [vmem:[#allocation6 + $0x228] sm:$0xf0]  ;;  %v2381_v16 = vld [vmem:[#allocation6 + $0x2b4] sm:$0xf0]  ;;  %v1839_v19 = vld [vmem:[#allocation6 + $0x2b8] sm:$0xf0] }
  0x34   :  { %290 = vmatpush.bf16.msra.mxu2 %v1698_v6  ;;  %v1846_v6 = vor.u32 %v2383_v4, %v1845_v3  ;;  %v1770_v14 = vor.u32 %v2362_v11, %v1767_v13  ;;  %v1838_v17 = vor.u32 %v2381_v16, %v1837_v15  ;;  %v1757_v21 = vld [vmem:[#allocation6 + $0x210] sm:$0xf]  ;;  %v2361_v22 = vld [vmem:[#allocation6 + $0x214] sm:$0xf0]  ;;  %v2360_v23 = vld [vmem:[#allocation6 + $0x214] sm:$0xf] }
  0x35   :  { %156 = vmatpush.bf16.msra.mxu0 %v1654_v41  ;;  %v2367_v41 = vld [vmem:[#allocation6 + $0x244] sm:$0xf0]  ;;  %v1758_v24 = vor.u32 %v2361_v22, %v1757_v21  ;;  %v1759_v25 = vld [vmem:[#allocation6 + $0x218] sm:$0xf0]  ;;  %v2378_v29 = vld [vmem:[#allocation6 + $0x2a4] sm:$0xf] }
  0x36   :  { %v1782_v51 = vor.u32 %v2367_v41, %v1781_v40  ;;  %v1831_v31 = vld [vmem:[#allocation6 + $0x2a8] sm:$0xf0]  ;;  %v1749_v33 = vld [vmem:[#allocation6 + $0x200] sm:$0xf]  ;;  %v2359_v34 = vld [vmem:[#allocation6 + $0x204] sm:$0xf0] }
  0x37   :  { %277 = vmatpush.bf16.msra.mxu1 %v1686_v9  ;;  %v1765_v9 = vld [vmem:[#allocation6 + $0x220] sm:$0xf]  ;;  %v1834_v32 = vor.u32 %v2378_v29, %v1831_v31  ;;  %v1750_v36 = vor.u32 %v2359_v34, %v1749_v33  ;;  %v1751_v37 = vld [vmem:[#allocation6 + $0x208] sm:$0xf0]  ;;  %v2377_v40 = vld [vmem:[#allocation6 + $0x294] sm:$0xf0] }
  0x38   :  { %157 = vmatmul.bf16.vlgmr.msra.gmra.mxu0 %v96_v44  ;;  %291 = vmatpush.bf16.msra.mxu2 %v1690_v10  ;;  %v2385_v44 = vld [vmem:[#allocation6 + $0x2d4] sm:$0xf0]  ;;  %v2363_v10 = vld [vmem:[#allocation6 + $0x224] sm:$0xf0]  ;;  %v2376_v41 = vld [vmem:[#allocation6 + $0x294] sm:$0xf] }
  0x39   :  { %518 = vmatpush.bf16.msrb.mxu0 %v1870_v27  ;;  %v1854_v49 = vor.u32 %v2385_v44, %v1853_v43  ;;  %507 = vmatpush.bf16.msra.mxu3 %v1782_v51  ;;  %v1766_v12 = vor.u32 %v2363_v10, %v1765_v9  ;;  %v1829_v27 = vld [vmem:[#allocation6 + $0x2a0] sm:$0xf]  ;;  %v1823_v43 = vld [vmem:[#allocation6 + $0x298] sm:$0xf0]  ;;  %v2375_v46 = vld [vmem:[#allocation6 + $0x284] sm:$0xf0] }
  0x3a   :  { %v1826_v44 = vor.u32 %v2376_v41, %v1823_v43  ;;  %v1813_v45 = vld [vmem:[#allocation6 + $0x280] sm:$0xf]  ;;  %v2374_v47 = vld [vmem:[#allocation6 + $0x284] sm:$0xf]  ;;  %v1933_v51 = vld [vmem:[#allocation6 + $0x370] sm:$0xf] }
  0x3b   :  { %532 = vmatpush.bf16.msrb.mxu1 %v1810_v18  ;;  %v2380_v18 = vld [vmem:[#allocation6 + $0x2b4] sm:$0xf]  ;;  %v1814_v48 = vor.u32 %v2375_v46, %v1813_v45  ;;  %v2402_v61 = vld [vmem:[#allocation6 + $0x364] sm:$0xf]  ;;  %v184_v5 = vld [vmem:[#allocation8 + $0x2] sm:$0x3] }
  0x3c   :  { %546 = vmatpush.bf16.msrb.mxu2 %v1874_v28  ;;  %v1842_v20 = vor.u32 %v2380_v18, %v1839_v19  ;;  %v2379_v28 = vld [vmem:[#allocation6 + $0x2a4] sm:$0xf0]  ;;  %v2420_v1 = vld [vmem:[#allocation6 + $0x3f4] sm:$0xf]  ;;  %v186_v7 = vperm.slane %v184_v5, 0  ;;  %v187_v11 = vperm.slane %v184_v5, 1 }
  0x3d   :  { %519 = vmatpush.bf16.msrb.mxu0 %v1862_v35  ;;  %508 = vmatpush.bf16.msra.mxu3 %v1774_v0  ;;  %v1830_v30 = vor.u32 %v2379_v28, %v1829_v27  ;;  %v2358_v35 = vld [vmem:[#allocation6 + $0x204] sm:$0xf]  ;;  %v1927_v0 = vld [vmem:[#allocation6 + $0x368] sm:$0xf0]  ;;  %v1917_v22 = vld [vmem:[#allocation6 + $0x350] sm:$0xf] }
  0x3e   :  { %v1754_v38 = vor.u32 %v2358_v35, %v1751_v37  ;;  %v1930_v3 = vor.u32 %v2402_v61, %v1927_v0  ;;  %v2400_v27 = vld [vmem:[#allocation6 + $0x354] sm:$0xf]  ;;  %v1919_v28 = vld [vmem:[#allocation6 + $0x358] sm:$0xf0]  ;;  %v2418_v31 = vld [vmem:[#allocation6 + $0x3e4] sm:$0xf] }
  0x3f   :  { %533 = vmatpush.bf16.msrb.mxu1 %v1802_v26  ;;  %v1762_v26 = vor.u32 %v2360_v23, %v1759_v25  ;;  %v2401_v23 = vld [vmem:[#allocation6 + $0x354] sm:$0xf0]  ;;  %v1909_v34 = vld [vmem:[#allocation6 + $0x340] sm:$0xf]  ;;  %v2399_v35 = vld [vmem:[#allocation6 + $0x344] sm:$0xf0] }
  0x40   :  { %547 = vmatpush.bf16.msrb.mxu2 %v1866_v39  ;;  %v1821_v39 = vld [vmem:[#allocation6 + $0x290] sm:$0xf]  ;;  %v1918_v25 = vor.u32 %v2401_v23, %v1917_v22  ;;  %v1910_v37 = vor.u32 %v2399_v35, %v1909_v34  ;;  %v2416_v43 = vld [vmem:[#allocation6 + $0x3d4] sm:$0xf]  ;;  %v1895_v0 = vld [vmem:[#allocation6 + $0x328] sm:$0xf0] }
  0x41   :  { %520 = vmatpush.bf16.msrb.mxu0 %v1854_v49  ;;  %509 = vmatpush.bf16.msra.mxu3 %v1766_v12  ;;  %v1815_v49 = vld [vmem:[#allocation6 + $0x288] sm:$0xf0]  ;;  %v1901_v46 = vld [vmem:[#allocation6 + $0x330] sm:$0xf]  ;;  %v2409_v22 = vld [vmem:[#allocation6 + $0x394] sm:$0xf0] }
  0x42   :  { %v2390_v23 = vld [vmem:[#allocation6 + $0x304] sm:$0xf]  ;;  %v1943_v34 = vld [vmem:[#allocation6 + $0x388] sm:$0xf0]  ;;  %s2715_s3 = sld [smem:[#allocation9 + $0x1]]  ;;  %s1634_s11 = sshll.u32 %s2669_s10, 4  ;;  %s1635_s11 = int_to_ptr.vmem [resolvable:$true] %s1634_s11 }
  0x43   :  { %534 = vmatpush.bf16.msrb.mxu1 %v1794_v42  ;;  %v1822_v42 = vor.u32 %v2377_v40, %v1821_v39  ;;  %v2398_v39 = vld [vmem:[#allocation6 + $0x344] sm:$0xf]  ;;  %v1911_v40 = vld [vmem:[#allocation6 + $0x348] sm:$0xf0]  ;;  %s1636_s14 = sshll.u32 %s2733_s4, 4  ;;  %s1637_s14 = int_to_ptr.hbm [resolvable:$true] %s1636_s14 }
  0x44   :  { %548 = vmatpush.bf16.msrb.mxu2 %v1858_v50  ;;  %v1818_v50 = vor.u32 %v2374_v47, %v1815_v49  ;;  %v2397_v47 = vld [vmem:[#allocation6 + $0x334] sm:$0xf0] }
  0x45   :  { %521 = vmatpush.bf16.msrb.mxu0 %v1846_v6  ;;  %510 = vmatpush.bf16.msra.mxu3 %v1758_v24  ;;  %v1989_v24 = vld [vmem:[#allocation6 + $0x3e0] sm:$0xf]  ;;  %v1902_v49 = vor.u32 %v2397_v47, %v1901_v46  ;;  %v2127_v46 = vld [vmem:[#allocation6 + $0x4f8] sm:$0xf0] }
  0x46   :  { %v2053_v47 = vld [vmem:[#allocation6 + $0x460] sm:$0xf] }
  0x47   :  { %535 = vmatpush.bf16.msrb.mxu1 %v1786_v53  ;;  %v2404_v53 = vld [vmem:[#allocation6 + $0x374] sm:$0xf] }
  0x48   :  { %549 = vmatpush.bf16.msrb.mxu2 %v1850_v8 }
  0x49   :  { %522 = vmatpush.bf16.msrb.mxu0 %v1838_v17  ;;  %511 = vmatpush.bf16.msra.mxu3 %v1750_v36  ;;  %v1981_v36 = vld [vmem:[#allocation6 + $0x3d0] sm:$0xf] }
  0x4b   :  { %536 = vmatpush.bf16.msrb.mxu1 %v1778_v2  ;;  %v1999_v2 = vld [vmem:[#allocation6 + $0x3f8] sm:$0xf0] }
  0x4c   :  { %550 = vmatpush.bf16.msrb.mxu2 %v1842_v20  ;;  %v2002_v4 = vor.u32 %v2420_v1, %v1999_v2 }
  0x4d   :  { %523 = vmatpush.bf16.msrb.mxu0 %v1830_v30  ;;  %v1922_v30 = vor.u32 %v2400_v27, %v1919_v28  ;;  %v2408_v27 = vld [vmem:[#allocation6 + $0x394] sm:$0xf]  ;;  %v1951_v28 = vld [vmem:[#allocation6 + $0x398] sm:$0xf0] }
  0x4f   :  { %537 = vmatpush.bf16.msrb.mxu1 %v1770_v14 }
  0x50   :  { %551 = vmatpush.bf16.msrb.mxu2 %v1834_v32  ;;  %v1991_v32 = vld [vmem:[#allocation6 + $0x3e8] sm:$0xf0] }
  0x51   :  { %524 = vmatpush.bf16.msrb.mxu0 %v1822_v42  ;;  %v1994_v33 = vor.u32 %v2418_v31, %v1991_v32  ;;  %v1914_v42 = vor.u32 %v2398_v39, %v1911_v40  ;;  %v2407_v31 = vld [vmem:[#allocation6 + $0x384] sm:$0xf0]  ;;  %v2406_v32 = vld [vmem:[#allocation6 + $0x384] sm:$0xf]  ;;  %v2063_v40 = vld [vmem:[#allocation6 + $0x478] sm:$0xf0] }
  0x52   :  { %v1946_v35 = vor.u32 %v2406_v32, %v1943_v34  ;;  %v2431_v34 = vld [vmem:[#allocation6 + $0x444] sm:$0xf0] }
  0x53   :  { %538 = vmatpush.bf16.msrb.mxu1 %v1762_v26  ;;  %v2419_v26 = vld [vmem:[#allocation6 + $0x3e4] sm:$0xf0] }
  0x54   :  { %552 = vmatpush.bf16.msrb.mxu2 %v1826_v44  ;;  %v1990_v29 = vor.u32 %v2419_v26, %v1989_v24  ;;  %v1983_v44 = vld [vmem:[#allocation6 + $0x3d8] sm:$0xf0]  ;;  %v1879_v24 = vld [vmem:[#allocation6 + $0x308] sm:$0xf0] }
  0x55   :  { %525 = vmatpush.bf16.msrb.mxu0 %v1814_v48  ;;  %v1986_v45 = vor.u32 %v2416_v43, %v1983_v44  ;;  %v1973_v48 = vld [vmem:[#allocation6 + $0x3c0] sm:$0xf]  ;;  %v1882_v26 = vor.u32 %v2390_v23, %v1879_v24  ;;  %v2432_v23 = vld [vmem:[#allocation6 + $0x454] sm:$0xf] }
  0x57   :  { %539 = vmatpush.bf16.msrb.mxu1 %v1754_v38  ;;  %v2417_v38 = vld [vmem:[#allocation6 + $0x3d4] sm:$0xf0] }
  0x58   :  { %553 = vmatpush.bf16.msrb.mxu2 %v1818_v50  ;;  %v1982_v41 = vor.u32 %v2417_v38, %v1981_v36  ;;  %v2415_v50 = vld [vmem:[#allocation6 + $0x3c4] sm:$0xf0]  ;;  %v2061_v36 = vld [vmem:[#allocation6 + $0x470] sm:$0xf]  ;;  %v2436_v38 = vld [vmem:[#allocation6 + $0x474] sm:$0xf] }
  0x59   :  { %v2066_v43 = vor.u32 %v2436_v38, %v2063_v40  ;;  %v2447_v40 = vld [vmem:[#allocation6 + $0x4c4] sm:$0xf0] }
  0xb5   :  { %v158_v52 = vpop.f32.mrf.mxu0 }
  0xb6   :  { %v159_v55 = vadd.f32 %v2514_v54, %v158_v52  ;;  %v2405_v52 = vld [vmem:[#allocation6 + $0x374] sm:$0xf0] }
  0xb8   :  { %2516 = vtanh.f32 %v159_v55  ;;  %v1935_v55 = vld [vmem:[#allocation6 + $0x378] sm:$0xf0] }
  0xbd   :  { %v160_v56 = vpop.f32.mrf.mxu0 }
  0xbe   :  { %v161_v57 = vadd.f32 %v2514_v54, %v160_v56  ;;  %v2517_v58 = vpop.eup %2516  ;;  %v1934_v54 = vor.u32 %v2405_v52, %v1933_v51  ;;  %v1925_v56 = vld [vmem:[#allocation6 + $0x360] sm:$0xf]  ;;  %v2396_v51 = vld [vmem:[#allocation6 + $0x334] sm:$0xf]  ;;  %v1903_v52 = vld [vmem:[#allocation6 + $0x338] sm:$0xf0] }
  0xc0   :  { %2518 = vtanh.f32 %v161_v57  ;;  %v2403_v57 = vld [vmem:[#allocation6 + $0x364] sm:$0xf0]  ;;  %766 = vmatpush.bf16.msrb.mxu3 %v1934_v54  ;;  %v1906_v54 = vor.u32 %v2396_v51, %v1903_v52  ;;  %v2055_v51 = vld [vmem:[#allocation6 + $0x468] sm:$0xf0] }
  0xc1   :  { %v1926_v62 = vor.u32 %v2403_v57, %v1925_v56  ;;  %v1975_v56 = vld [vmem:[#allocation6 + $0x3c8] sm:$0xf0] }
  0xc4   :  { %767 = vmatpush.bf16.msrb.mxu3 %v1926_v62  ;;  %v2413_v62 = vld [vmem:[#allocation6 + $0x3b4] sm:$0xf0] }
  0xc6   :  { %v2519_v59 = vpop.eup %2518 }
  0xc7   :  { %v182_v60 = vpack.c.bf16 %v2519_v59, %v2517_v58  ;;  %v1938_v58 = vor.u32 %v2404_v53, %v1935_v55  ;;  %v1997_v59 = vld [vmem:[#allocation6 + $0x3f0] sm:$0xf]  ;;  %v1974_v53 = vor.u32 %v2415_v50, %v1973_v48  ;;  %v2414_v55 = vld [vmem:[#allocation6 + $0x3c4] sm:$0xf] }
  0xc8   :  { %768 = vmatpush.bf16.msrb.mxu3 %v1918_v25  ;;  %v1978_v57 = vor.u32 %v2414_v55, %v1975_v56  ;;  %v2434_v50 = vld [vmem:[#allocation6 + $0x464] sm:$0xf]  ;;  %v2451_v55 = vld [vmem:[#allocation6 + $0x4e4] sm:$0xf0] }
  0xc9   :  { %278 = vmatmul.bf16.vlgmr.msra.gmra.mxu1 %v182_v60  ;;  %292 = vmatmul.bf16.vlgmr.msra.gmra.mxu2 %v182_v60  ;;  %v2421_v60 = vld [vmem:[#allocation6 + $0x3f4] sm:$0xf0]  ;;  %v2450_v56 = vld [vmem:[#allocation6 + $0x4e4] sm:$0xf] }
  0xca   :  { %v1998_v63 = vor.u32 %v2421_v60, %v1997_v59  ;;  %794 = vmatpush.bf16.msra.mxu1 %v1938_v58  ;;  %808 = vmatpush.bf16.msra.mxu2 %v2002_v4  ;;  %v1893_v58 = vld [vmem:[#allocation6 + $0x320] sm:$0xf]  ;;  %v2395_v59 = vld [vmem:[#allocation6 + $0x324] sm:$0xf0]  ;;  %v1965_v60 = vld [vmem:[#allocation6 + $0x3b0] sm:$0xf] }
  0xcb   :  { %v1894_v61 = vor.u32 %v2395_v59, %v1893_v58  ;;  %v1966_v1 = vor.u32 %v2413_v62, %v1965_v60  ;;  %v1967_v4 = vld [vmem:[#allocation6 + $0x3b8] sm:$0xf0]  ;;  %v2119_v58 = vld [vmem:[#allocation6 + $0x4e8] sm:$0xf0] }
  0xcc   :  { %780 = vmatpush.bf16.msra.mxu0 %v1998_v63  ;;  %769 = vmatpush.bf16.msrb.mxu3 %v1910_v37  ;;  %v2394_v63 = vld [vmem:[#allocation6 + $0x324] sm:$0xf]  ;;  %v2437_v37 = vld [vmem:[#allocation6 + $0x474] sm:$0xf0]  ;;  %v2122_v59 = vor.u32 %v2450_v56, %v2119_v58  ;;  %v2427_v58 = vld [vmem:[#allocation6 + $0x424] sm:$0xf0] }
  0xcd   :  { %v1898_v2 = vor.u32 %v2394_v63, %v1895_v0  ;;  %v2062_v39 = vor.u32 %v2437_v37, %v2061_v36  ;;  %v2039_v37 = vld [vmem:[#allocation6 + $0x448] sm:$0xf0] }
  0xce   :  { %795 = vmatpush.bf16.msra.mxu1 %v1930_v3  ;;  %809 = vmatpush.bf16.msra.mxu2 %v1994_v33  ;;  %v2412_v3 = vld [vmem:[#allocation6 + $0x3b4] sm:$0xf] }
  0xcf   :  { %v1970_v5 = vor.u32 %v2412_v3, %v1967_v4 }
  0xd0   :  { %781 = vmatpush.bf16.msra.mxu0 %v1990_v29  ;;  %770 = vmatpush.bf16.msrb.mxu3 %v1902_v49  ;;  %v1954_v29 = vor.u32 %v2408_v27, %v1951_v28  ;;  %v2435_v49 = vld [vmem:[#allocation6 + $0x464] sm:$0xf0]  ;;  %v2109_v27 = vld [vmem:[#allocation6 + $0x4d0] sm:$0xf]  ;;  %v2449_v28 = vld [vmem:[#allocation6 + $0x4d4] sm:$0xf0] }
  0xd1   :  { %v2054_v52 = vor.u32 %v2435_v49, %v2053_v47  ;;  %v2428_v47 = vld [vmem:[#allocation6 + $0x434] sm:$0xf]  ;;  %v2031_v49 = vld [vmem:[#allocation6 + $0x438] sm:$0xf0] }
  0xd2   :  { %796 = vmatpush.bf16.msra.mxu1 %v1922_v30  ;;  %810 = vmatpush.bf16.msra.mxu2 %v1986_v45  ;;  %v1941_v30 = vld [vmem:[#allocation6 + $0x380] sm:$0xf]  ;;  %v2452_v45 = vld [vmem:[#allocation6 + $0x4f4] sm:$0xf] }
  0xd3   :  { %v1942_v33 = vor.u32 %v2407_v31, %v1941_v30  ;;  %v2130_v48 = vor.u32 %v2452_v45, %v2127_v46  ;;  %v2110_v30 = vor.u32 %v2449_v28, %v2109_v27  ;;  %v2111_v31 = vld [vmem:[#allocation6 + $0x4d8] sm:$0xf0]  ;;  %v2029_v45 = vld [vmem:[#allocation6 + $0x430] sm:$0xf]  ;;  %v2429_v46 = vld [vmem:[#allocation6 + $0x434] sm:$0xf0] }
  0xd4   :  { %782 = vmatpush.bf16.msra.mxu0 %v1982_v41  ;;  %771 = vmatpush.bf16.msrb.mxu3 %v1894_v61  ;;  %v2125_v41 = vld [vmem:[#allocation6 + $0x4f0] sm:$0xf]  ;;  %v338_v61 = vld [vmem:[#allocation8 + $0x4] sm:$0x3]  ;;  %v2071_v27 = vld [vmem:[#allocation6 + $0x488] sm:$0xf0] }
  0xd5   :  { %v340_v0 = vperm.slane %v338_v61, 0  ;;  %v341_v3 = vperm.slane %v338_v61, 1  ;;  %v2023_v61 = vld [vmem:[#allocation6 + $0x428] sm:$0xf0] }
  0xd6   :  { %797 = vmatpush.bf16.msra.mxu1 %v1914_v42  ;;  %811 = vmatpush.bf16.msra.mxu2 %v1978_v57  ;;  %v2453_v42 = vld [vmem:[#allocation6 + $0x4f4] sm:$0xf0] }
  0xd7   :  { %v2126_v44 = vor.u32 %v2453_v42, %v2125_v41  ;;  %v2446_v41 = vld [vmem:[#allocation6 + $0x4c4] sm:$0xf] }
  0xd8   :  { %783 = vmatpush.bf16.msra.mxu0 %v1974_v53  ;;  %v2058_v53 = vor.u32 %v2434_v50, %v2055_v51  ;;  %v2034_v50 = vor.u32 %v2428_v47, %v2031_v49  ;;  %v2093_v51 = vld [vmem:[#allocation6 + $0x4b0] sm:$0xf] }
  0xda   :  { %798 = vmatpush.bf16.msra.mxu1 %v1906_v54  ;;  %812 = vmatpush.bf16.msra.mxu2 %v1970_v5  ;;  %v2117_v54 = vld [vmem:[#allocation6 + $0x4e0] sm:$0xf] }
  0xdb   :  { %v2118_v57 = vor.u32 %v2451_v55, %v2117_v54  ;;  %v2095_v55 = vld [vmem:[#allocation6 + $0x4b8] sm:$0xf0] }
  0xdc   :  { %784 = vmatpush.bf16.msra.mxu0 %v1966_v1 }
  0xde   :  { %799 = vmatpush.bf16.msra.mxu1 %v1898_v2 }
 0x146   :  { %v279_v6 = vpop.f32.mrf.mxu1 }
 0x147   :  { %v280_v9 = vadd.f32 %v279_v6, %v186_v7  ;;  %v1885_v6 = vld [vmem:[#allocation6 + $0x310] sm:$0xf] }
 0x149   :  { %v298_v13 = vmax.f32 %v280_v9, 0.0 }
 0x14c   :  { %v293_v8 = vpop.f32.mrf.mxu2 }
 0x14d   :  { %v294_v15 = vadd.f32 %v293_v8, %v187_v11  ;;  %v1957_v8 = vld [vmem:[#allocation6 + $0x3a0] sm:$0xf] }
 0x14e   :  { %v281_v10 = vpop.f32.mrf.mxu1 }
 0x14f   :  { %v282_v12 = vadd.f32 %v281_v10, %v186_v7  ;;  %v299_v19 = vmax.f32 %v294_v15, 0.0  ;;  %v2393_v7 = vld [vmem:[#allocation6 + $0x314] sm:$0xf0]  ;;  %v2411_v10 = vld [vmem:[#allocation6 + $0x3a4] sm:$0xf0] }
 0x150   :  { %v1886_v9 = vor.u32 %v2393_v7, %v1885_v6  ;;  %v2410_v15 = vld [vmem:[#allocation6 + $0x3a4] sm:$0xf] }
 0x151   :  { %v300_v14 = vmax.f32 %v282_v12, 0.0  ;;  %v1887_v12 = vld [vmem:[#allocation6 + $0x318] sm:$0xf0] }
 0x152   :  { %772 = vmatpush.bf16.msrb.mxu3 %v1886_v9 }
 0x153   :  { %v335_v16 = vpack.c.bf16 %v300_v14, %v298_v13  ;;  %v1958_v13 = vor.u32 %v2411_v10, %v1957_v8 }
 0x154   :  { %v295_v17 = vpop.f32.mrf.mxu2 }
 0x155   :  { %v296_v18 = vadd.f32 %v295_v17, %v187_v11  ;;  %512 = vmatmul.bf16.vlgmr.msra.gmra.mxu3 %v335_v16  ;;  %540 = vmatmul.bf16.vlgmr.msrb.gmra.mxu1 %v335_v16  ;;  %v2392_v11 = vld [vmem:[#allocation6 + $0x314] sm:$0xf]  ;;  %v1959_v16 = vld [vmem:[#allocation6 + $0x3a8] sm:$0xf0] }
 0x156   :  { %v1890_v14 = vor.u32 %v2392_v11, %v1887_v12  ;;  %v1962_v17 = vor.u32 %v2410_v15, %v1959_v16  ;;  %785 = vmatpush.bf16.msra.mxu0 %v1958_v13 }
 0x157   :  { %v301_v20 = vmax.f32 %v296_v18, 0.0  ;;  %v1877_v18 = vld [vmem:[#allocation6 + $0x300] sm:$0xf] }
 0x158   :  { %800 = vmatpush.bf16.msra.mxu1 %v1890_v14  ;;  %813 = vmatpush.bf16.msra.mxu2 %v1962_v17 }
 0x159   :  { %v336_v21 = vpack.c.bf16 %v301_v20, %v299_v19  ;;  %v2391_v19 = vld [vmem:[#allocation6 + $0x304] sm:$0xf0]  ;;  %v1949_v20 = vld [vmem:[#allocation6 + $0x390] sm:$0xf] }
 0x15a   :  { %v1950_v25 = vor.u32 %v2409_v22, %v1949_v20  ;;  %v2433_v22 = vld [vmem:[#allocation6 + $0x454] sm:$0xf0] }
 0x15b   :  { %526 = vmatmul.bf16.vlgmr.msrb.gmra.mxu0 %v336_v21  ;;  %554 = vmatmul.bf16.vlgmr.msrb.gmra.mxu2 %v336_v21  ;;  %v1878_v21 = vor.u32 %v2391_v19, %v1877_v18 }
 0x15c   :  { %786 = vmatpush.bf16.msra.mxu0 %v1950_v25  ;;  %801 = vmatpush.bf16.msra.mxu1 %v1882_v26  ;;  %v2047_v25 = vld [vmem:[#allocation6 + $0x458] sm:$0xf0] }
 0x15d   :  { %773 = vmatpush.bf16.msrb.mxu3 %v1878_v21  ;;  %814 = vmatpush.bf16.msra.mxu2 %v1954_v29  ;;  %v2045_v21 = vld [vmem:[#allocation6 + $0x450] sm:$0xf]  ;;  %v2050_v26 = vor.u32 %v2432_v23, %v2047_v25  ;;  %v2448_v29 = vld [vmem:[#allocation6 + $0x4d4] sm:$0xf]  ;;  %v2069_v23 = vld [vmem:[#allocation6 + $0x480] sm:$0xf] }
 0x15e   :  { %v2046_v24 = vor.u32 %v2433_v22, %v2045_v21  ;;  %v2114_v32 = vor.u32 %v2448_v29, %v2111_v31  ;;  %v2007_v21 = vld [vmem:[#allocation6 + $0x408] sm:$0xf0]  ;;  %v2438_v25 = vld [vmem:[#allocation6 + $0x484] sm:$0xf] }
 0x15f   :  { %v2074_v28 = vor.u32 %v2438_v25, %v2071_v27  ;;  %v2463_v27 = vld [vmem:[#allocation6 + $0x544] sm:$0xf0] }
 0x160   :  { %787 = vmatpush.bf16.msra.mxu0 %v1942_v33  ;;  %1056 = vmatpush.bf16.msrb.mxu1 %v2066_v43  ;;  %v2037_v33 = vld [vmem:[#allocation6 + $0x440] sm:$0xf]  ;;  %v2103_v43 = vld [vmem:[#allocation6 + $0x4c8] sm:$0xf0] }
 0x161   :  { %815 = vmatpush.bf16.msra.mxu2 %v1946_v35  ;;  %1028 = vmatpush.bf16.msra.mxu3 %v2062_v39  ;;  %v2430_v35 = vld [vmem:[#allocation6 + $0x444] sm:$0xf]  ;;  %v2038_v36 = vor.u32 %v2431_v34, %v2037_v33  ;;  %v2101_v39 = vld [vmem:[#allocation6 + $0x4c0] sm:$0xf] }
 0x162   :  { %v2042_v38 = vor.u32 %v2430_v35, %v2039_v37  ;;  %v2102_v42 = vor.u32 %v2447_v40, %v2101_v39 }
 0x164   :  { %1042 = vmatpush.bf16.msrb.mxu0 %v2126_v44  ;;  %1057 = vmatpush.bf16.msrb.mxu1 %v2058_v53  ;;  %v2106_v44 = vor.u32 %v2446_v41, %v2103_v43  ;;  %v2444_v53 = vld [vmem:[#allocation6 + $0x4b4] sm:$0xf] }
 0x165   :  { %1070 = vmatpush.bf16.msrb.mxu2 %v2130_v48  ;;  %1029 = vmatpush.bf16.msra.mxu3 %v2054_v52  ;;  %v2030_v48 = vor.u32 %v2429_v46, %v2029_v45  ;;  %v2445_v52 = vld [vmem:[#allocation6 + $0x4b4] sm:$0xf0]  ;;  %v2098_v56 = vor.u32 %v2444_v53, %v2095_v55 }
 0x166   :  { %v2094_v54 = vor.u32 %v2445_v52, %v2093_v51  ;;  %v2469_v55 = vld [vmem:[#allocation6 + $0x574] sm:$0xf0] }
 0x168   :  { %1043 = vmatpush.bf16.msrb.mxu0 %v2118_v57  ;;  %1058 = vmatpush.bf16.msrb.mxu1 %v2050_v26  ;;  %v2021_v57 = vld [vmem:[#allocation6 + $0x420] sm:$0xf] }
 0x169   :  { %1071 = vmatpush.bf16.msrb.mxu2 %v2122_v59  ;;  %1030 = vmatpush.bf16.msra.mxu3 %v2046_v24  ;;  %v2426_v59 = vld [vmem:[#allocation6 + $0x424] sm:$0xf]  ;;  %v2439_v24 = vld [vmem:[#allocation6 + $0x484] sm:$0xf0] }
 0x16a   :  { %v2070_v26 = vor.u32 %v2439_v24, %v2069_v23  ;;  %v2480_v23 = vld [vmem:[#allocation6 + $0x5d4] sm:$0xf]  ;;  %v2245_v24 = vld [vmem:[#allocation6 + $0x5d8] sm:$0xf0] }
 0x16b   :  { %v2248_v25 = vor.u32 %v2480_v23, %v2245_v24 }
 0x16c   :  { %1044 = vmatpush.bf16.msrb.mxu0 %v2110_v30  ;;  %1059 = vmatpush.bf16.msrb.mxu1 %v2042_v38  ;;  %v600_v30 = vld [vmem:[#allocation8 + $0x6] sm:$0x3] }
 0x16d   :  { %1072 = vmatpush.bf16.msrb.mxu2 %v2114_v32  ;;  %1031 = vmatpush.bf16.msra.mxu3 %v2038_v36  ;;  %v602_v33 = vperm.slane %v600_v30, 0  ;;  %v603_v35 = vperm.slane %v600_v30, 1  ;;  %v2479_v30 = vld [vmem:[#allocation6 + $0x5c4] sm:$0xf0] }
 0x170   :  { %1045 = vmatpush.bf16.msrb.mxu0 %v2102_v42  ;;  %1060 = vmatpush.bf16.msrb.mxu1 %v2034_v50 }
 0x171   :  { %1073 = vmatpush.bf16.msrb.mxu2 %v2106_v44  ;;  %1032 = vmatpush.bf16.msra.mxu3 %v2030_v48 }
 0x174   :  { %1046 = vmatpush.bf16.msrb.mxu0 %v2094_v54  ;;  %v2195_v54 = vld [vmem:[#allocation6 + $0x570] sm:$0xf] }
 0x175   :  { %1074 = vmatpush.bf16.msrb.mxu2 %v2098_v56  ;;  %v2259_v56 = vld [vmem:[#allocation6 + $0x5f0] sm:$0xf] }
 0x1d2   :  { %v541_v60 = vpop.f32.mrf.mxu1 }
 0x1d3   :  { %v542_v9 = vadd.f32 %v541_v60, %v341_v3  ;;  %v2022_v60 = vor.u32 %v2427_v58, %v2021_v57  ;;  %v2196_v57 = vor.u32 %v2469_v55, %v2195_v54  ;;  %v2485_v58 = vld [vmem:[#allocation6 + $0x5f4] sm:$0xf0]  ;;  %v2475_v54 = vld [vmem:[#allocation6 + $0x5a4] sm:$0xf0]  ;;  %v2458_v55 = vld [vmem:[#allocation6 + $0x524] sm:$0xf] }
 0x1d5   :  { %1033 = vmatpush.bf16.msra.mxu3 %v2022_v60  ;;  %v2197_v60 = vld [vmem:[#allocation6 + $0x578] sm:$0xf0] }
 0x1d8   :  { %v513_v62 = vpop.f32.mrf.mxu3  ;;  %v527_v63 = vpop.f32.mrf.mxu0 }
 0x1d9   :  { %v514_v1 = vadd.f32 %v513_v62, %v340_v0  ;;  %v2026_v62 = vor.u32 %v2426_v59, %v2023_v61  ;;  %v2468_v59 = vld [vmem:[#allocation6 + $0x574] sm:$0xf]  ;;  %v2260_v61 = vor.u32 %v2485_v58, %v2259_v56  ;;  %v2157_v56 = vld [vmem:[#allocation6 + $0x528] sm:$0xf0] }
 0x1da   :  { %v543_v7 = vpop.f32.mrf.mxu1  ;;  %v2160_v58 = vor.u32 %v2458_v55, %v2157_v56 }
 0x1db   :  { %v528_v5 = vadd.f32 %v527_v63, %v514_v1  ;;  %v544_v12 = vadd.f32 %v543_v7, %v341_v3  ;;  %v2085_v63 = vld [vmem:[#allocation6 + $0x4a0] sm:$0xf]  ;;  %v2442_v1 = vld [vmem:[#allocation6 + $0x4a4] sm:$0xf]  ;;  %v2087_v3 = vld [vmem:[#allocation6 + $0x4a8] sm:$0xf0]  ;;  %1061 = vmatpush.bf16.msrb.mxu1 %v2026_v62  ;;  %v2200_v62 = vor.u32 %v2468_v59, %v2197_v60 }
 0x1dc   :  { %v2424_v7 = vld [vmem:[#allocation6 + $0x414] sm:$0xf]  ;;  %v2474_v59 = vld [vmem:[#allocation6 + $0x5a4] sm:$0xf]  ;;  %v2221_v60 = vld [vmem:[#allocation6 + $0x5a8] sm:$0xf0] }
 0x1dd   :  { %v560_v11 = vmax.f32 %v528_v5, 0.0  ;;  %v2013_v5 = vld [vmem:[#allocation6 + $0x410] sm:$0xf] }
 0x1de   :  { %v555_v2 = vpop.f32.mrf.mxu2 }
 0x1df   :  { %v556_v13 = vadd.f32 %v555_v2, %v542_v9  ;;  %v2015_v9 = vld [vmem:[#allocation6 + $0x418] sm:$0xf0] }
 0x1e0   :  { %v515_v4 = vpop.f32.mrf.mxu3  ;;  %v529_v8 = vpop.f32.mrf.mxu0 }
 0x1e1   :  { %v516_v6 = vadd.f32 %v515_v4, %v340_v0  ;;  %v561_v18 = vmax.f32 %v556_v13, 0.0  ;;  %v2443_v0 = vld [vmem:[#allocation6 + $0x4a4] sm:$0xf0]  ;;  %v2090_v4 = vor.u32 %v2442_v1, %v2087_v3  ;;  %v2440_v13 = vld [vmem:[#allocation6 + $0x494] sm:$0xf] }
 0x1e2   :  { %v2086_v2 = vor.u32 %v2443_v0, %v2085_v63  ;;  %v2484_v63 = vld [vmem:[#allocation6 + $0x5f4] sm:$0xf]  ;;  %v2261_v0 = vld [vmem:[#allocation6 + $0x5f8] sm:$0xf0]  ;;  %v2467_v3 = vld [vmem:[#allocation6 + $0x564] sm:$0xf0] }
 0x1e3   :  { %v530_v10 = vadd.f32 %v529_v8, %v516_v6  ;;  %v2425_v6 = vld [vmem:[#allocation6 + $0x414] sm:$0xf0]  ;;  %1075 = vmatpush.bf16.msrb.mxu2 %v2090_v4  ;;  %v2264_v1 = vor.u32 %v2484_v63, %v2261_v0  ;;  %v2251_v4 = vld [vmem:[#allocation6 + $0x5e0] sm:$0xf]  ;;  %v2211_v0 = vld [vmem:[#allocation6 + $0x590] sm:$0xf] }
 0x1e4   :  { %1047 = vmatpush.bf16.msrb.mxu0 %v2086_v2  ;;  %v2014_v8 = vor.u32 %v2425_v6, %v2013_v5  ;;  %v2187_v2 = vld [vmem:[#allocation6 + $0x560] sm:$0xf]  ;;  %v2483_v6 = vld [vmem:[#allocation6 + $0x5e4] sm:$0xf0]  ;;  %v2457_v63 = vld [vmem:[#allocation6 + $0x514] sm:$0xf0] }
 0x1e5   :  { %v562_v14 = vmax.f32 %v530_v10, 0.0  ;;  %v2018_v10 = vor.u32 %v2424_v7, %v2015_v9  ;;  %v2188_v5 = vor.u32 %v2467_v3, %v2187_v2  ;;  %v2466_v7 = vld [vmem:[#allocation6 + $0x564] sm:$0xf]  ;;  %v2252_v9 = vor.u32 %v2483_v6, %v2251_v4  ;;  %v2473_v2 = vld [vmem:[#allocation6 + $0x594] sm:$0xf0] }
 0x1e6   :  { %v557_v15 = vpop.f32.mrf.mxu2  ;;  %1034 = vmatpush.bf16.msra.mxu3 %v2014_v8  ;;  %v2189_v8 = vld [vmem:[#allocation6 + $0x568] sm:$0xf0]  ;;  %v2456_v3 = vld [vmem:[#allocation6 + $0x514] sm:$0xf]  ;;  %v2149_v4 = vld [vmem:[#allocation6 + $0x518] sm:$0xf0] }
 0x1e7   :  { %v597_v16 = vpack.c.bf16 %v562_v14, %v560_v11  ;;  %v558_v17 = vadd.f32 %v557_v15, %v544_v12  ;;  %v2077_v11 = vld [vmem:[#allocation6 + $0x490] sm:$0xf]  ;;  %v2441_v12 = vld [vmem:[#allocation6 + $0x494] sm:$0xf0]  ;;  %v2079_v15 = vld [vmem:[#allocation6 + $0x498] sm:$0xf0]  ;;  %1062 = vmatpush.bf16.msrb.mxu1 %v2018_v10  ;;  %v2192_v10 = vor.u32 %v2466_v7, %v2189_v8  ;;  %v2152_v6 = vor.u32 %v2456_v3, %v2149_v4 }
 0x1e8   :  { %v2078_v14 = vor.u32 %v2441_v12, %v2077_v11  ;;  %v2482_v11 = vld [vmem:[#allocation6 + $0x5e4] sm:$0xf]  ;;  %v2253_v12 = vld [vmem:[#allocation6 + $0x5e8] sm:$0xf0]  ;;  %v2472_v7 = vld [vmem:[#allocation6 + $0x594] sm:$0xf] }
 0x1e9   :  { %v563_v19 = vmax.f32 %v558_v17, 0.0  ;;  %774 = vmatmul.bf16.vlgmr.msrb.gmra.mxu3 %v597_v16  ;;  %802 = vmatmul.bf16.vlgmr.msra.gmra.mxu1 %v597_v16  ;;  %v2082_v16 = vor.u32 %v2440_v13, %v2079_v15  ;;  %v2005_v17 = vld [vmem:[#allocation6 + $0x400] sm:$0xf]  ;;  %v2256_v13 = vor.u32 %v2482_v11, %v2253_v12  ;;  %v2465_v15 = vld [vmem:[#allocation6 + $0x554] sm:$0xf0] }
 0x1ea   :  { %1048 = vmatpush.bf16.msrb.mxu0 %v2078_v14  ;;  %v2179_v14 = vld [vmem:[#allocation6 + $0x550] sm:$0xf]  ;;  %v2213_v8 = vld [vmem:[#allocation6 + $0x598] sm:$0xf0]  ;;  %v2455_v11 = vld [vmem:[#allocation6 + $0x504] sm:$0xf0] }
 0x1eb   :  { %v598_v20 = vpack.c.bf16 %v563_v19, %v561_v18  ;;  %v2423_v18 = vld [vmem:[#allocation6 + $0x404] sm:$0xf0]  ;;  %v2422_v19 = vld [vmem:[#allocation6 + $0x404] sm:$0xf]  ;;  %1076 = vmatpush.bf16.msrb.mxu2 %v2082_v16  ;;  %v2243_v16 = vld [vmem:[#allocation6 + $0x5d0] sm:$0xf] }
 0x1ec   :  { %v2010_v22 = vor.u32 %v2422_v19, %v2007_v21  ;;  %v2464_v19 = vld [vmem:[#allocation6 + $0x554] sm:$0xf]  ;;  %v2203_v12 = vld [vmem:[#allocation6 + $0x580] sm:$0xf] }
 0x1ed   :  { %788 = vmatmul.bf16.vlgmr.msra.gmra.mxu0 %v598_v20  ;;  %816 = vmatmul.bf16.vlgmr.msra.gmra.mxu2 %v598_v20  ;;  %v2006_v20 = vor.u32 %v2423_v18, %v2005_v17  ;;  %v2180_v17 = vor.u32 %v2465_v15, %v2179_v14  ;;  %v2481_v18 = vld [vmem:[#allocation6 + $0x5d4] sm:$0xf0]  ;;  %v2471_v14 = vld [vmem:[#allocation6 + $0x584] sm:$0xf0]  ;;  %v2454_v15 = vld [vmem:[#allocation6 + $0x504] sm:$0xf] }
 0x1ee   :  { %1063 = vmatpush.bf16.msrb.mxu1 %v2010_v22  ;;  %1049 = vmatpush.bf16.msrb.mxu0 %v2070_v26  ;;  %v2244_v21 = vor.u32 %v2481_v18, %v2243_v16  ;;  %v2171_v26 = vld [vmem:[#allocation6 + $0x540] sm:$0xf]  ;;  %v2141_v16 = vld [vmem:[#allocation6 + $0x508] sm:$0xf0]  ;;  %v2204_v18 = vor.u32 %v2471_v14, %v2203_v12 }
 0x1ef   :  { %1035 = vmatpush.bf16.msra.mxu3 %v2006_v20  ;;  %1077 = vmatpush.bf16.msrb.mxu2 %v2074_v28  ;;  %v2181_v20 = vld [vmem:[#allocation6 + $0x558] sm:$0xf0]  ;;  %v2235_v28 = vld [vmem:[#allocation6 + $0x5c0] sm:$0xf] }
 0x1f0   :  { %v2184_v22 = vor.u32 %v2464_v19, %v2181_v20  ;;  %v2144_v19 = vor.u32 %v2454_v15, %v2141_v16  ;;  %v2470_v20 = vld [vmem:[#allocation6 + $0x584] sm:$0xf]  ;;  %v1593_v15 = vstv %s2713_s2 }
 0x1f2   :  { %1362 = vmatpush.bf16.msra.mxu0 %v2260_v61  ;;  %1376 = vmatpush.bf16.msra.mxu1 %v2200_v62  ;;  %v2224_v61 = vor.u32 %v2474_v59, %v2221_v60  ;;  %v2147_v62 = vld [vmem:[#allocation6 + $0x510] sm:$0xf] }
 0x1f3   :  { %1348 = vmatpush.bf16.msrb.mxu3 %v2196_v57  ;;  %1390 = vmatpush.bf16.msra.mxu2 %v2264_v1  ;;  %v2148_v1 = vor.u32 %v2457_v63, %v2147_v62 }
 0x1f6   :  { %1363 = vmatpush.bf16.msra.mxu0 %v2252_v9  ;;  %1377 = vmatpush.bf16.msra.mxu1 %v2192_v10  ;;  %v2216_v9 = vor.u32 %v2472_v7, %v2213_v8  ;;  %v2139_v10 = vld [vmem:[#allocation6 + $0x500] sm:$0xf] }
 0x1f7   :  { %1349 = vmatpush.bf16.msrb.mxu3 %v2188_v5  ;;  %1391 = vmatpush.bf16.msra.mxu2 %v2256_v13  ;;  %v2212_v5 = vor.u32 %v2473_v2, %v2211_v0  ;;  %v2140_v13 = vor.u32 %v2455_v11, %v2139_v10 }
 0x1fa   :  { %1364 = vmatpush.bf16.msra.mxu0 %v2244_v21  ;;  %1378 = vmatpush.bf16.msra.mxu1 %v2184_v22  ;;  %v2205_v21 = vld [vmem:[#allocation6 + $0x588] sm:$0xf0] }
 0x1fb   :  { %1350 = vmatpush.bf16.msrb.mxu3 %v2180_v17  ;;  %1392 = vmatpush.bf16.msra.mxu2 %v2248_v25  ;;  %v862_v17 = vld [vmem:[#allocation8 + $0x8] sm:$0x3]  ;;  %v2208_v22 = vor.u32 %v2470_v20, %v2205_v21 }
 0x1fc   :  { %v865_v24 = vperm.slane %v862_v17, 1  ;;  %v864_v25 = vperm.slane %v862_v17, 0 }
 0x266   :  { %v803_v29 = vpop.f32.mrf.mxu1 }
 0x267   :  { %v804_v39 = vadd.f32 %v803_v29, %v603_v35  ;;  %v2172_v29 = vor.u32 %v2463_v27, %v2171_v26  ;;  %v2668_v26 = vmov 72  }
 0x268   :  { %2512 = vset.pattern.permute.xlu0 %v2668_v26  ;;  %2513 = vset.pattern.permute.xlu1 %v2668_v26 }
 0x269   :  { %1351 = vmatpush.bf16.msrb.mxu3 %v2172_v29 }
 0x26a   :  { %v789_v31 = vpop.f32.mrf.mxu0 }
 0x26c   :  { %v775_v32 = vpop.f32.mrf.mxu3 }
 0x26d   :  { %v776_v36 = vadd.f32 %v775_v32, %v602_v33  ;;  %v2173_v32 = vld [vmem:[#allocation6 + $0x548] sm:$0xf0] }
 0x26e   :  { %v805_v37 = vpop.f32.mrf.mxu1 }
 0x26f   :  { %v790_v40 = vadd.f32 %v789_v31, %v776_v36  ;;  %v806_v43 = vadd.f32 %v805_v37, %v603_v35  ;;  %v2462_v31 = vld [vmem:[#allocation6 + $0x544] sm:$0xf]  ;;  %v2237_v36 = vld [vmem:[#allocation6 + $0x5c8] sm:$0xf0] }
 0x270   :  { %v817_v34 = vpop.f32.mrf.mxu2  ;;  %v2478_v35 = vld [vmem:[#allocation6 + $0x5c4] sm:$0xf] }
 0x271   :  { %v818_v44 = vadd.f32 %v817_v34, %v804_v39  ;;  %v822_v47 = vmax.f32 %v790_v40, 0.0  ;;  %v2176_v34 = vor.u32 %v2462_v31, %v2173_v32  ;;  %v2240_v37 = vor.u32 %v2478_v35, %v2237_v36  ;;  %v2461_v39 = vld [vmem:[#allocation6 + $0x534] sm:$0xf0]  ;;  %v2227_v40 = vld [vmem:[#allocation6 + $0x5b0] sm:$0xf] }
 0x272   :  { %v791_v42 = vpop.f32.mrf.mxu0 }
 0x273   :  { %v823_v50 = vmax.f32 %v818_v44, 0.0  ;;  %1379 = vmatpush.bf16.msra.mxu1 %v2176_v34  ;;  %1393 = vmatpush.bf16.msra.mxu2 %v2240_v37  ;;  %v2165_v44 = vld [vmem:[#allocation6 + $0x538] sm:$0xf0] }
 0x274   :  { %v777_v38 = vpop.f32.mrf.mxu3 }
 0x275   :  { %v778_v41 = vadd.f32 %v777_v38, %v602_v33  ;;  %v2236_v33 = vor.u32 %v2479_v30, %v2235_v28  ;;  %v2163_v38 = vld [vmem:[#allocation6 + $0x530] sm:$0xf] }
 0x277   :  { %v792_v45 = vadd.f32 %v791_v42, %v778_v41  ;;  %1365 = vmatpush.bf16.msra.mxu0 %v2236_v33  ;;  %v2164_v41 = vor.u32 %v2461_v39, %v2163_v38  ;;  %v2477_v42 = vld [vmem:[#allocation6 + $0x5b4] sm:$0xf0] }
 0x278   :  { %v819_v46 = vpop.f32.mrf.mxu2 }
 0x279   :  { %v824_v48 = vmax.f32 %v792_v45, 0.0  ;;  %v820_v49 = vadd.f32 %v819_v46, %v806_v43  ;;  %v2460_v43 = vld [vmem:[#allocation6 + $0x534] sm:$0xf]  ;;  %v2228_v45 = vor.u32 %v2477_v42, %v2227_v40  ;;  %1352 = vmatpush.bf16.msrb.mxu3 %v2164_v41 }
 0x27a   :  { %v2168_v46 = vor.u32 %v2460_v43, %v2165_v44 }
 0x27b   :  { %v859_v51 = vpack.c.bf16 %v824_v48, %v822_v47  ;;  %v825_v52 = vmax.f32 %v820_v49, 0.0  ;;  %v2476_v47 = vld [vmem:[#allocation6 + $0x5b4] sm:$0xf]  ;;  %v2229_v48 = vld [vmem:[#allocation6 + $0x5b8] sm:$0xf0]  ;;  %1366 = vmatpush.bf16.msra.mxu0 %v2228_v45 }
 0x27c   :  { %v2232_v49 = vor.u32 %v2476_v47, %v2229_v48  ;;  %1380 = vmatpush.bf16.msra.mxu1 %v2168_v46 }
 0x27d   :  { %v860_v53 = vpack.c.bf16 %v825_v52, %v823_v50  ;;  %1036 = vmatmul.bf16.vlgmr.msra.gmra.mxu3 %v859_v51  ;;  %1064 = vmatmul.bf16.vlgmr.msrb.gmra.mxu1 %v859_v51  ;;  %v2155_v50 = vld [vmem:[#allocation6 + $0x520] sm:$0xf]  ;;  %v2459_v51 = vld [vmem:[#allocation6 + $0x524] sm:$0xf0] }
 0x27e   :  { %v2219_v52 = vld [vmem:[#allocation6 + $0x5a0] sm:$0xf]  ;;  %1394 = vmatpush.bf16.msra.mxu2 %v2232_v49 }
 0x27f   :  { %1050 = vmatmul.bf16.vlgmr.msrb.gmra.mxu0 %v860_v53  ;;  %1078 = vmatmul.bf16.vlgmr.msrb.gmra.mxu2 %v860_v53  ;;  %v2156_v53 = vor.u32 %v2459_v51, %v2155_v50  ;;  %v2220_v57 = vor.u32 %v2475_v54, %v2219_v52 }
 0x280   :  { %1381 = vmatpush.bf16.msra.mxu1 %v2160_v58 }
 0x281   :  { %1353 = vmatpush.bf16.msrb.mxu3 %v2156_v53  ;;  %1367 = vmatpush.bf16.msra.mxu0 %v2220_v57 }
 0x282   :  { %1395 = vmatpush.bf16.msra.mxu2 %v2224_v61 }
 0x284   :  { %1382 = vmatpush.bf16.msra.mxu1 %v2152_v6 }
 0x285   :  { %1354 = vmatpush.bf16.msrb.mxu3 %v2148_v1  ;;  %1368 = vmatpush.bf16.msra.mxu0 %v2212_v5 }
 0x286   :  { %1396 = vmatpush.bf16.msra.mxu2 %v2216_v9 }
 0x288   :  { %1383 = vmatpush.bf16.msra.mxu1 %v2144_v19  ;;  %v1597_v19 = vstv %s2715_s3 }
 0x289   :  { %1355 = vmatpush.bf16.msrb.mxu3 %v2140_v13  ;;  %1369 = vmatpush.bf16.msra.mxu0 %v2204_v18 }
 0x28a   :  { %1397 = vmatpush.bf16.msra.mxu2 %v2208_v22 }
 0x2fa   :  { %v1065_v23 = vpop.f32.mrf.mxu1 }
 0x2fb   :  { %v1066_v29 = vadd.f32 %v1065_v23, %v865_v24 }
 0x2fc   :  { %v1051_v27 = vpop.f32.mrf.mxu0 }
 0x300   :  { %v1037_v28 = vpop.f32.mrf.mxu3 }
 0x301   :  { %v1038_v30 = vadd.f32 %v1037_v28, %v864_v25 }
 0x302   :  { %v1079_v31 = vpop.f32.mrf.mxu2  ;;  %v1067_v36 = vpop.f32.mrf.mxu1 }
 0x303   :  { %v1052_v32 = vadd.f32 %v1051_v27, %v1038_v30  ;;  %v1080_v33 = vadd.f32 %v1079_v31, %v1066_v29  ;;  %v1068_v40 = vadd.f32 %v1067_v36, %v865_v24  ;;  %v2493_v36 = vld [vmem:[#allocation6 + $0x674] sm:$0xf0] }
 0x304   :  { %v1053_v43 = vpop.f32.mrf.mxu0 }
 0x305   :  { %v1126_v34 = vmin.f32 %v1052_v32, 0.0  ;;  %v2131_v35 = vmul.f32 -1.442695, %v1080_v33  ;;  %v1127_v37 = vmin.f32 %v1080_v33, 0.0  ;;  %vm1122_vm0 = vcmp.gt.f32.partialorder %v1052_v32, 0.0 }
 0x306   :  { %vm1123_vm1 = vcmp.gt.f32.partialorder %v1080_v33, 0.0 }
 0x307   :  { %2520 = vpow2.f32 %v2131_v35  ;;  %v1130_v38 = vmul.f32 1.442695, %v1126_v34  ;;  %v1132_v41 = vmul.f32 1.442695, %v1127_v37  ;;  %v2299_v35 = vld [vmem:[#allocation6 + $0x670] sm:$0xf] }
 0x308   :  { %v1039_v39 = vpop.f32.mrf.mxu3  ;;  %v2300_v37 = vor.u32 %v2493_v36, %v2299_v35 }
 0x309   :  { %v1040_v42 = vadd.f32 %v1039_v39, %v864_v25  ;;  %2522 = vpow2.f32 %v1130_v38  ;;  %v2327_v38 = vld [vmem:[#allocation6 + $0x6e0] sm:$0xf]  ;;  %v2500_v39 = vld [vmem:[#allocation6 + $0x6e4] sm:$0xf0] }
 0x30a   :  { %v1081_v44 = vpop.f32.mrf.mxu2  ;;  %2524 = vpow2.f32 %v1132_v41  ;;  %1564 = vmatpush.bf16.msra.mxu3 %v2300_v37  ;;  %v2295_v41 = vld [vmem:[#allocation6 + $0x660] sm:$0xf] }
 0x30b   :  { %v1054_v45 = vadd.f32 %v1053_v43, %v1040_v42  ;;  %v1082_v46 = vadd.f32 %v1081_v44, %v1068_v40  ;;  %v2328_v40 = vor.u32 %v2500_v39, %v2327_v38  ;;  %v2492_v42 = vld [vmem:[#allocation6 + $0x664] sm:$0xf0]  ;;  %v2323_v44 = vld [vmem:[#allocation6 + $0x6d0] sm:$0xf] }
 0x30c   :  { %v2296_v43 = vor.u32 %v2492_v42, %v2295_v41 }
 0x30d   :  { %v2521_v47 = vpop.eup %2520  ;;  %v1128_v48 = vmin.f32 %v1054_v45, 0.0  ;;  %v2132_v49 = vmul.f32 -1.442695, %v1082_v46  ;;  %v1129_v51 = vmin.f32 %v1082_v46, 0.0  ;;  %vm1124_vm2 = vcmp.gt.f32.partialorder %v1054_v45, 0.0 }
 0x30e   :  { %v1090_v50 = vadd.f32 1.0, %v2521_v47  ;;  %vm1125_vm3 = vcmp.gt.f32.partialorder %v1082_v46, 0.0  ;;  %1565 = vmatpush.bf16.msra.mxu3 %v2296_v43  ;;  %v2291_v47 = vld [vmem:[#allocation6 + $0x650] sm:$0xf] }
 0x30f   :  { %v1134_v52 = vmul.f32 1.442695, %v1128_v48  ;;  %2526 = vpow2.f32 %v2132_v49  ;;  %v1136_v53 = vmul.f32 1.442695, %v1129_v51  ;;  %v2523_v54 = vpop.eup %2522  ;;  %v2491_v48 = vld [vmem:[#allocation6 + $0x654] sm:$0xf0] }
 0x310   :  { %2528 = vrcp.f32 %v1090_v50  ;;  %v2525_v55 = vpop.eup %2524  ;;  %v2133_v58 = vadd.f32 -1.0, %v2523_v54  ;;  %v1101_v3 = vand.u32 2147483647, %v1090_v50  ;;  %v1103_v7 = vand.u32 2147483648, %v1090_v50  ;;  %v2498_v51 = vld [vmem:[#allocation6 + $0x6c4] sm:$0xf0] }
 0x311   :  { %2530 = vpow2.f32 %v1134_v52  ;;  %v2134_v59 = vadd.f32 -1.0, %v2525_v55  ;;  %vm1097_vm5 = vweird.f32 %v1090_v50  ;;  %v2292_v49 = vor.u32 %v2491_v48, %v2291_v47  ;;  %v2490_v54 = vld [vmem:[#allocation6 + $0x644] sm:$0xf0] }
 0x312   :  { %2532 = vpow2.f32 %v1136_v53  ;;  %v1142_v4 = vsel %vm1122_vm0, %v1052_v32, %v2133_v58  ;;  %v1104_v14 = vor.u32 1.1754944e-38, %v1103_v7  ;;  %vm1102_vm7 = vcmp.eq.f32.partialorder %v1101_v3, 8.507059e+37  ;;  %v2331_v32 = vld [vmem:[#allocation6 + $0x6f0] sm:$0xf]  ;;  %v2287_v53 = vld [vmem:[#allocation6 + $0x640] sm:$0xf] }
 0x313   :  { %v1143_v6 = vsel %vm1123_vm1, %v1080_v33, %v2134_v59  ;;  %v2501_v33 = vld [vmem:[#allocation6 + $0x6f4] sm:$0xf0]  ;;  %1566 = vmatpush.bf16.msra.mxu3 %v2292_v49  ;;  %v2288_v55 = vor.u32 %v2490_v54, %v2287_v53  ;;  %v2283_v59 = vld [vmem:[#allocation6 + $0x630] sm:$0xf] }
 0x314   :  { %v2332_v34 = vor.u32 %v2501_v33, %v2331_v32  ;;  %v2275_v7 = vld [vmem:[#allocation6 + $0x610] sm:$0xf] }
 0x315   :  { %v2527_v56 = vpop.eup %2526 }
 0x316   :  { %v2529_v57 = vpop.eup %2528  ;;  %v1091_v60 = vadd.f32 1.0, %v2527_v56  ;;  %1578 = vmatpush.bf16.msrb.mxu0 %v2332_v34  ;;  %v2315_v56 = vld [vmem:[#allocation6 + $0x6b0] sm:$0xf] }
 0x317   :  { %v2531_v61 = vpop.eup %2530  ;;  %v1093_v62 = vmul.f32 %v2529_v57, %v1090_v50  ;;  %vm1098_vm4 = vweird.f32 %v2529_v57  ;;  %v2319_v50 = vld [vmem:[#allocation6 + $0x6c0] sm:$0xf]  ;;  %1567 = vmatpush.bf16.msra.mxu3 %v2288_v55 }
 0x318   :  { %v2533_v63 = vpop.eup %2532  ;;  %v2135_v0 = vadd.f32 -1.0, %v2531_v61  ;;  %2534 = vrcp.f32 %v1091_v60  ;;  %vm1099_vm6 = vmor %vm1097_vm5, %vm1098_vm4  ;;  %v1118_v22 = vand.u32 2147483648, %v1091_v60  ;;  %v1116_v25 = vand.u32 2147483647, %v1091_v60 }
 0x319   :  { %v2136_v1 = vadd.f32 -1.0, %v2533_v63  ;;  %v1094_v2 = vsub.f32 1.0, %v1093_v62  ;;  %vm1112_vm9 = vweird.f32 %v1091_v60  ;;  %v2320_v52 = vor.u32 %v2498_v51, %v2319_v50  ;;  %v2311_v62 = vld [vmem:[#allocation6 + $0x6a0] sm:$0xf]  ;;  %v2496_v63 = vld [vmem:[#allocation6 + $0x6a4] sm:$0xf0] }
 0x31a   :  { %v1144_v5 = vsel %vm1124_vm2, %v1054_v45, %v2135_v0  ;;  %v1119_v27 = vor.u32 1.1754944e-38, %v1118_v22  ;;  %vm1117_vm11 = vcmp.eq.f32.partialorder %v1116_v25, 8.507059e+37  ;;  %1579 = vmatpush.bf16.msrb.mxu0 %v2328_v40  ;;  %v2499_v45 = vld [vmem:[#allocation6 + $0x6d4] sm:$0xf0]  ;;  %v2312_v0 = vor.u32 %v2496_v63, %v2311_v62 }
 0x31b   :  { %v1179_v8 = vpack.c.bf16 %v1144_v5, %v1142_v4  ;;  %v1145_v9 = vsel %vm1125_vm3, %v1082_v46, %v2136_v1  ;;  %v1095_v10 = vmul.f32 %v2529_v57, %v1094_v2  ;;  %v2324_v46 = vor.u32 %v2499_v45, %v2323_v44  ;;  %v2279_v1 = vld [vmem:[#allocation6 + $0x620] sm:$0xf]  ;;  %v2488_v2 = vld [vmem:[#allocation6 + $0x624] sm:$0xf0]  ;;  %v2307_v4 = vld [vmem:[#allocation6 + $0x690] sm:$0xf] }
 0x31c   :  { %v1180_v11 = vpack.c.bf16 %v1145_v9, %v1143_v6  ;;  %v2280_v3 = vor.u32 %v2488_v2, %v2279_v1  ;;  %v2495_v5 = vld [vmem:[#allocation6 + $0x694] sm:$0xf0] }
 0x31d   :  { %1356 = vmatmul.bf16.vlgmr.msrb.gmra.mxu3 %v1179_v8  ;;  %1384 = vmatmul.bf16.vlgmr.msra.gmra.mxu1 %v1179_v8  ;;  %v1096_v12 = vadd.f32 %v2529_v57, %v1095_v10  ;;  %v2308_v6 = vor.u32 %v2495_v5, %v2307_v4  ;;  %v2487_v8 = vld [vmem:[#allocation6 + $0x614] sm:$0xf0]  ;;  %v2303_v10 = vld [vmem:[#allocation6 + $0x680] sm:$0xf] }
 0x31e   :  { %v2535_v13 = vpop.eup %2534  ;;  %1370 = vmatmul.bf16.vlgmr.msra.gmra.mxu0 %v1180_v11  ;;  %1398 = vmatmul.bf16.vlgmr.msra.gmra.mxu2 %v1180_v11  ;;  %v2276_v9 = vor.u32 %v2487_v8, %v2275_v7  ;;  %v2494_v11 = vld [vmem:[#allocation6 + $0x684] sm:$0xf0] }
 0x31f   :  { %v1100_v16 = vsel %vm1099_vm6, %v2529_v57, %v1096_v12  ;;  %v1108_v17 = vmul.f32 %v2535_v13, %v1091_v60  ;;  %vm1113_vm8 = vweird.f32 %v2535_v13  ;;  %1580 = vmatpush.bf16.msrb.mxu0 %v2324_v46  ;;  %v2497_v57 = vld [vmem:[#allocation6 + $0x6b4] sm:$0xf0]  ;;  %v2304_v12 = vor.u32 %v2494_v11, %v2303_v10 }
 0x320   :  { %v1105_v18 = vsel %vm1102_vm7, %v1104_v14, %v1100_v16  ;;  %vm1114_vm10 = vmor %vm1112_vm9, %vm1113_vm8  ;;  %v2316_v58 = vor.u32 %v2497_v57, %v2315_v56  ;;  %v2489_v60 = vld [vmem:[#allocation6 + $0x634] sm:$0xf0]  ;;  %v2486_v14 = vld [vmem:[#allocation6 + $0x604] sm:$0xf0]  ;;  %v1600_v57 = vlaneseq }
 0x321   :  { %1605 = vperm.xlu0 %2512, %v1105_v18   ;;  %v1594_v20 = vmul.f32 %v1593_v15, %v1105_v18  ;;  %v1109_v21 = vsub.f32 1.0, %v1108_v17  ;;  %v2284_v61 = vor.u32 %v2489_v60, %v2283_v59 }
 0x322   :  { %v1601_v59 = vand.u32 127, %v1600_v57 }
 0x323   :  { %v1598_v23 = vadd.f32 %v1597_v19, %v1594_v20  ;;  %v1110_v24 = vmul.f32 %v2535_v13, %v1109_v21  ;;  %1581 = vmatpush.bf16.msrb.mxu0 %v2320_v52  ;;  %1568 = vmatpush.bf16.msra.mxu3 %v2284_v61 }
 0x324   :  { %vm1602_vm0 = vcmp.eq.s32.totalorder %v1601_v59, 2  ;;  %vm1615_vm1 = vcmp.eq.s32.totalorder %v1601_v59, 3 }
 0x325   :  { %1618 = vperm.xlu1 %2513, %v1598_v23   ;;  %v1111_v26 = vadd.f32 %v2535_v13, %v1110_v24 }
 0x327   :  { %v1115_v28 = vsel %vm1114_vm10, %v2535_v13, %v1111_v26  ;;  %1582 = vmatpush.bf16.msrb.mxu0 %v2316_v58  ;;  %1569 = vmatpush.bf16.msra.mxu3 %v2280_v3  ;;  %v2271_v13 = vld [vmem:[#allocation6 + $0x600] sm:$0xf]  ;;  %v2515_v58 = vld [vmem:[#allocation8 + $0xc] ss:$0 sm:$0xff] }
 0x328   :  { %v1120_v29 = vsel %vm1117_vm11, %v1119_v27, %v1115_v28  ;;  %v2272_v16 = vor.u32 %v2486_v14, %v2271_v13 }
 0x329   :  { %v1595_v30 = vmul.f32 %v1593_v15, %v1120_v29  ;;  %1610 = vperm.xlu0 %2512, %v1120_v29   ;;  %v1182_v15 = vld [vmem:[#allocation8 + $0xa] sm:$0x3] }
 0x32a   :  { %v1185_v18 = vperm.slane %v1182_v15, 1 }
 0x32b   :  { %v1599_v31 = vadd.f32 %v1597_v19, %v1595_v30  ;;  %1583 = vmatpush.bf16.msrb.mxu0 %v2312_v0  ;;  %1570 = vmatpush.bf16.msra.mxu3 %v2276_v9  ;;  %v1184_v19 = vperm.slane %v1182_v15, 0 }
 0x32d   :  { %1623 = vperm.xlu1 %2513, %v1599_v31  }
 0x32f   :  { %1584 = vmatpush.bf16.msrb.mxu0 %v2308_v6  ;;  %1571 = vmatpush.bf16.msra.mxu3 %v2272_v16 }
 0x333   :  { %1585 = vmatpush.bf16.msrb.mxu0 %v2304_v12 }
 0x393   :  { %v1606_v63 = vpop.permute.xlu0 %1605 }
 0x397   :  { %v1619_v0 = vpop.permute.xlu1 %1618 }
 0x39a   :  { %v1385_v17 = vpop.f32.mrf.mxu1 }
 0x39b   :  { %v1371_v20 = vpop.f32.mrf.mxu0  ;;  %v1386_v21 = vadd.f32 %v1385_v17, %v1185_v18  ;;  %v1611_v8 = vpop.permute.xlu0 %1610 }
 0x39f   :  { %v1624_v9 = vpop.permute.xlu1 %1623 }
 0x3a0   :  { %v1357_v22 = vpop.f32.mrf.mxu3 }
 0x3a1   :  { %v1358_v23 = vadd.f32 %v1357_v22, %v1184_v19  ;;  %v1399_v24 = vpop.f32.mrf.mxu2 }
 0x3a2   :  { %v1400_v25 = vadd.f32 %v1399_v24, %v1386_v21  ;;  %v1387_v29 = vpop.f32.mrf.mxu1 }
 0x3a3   :  { %v1372_v26 = vadd.f32 %v1371_v20, %v1358_v23  ;;  %v1388_v31 = vadd.f32 %v1387_v29, %v1185_v18  ;;  %v1373_v36 = vpop.f32.mrf.mxu0 }
 0x3a4   :  { %v1409_v27 = vmin.f32 %v1400_v25, 0.0  ;;  %vm1405_vm12 = vcmp.gt.f32.partialorder %v1400_v25, 0.0 }
 0x3a5   :  { %v1408_v28 = vmin.f32 %v1372_v26, 0.0  ;;  %vm1404_vm14 = vcmp.gt.f32.partialorder %v1372_v26, 0.0 }
 0x3a6   :  { %v1414_v30 = vmul.f32 1.442695, %v1409_v27 }
 0x3a7   :  { %v1412_v33 = vmul.f32 1.442695, %v1408_v28 }
 0x3a8   :  { %v1359_v32 = vpop.f32.mrf.mxu3  ;;  %2536 = vpow2.f32 %v1414_v30 }
 0x3a9   :  { %v1360_v34 = vadd.f32 %v1359_v32, %v1184_v19  ;;  %v1401_v35 = vpop.f32.mrf.mxu2  ;;  %2538 = vpow2.f32 %v1412_v33 }
 0x3aa   :  { %v1402_v37 = vadd.f32 %v1401_v35, %v1388_v31 }
 0x3ab   :  { %v1374_v38 = vadd.f32 %v1373_v36, %v1360_v34 }
 0x3ac   :  { %v1411_v39 = vmin.f32 %v1402_v37, 0.0  ;;  %vm1407_vm13 = vcmp.gt.f32.partialorder %v1402_v37, 0.0 }
 0x3ad   :  { %v1410_v40 = vmin.f32 %v1374_v38, 0.0  ;;  %vm1406_vm15 = vcmp.gt.f32.partialorder %v1374_v38, 0.0 }
 0x3ae   :  { %v1418_v41 = vmul.f32 1.442695, %v1411_v39  ;;  %v2537_v43 = vpop.eup %2536 }
 0x3af   :  { %v1416_v42 = vmul.f32 1.442695, %v1410_v40  ;;  %v2539_v44 = vpop.eup %2538  ;;  %v2266_v45 = vadd.f32 -1.0, %v2537_v43 }
 0x3b0   :  { %2540 = vpow2.f32 %v1418_v41  ;;  %v2265_v47 = vadd.f32 -1.0, %v2539_v44 }
 0x3b1   :  { %2542 = vpow2.f32 %v1416_v42  ;;  %v1425_v51 = vsel %vm1405_vm12, %v1400_v25, %v2266_v45 }
 0x3b2   :  { %v1424_v53 = vsel %vm1404_vm14, %v1372_v26, %v2265_v47 }
 0x3b6   :  { %v2541_v46 = vpop.eup %2540 }
 0x3b7   :  { %v2543_v48 = vpop.eup %2542  ;;  %v2268_v49 = vadd.f32 -1.0, %v2541_v46 }
 0x3b8   :  { %v2267_v50 = vadd.f32 -1.0, %v2543_v48 }
 0x3b9   :  { %v1427_v52 = vsel %vm1407_vm13, %v1402_v37, %v2268_v49 }
 0x3ba   :  { %v1426_v54 = vsel %vm1406_vm15, %v1374_v38, %v2267_v50  ;;  %v1462_v55 = vpack.c.bf16 %v1427_v52, %v1425_v51 }
 0x3bb   :  { %v1461_v56 = vpack.c.bf16 %v1426_v54, %v1424_v53 }
 0x3bc   :  { %1586 = vmatmul.bf16.vlgmr.msrb.gmra.mxu0 %v1462_v55 }
 0x3bd   :  { %1572 = vmatmul.bf16.vlgmr.msra.gmra.mxu3 %v1461_v56 }
 0x439   :  { %v1587_v60 = vpop.f32.mrf.mxu0 }
 0x440   :  { %v1573_v61 = vpop.f32.mrf.mxu3 }
 0x441   :  { %v1574_v62 = vadd.f32 %v2515_v58, %v1573_v61  ;;  %v1589_v6 = vpop.f32.mrf.mxu0 }
 0x443   :  { %v1588_v1 = vadd.f32 %v1587_v60, %v1574_v62 }
 0x445   :  { %v1613_v2 = vsel %vm1602_vm0, %v1606_v63, %v1588_v1 }
 0x446   :  { %v1626_v3 = vsel %vm1615_vm1, %v1619_v0, %v1613_v2 }
 0x447   :  { %1628 = vst [vmem:[#allocation10] sm:$0xff] %v1626_v3 }
 0x448   :  { %v1575_v4 = vpop.f32.mrf.mxu3 }
 0x449   :  { %v1576_v5 = vadd.f32 %v2515_v58, %v1575_v4 }
 0x44b   :  { %v1590_v7 = vadd.f32 %v1589_v6, %v1576_v5 }
 0x44d   :  { %v1614_v10 = vsel %vm1602_vm0, %v1611_v8, %v1590_v7 }
 0x44e   :  { %v1627_v11 = vsel %vm1615_vm1, %v1624_v9, %v1614_v10 }
 0x44f   :  { %1629 = vst [vmem:[#allocation10 + $0x8] sm:$0xff] %v1627_v11 }
 0x450   :  { %1642 = dma.vmem_to_hbm [thread:$0]  %s1635_s11, 256, %s1637_s14, [#allocation4], %s2661_s23, %s2661_s23, %s2662_s24  }
 0x451   :  { %2658 = dma.done.wait [#allocation4], 256  }
 0x452   :  { %2659 = vsyncadd [#allocation4], 4294967040 }
 0x453   :  { %1647 = vsyncpa [#allocation3], 1 }
 0x454   :  { %1648 = vsyncpa [#allocation7], 1 }
 0x455   :  { %1649 = vsyncpa [#allocation4], 1 }
 0x456   :  { %1650 = vsyncpa [#allocation5], 1 }

</bundles_post_ra>
